<compile_context>
chip_gen: v7x
topology: tpu7x:2x2x1
jax: 0.10.0
libtpu: 0.0.40
codegen_flags: <defaults>
</compile_context>

<pallas_src>
import jax
import jax.numpy as jnp
from jax.experimental import pallas as pl
from jax.experimental.pallas import tpu as pltpu

# ---- shapes fixed by the PyTorch module -------------------------------------
D, H, W = 20, 20, 79            # Conv3d(1, 50, (20,20,3)) -> (N, 50, 1, 1, 77)
KW = 3
DH = D * H                      # 400
T_CONV = W - KW + 1             # 77
T_POOL = 25                     # MaxPool1d(3, stride=3, dilation=2) on 77 -> 25
C_OUT = 50
C2 = 2 * C_OUT                  # forward + flipped channels = 100
C_PAD = 128                     # channel dim padded to one full lane tile
H1 = 512
H2 = 100
H2_PAD = 128                    # fc2 output / fc3 input padded to a lane tile
NCLS = 15
DROP_P = 0.5                    # F.dropout default p (module's dropout_p unused in forward)


# ---- fused kernel: one batch sample per grid step ----------------------------
def _fused_kernel(xs_ref, wc_ref, bc_ref, w1_ref, b1_ref, w2_ref, b2_ref,
                  w3_ref, b3_ref, m1_ref, m2_ref, o_ref):
    xs = xs_ref[0]                                                      # (79, 400) bf16

    # Conv3d(1,50,(20,20,3)), forward + W-flipped branch in one 128-wide matmul:
    # cols 0:50 forward taps, 50:100 kw-reversed taps (== flipped conv, time-reversed;
    # the reversal is folded into w1's row grouping), 100:128 zero pad.  Three
    # full-height matmuls, then shift-add of the narrow (79,128) outputs so the
    # 400-lane input slab is never sliced at a sublane offset.
    f0 = jnp.dot(xs, wc_ref[0], preferred_element_type=jnp.float32)     # (79, 128)
    f1 = jnp.dot(xs, wc_ref[1], preferred_element_type=jnp.float32)
    f2 = jnp.dot(xs, wc_ref[2], preferred_element_type=jnp.float32)
    acc = f0[0:T_CONV] + f1[1:1 + T_CONV] + f2[2:2 + T_CONV] + bc_ref[...]   # (77, 128)

    # MaxPool1d(3, stride=3, dilation=2): out[i] = max(acc[3i], acc[3i+2], acc[3i+4]);
    # the stride-3 row pick is a tiny exact 0/1 matmul (no strided value loads).
    m3 = jnp.maximum(jnp.maximum(acc[0:T_CONV - 4], acc[2:T_CONV - 2]),
                     acc[4:T_CONV])                                      # (73, 128)
    r_io = jax.lax.broadcasted_iota(jnp.int32, (T_POOL, T_CONV - 4), 0)
    c_io = jax.lax.broadcasted_iota(jnp.int32, (T_POOL, T_CONV - 4), 1)
    sel = (c_io == 3 * r_io).astype(jnp.float32)                         # (25, 73)
    pooled = jnp.dot(sel, m3, preferred_element_type=jnp.float32)        # (25, 128)
    pooled = jnp.maximum(pooled, 0.0).astype(jnp.bfloat16)               # ReLU

    # fc1 over the padded 25*128 feature space, accumulated as 25 lane-aligned K=128
    # matmuls (torch's channel-major flatten and the flipped branch's time reversal
    # are absorbed into w1_ref's (25,128,512) row grouping, built in init_params).
    h1 = jnp.zeros((1, H1), jnp.float32)
    for i in range(T_POOL):
        h1 = h1 + jnp.dot(pooled[i:i + 1, :], w1_ref[i],
                          preferred_element_type=jnp.float32)
    h1 = h1 + b1_ref[...]
    h1 = (jnp.maximum(h1, 0.0) * m1_ref[0]).astype(jnp.bfloat16)         # ReLU + dropout

    h2 = jnp.dot(h1, w2_ref[...], preferred_element_type=jnp.float32) + b2_ref[...]
    h2 = (jnp.maximum(h2, 0.0) * m2_ref[0]).astype(jnp.bfloat16)         # ReLU + dropout

    o_ref[0] = jnp.dot(h2, w3_ref[...], preferred_element_type=jnp.float32) + b3_ref[...]


def fused_forward(xs, wcat, bcat, w1g, b1, w2, b2, w3, b3, m1, m2):
    n = xs.shape[0]

    def const_spec(a):                     # weights: resident, DMA'd once
        nd = a.ndim
        return pl.BlockSpec(a.shape, lambda b, _nd=nd: (0,) * _nd)

    def per_sample_spec(a):                # streamed per grid step
        nd = a.ndim
        return pl.BlockSpec((1,) + a.shape[1:],
                            lambda b, _nd=nd: (b,) + (0,) * (_nd - 1))

    flops_per_sample = 2 * (KW * W * DH * C_PAD                # conv taps
                            + T_POOL * (T_CONV - 4) * C_PAD    # stride-3 select
                            + T_POOL * C_PAD * H1              # fc1
                            + H1 * H2_PAD + H2_PAD * NCLS)     # fc2 + fc3
    weight_bytes = (wcat.size + w1g.size + w2.size + w3.size) * 2 \
                   + (bcat.size + b1.size + b2.size + b3.size) * 4
    io_bytes = xs.size * 2 + (m1.size + m2.size) * 4 + n * NCLS * 4
    cost = pl.CostEstimate(flops=n * flops_per_sample, transcendentals=0,
                           bytes_accessed=weight_bytes + io_bytes)

    return pl.pallas_call(
        _fused_kernel,
        out_shape=jax.ShapeDtypeStruct((n, 1, NCLS), jnp.float32),
        grid=(n,),
        in_specs=[per_sample_spec(xs),
                  const_spec(wcat), const_spec(bcat), const_spec(w1g), const_spec(b1),
                  const_spec(w2), const_spec(b2), const_spec(w3), const_spec(b3),
                  per_sample_spec(m1), per_sample_spec(m2)],
        out_specs=pl.BlockSpec((1, 1, NCLS), lambda b: (b, 0, 0)),
        compiler_params=pltpu.CompilerParams(
            dimension_semantics=("parallel",),
            # resident weights ~3.7 MB bf16 (x2 buffers) + per-step slabs: well under
            # the 32 MiB scoped limit on every generation, incl. v7x (64 MiB physical).
            vmem_limit_bytes=32 * 1024 * 1024,
        ),
        cost_estimate=cost,
    )(xs, wcat, bcat, w1g, b1, w2, b2, w3, b3, m1, m2)


# ---- glue ---------------------------------------------------------------------
def forward(x, params, dropout_key):
    # x: (N, 1, D, H, W) float32, PyTorch NCDHW layout.
    n = x.shape[0]
    # One small transpose in glue: (N, W, D*H) so the conv becomes shifted matmuls;
    # cast to bf16 for the MXU (f32 accumulation inside the kernel).
    xs = jnp.transpose(x[:, 0], (0, 3, 1, 2)).reshape(n, W, DH).astype(jnp.bfloat16)

    # F.dropout(p=0.5, training=True): pre-scaled {0, 1/keep} masks via jax.random
    # (statistically equivalent to torch's RNG stream, not bit-identical).
    k1, k2 = jax.random.split(dropout_key)
    keep = 1.0 - DROP_P
    m1 = jax.random.bernoulli(k1, keep, (n, 1, H1)).astype(jnp.float32) / keep
    m2 = jax.random.bernoulli(k2, keep, (n, 1, H2_PAD)).astype(jnp.float32) / keep

    out = fused_forward(xs, params["wcat"], params["bcat"], params["w1g"],
                        params["b1"], params["w2"], params["b2"],
                        params["w3"], params["b3"], m1, m2)
    return out.reshape(n, NCLS)


def init_params(key):
    ks = jax.random.split(key, 8)
    conv_w = jax.random.normal(ks[0], (C_OUT, 1, D, H, KW), jnp.float32) / jnp.sqrt(DH * KW)
    conv_b = jax.random.normal(ks[1], (C_OUT,), jnp.float32) * 0.01
    # Linear weights stored as (in_features, out_features) == torch weight.T.
    w1 = jax.random.normal(ks[2], (C2 * T_POOL, H1), jnp.float32) / jnp.sqrt(C2 * T_POOL)
    b1 = jax.random.normal(ks[3], (1, H1), jnp.float32) * 0.01
    w2 = jax.random.normal(ks[4], (H1, H2), jnp.float32) / jnp.sqrt(H1)
    b2 = jax.random.normal(ks[5], (1, H2), jnp.float32) * 0.01
    w3 = jax.random.normal(ks[6], (H2, NCLS), jnp.float32) / jnp.sqrt(H2)
    b3 = jax.random.normal(ks[7], (1, NCLS), jnp.float32) * 0.01

    # --- one-time kernel-layout prep (at parameter setup, not per call) -------
    # Conv weight as (kw, d*h, c): cols 0:50 forward taps, 50:100 kw-reversed taps
    # (flipped branch), 100:128 zero pad so every lane dimension is 128-aligned.
    wk = jnp.transpose(conv_w[:, 0], (3, 1, 2, 0)).reshape(KW, DH, C_OUT)        # (3,400,50)
    wcat = jnp.concatenate(
        [wk, wk[::-1], jnp.zeros((KW, DH, C_PAD - C2), jnp.float32)], axis=-1)    # (3,400,128)
    bcat = jnp.concatenate(
        [conv_b, conv_b, jnp.zeros((C_PAD - C2,), jnp.float32)]).reshape(1, C_PAD)

    # fc1 weight regrouped to (25, 128, 512): entry [i, c] is torch row c*25 + t_src,
    # where t_src = i for forward channels (c < 50) and 24 - i for flipped channels
    # (50 <= c < 100; absorbs the flipped branch's time reversal).  Rows for the
    # zero-padded channels c >= 100 are zero.
    i_g = jnp.arange(T_POOL)[:, None]                          # (25, 1)
    c_g = jnp.arange(C_PAD)[None, :]                           # (1, 128)
    t_src = jnp.where(c_g < C_OUT, i_g, (T_POOL - 1) - i_g)    # (25, 128)
    rows = jnp.where(c_g < C2, c_g * T_POOL + t_src, 0)        # (25, 128)
    w1g = w1[rows.reshape(-1)].reshape(T_POOL, C_PAD, H1)
    w1g = jnp.where((c_g < C2)[..., None], w1g, 0.0)           # zero the pad rows

    # fc2 output / fc3 input padded 100 -> 128 with zeros (padded h2 columns stay
    # exactly 0 through ReLU/dropout, and the matching w3 rows are zero as well).
    w2p = jnp.pad(w2, ((0, 0), (0, H2_PAD - H2)))
    b2p = jnp.pad(b2, ((0, 0), (0, H2_PAD - H2)))
    w3p = jnp.pad(w3, ((0, H2_PAD - H2), (0, 0)))

    # Matmul operands as bfloat16 (halves weight HBM traffic, fast MXU path); biases f32.
    return {
        "wcat": wcat.astype(jnp.bfloat16),
        "bcat": bcat,
        "w1g": w1g.astype(jnp.bfloat16),
        "b1": b1,
        "w2": w2p.astype(jnp.bfloat16),
        "b2": b2p,
        "w3": w3p.astype(jnp.bfloat16),
        "b3": b3,
    }


if __name__ == "__main__":
    key = jax.random.PRNGKey(0)
    xkey, pkey, dkey = jax.random.split(key, 3)
    # Spatial shape is fixed by the module (fc1 expects 100*25 features): (N,1,20,20,79).
    x = jax.random.normal(xkey, (2, 1, D, H, W), jnp.float32)
    params = init_params(pkey)

    out = jax.jit(forward)(x, params, dkey)
    out = jax.block_until_ready(out)
    assert out.shape == (2, NCLS), out.shape
    assert bool(jnp.all(jnp.isfinite(out)))
    print("KERNEL_OK")
</pallas_src>

<mosaic_0001>
module attributes {stable_mosaic.version = 11 : i64} {
  func.func @_fused_kernel(%arg0: i32, %arg1: memref<1x79x400xbf16, #tpu.memory_space<vmem>>, %arg2: memref<3x400x128xbf16, #tpu.memory_space<vmem>>, %arg3: memref<1x128xf32, #tpu.memory_space<vmem>>, %arg4: memref<25x128x512xbf16, #tpu.memory_space<vmem>>, %arg5: memref<1x512xf32, #tpu.memory_space<vmem>>, %arg6: memref<512x128xbf16, #tpu.memory_space<vmem>>, %arg7: memref<1x128xf32, #tpu.memory_space<vmem>>, %arg8: memref<128x15xbf16, #tpu.memory_space<vmem>>, %arg9: memref<1x15xf32, #tpu.memory_space<vmem>>, %arg10: memref<1x1x512xf32, #tpu.memory_space<vmem>>, %arg11: memref<1x1x128xf32, #tpu.memory_space<vmem>>, %arg12: memref<1x1x15xf32, #tpu.memory_space<vmem>>) attributes {dimension_semantics = [#tpu.dimension_semantics<parallel>], iteration_bounds = array<i64: 2>, scalar_prefetch = 0 : i64, scratch_operands = 0 : i64, tpu.core_type = #tpu.core_type<tc>, window_params = [{transform_indices = @transform_0, window_bounds = array<i64: 1, 79, 400>}, {pipeline_mode = #tpu.pipeline_mode<synchronous>, transform_indices = @transform_1, window_bounds = array<i64: 3, 400, 128>}, {pipeline_mode = #tpu.pipeline_mode<synchronous>, transform_indices = @transform_2, window_bounds = array<i64: 1, 128>}, {pipeline_mode = #tpu.pipeline_mode<synchronous>, transform_indices = @transform_3, window_bounds = array<i64: 25, 128, 512>}, {pipeline_mode = #tpu.pipeline_mode<synchronous>, transform_indices = @transform_4, window_bounds = array<i64: 1, 512>}, {pipeline_mode = #tpu.pipeline_mode<synchronous>, transform_indices = @transform_5, window_bounds = array<i64: 512, 128>}, {pipeline_mode = #tpu.pipeline_mode<synchronous>, transform_indices = @transform_6, window_bounds = array<i64: 1, 128>}, {pipeline_mode = #tpu.pipeline_mode<synchronous>, transform_indices = @transform_7, window_bounds = array<i64: 128, 15>}, {pipeline_mode = #tpu.pipeline_mode<synchronous>, transform_indices = @transform_8, window_bounds = array<i64: 1, 15>}, {transform_indices = @transform_9, window_bounds = array<i64: 1, 1, 512>}, {transform_indices = @transform_10, window_bounds = array<i64: 1, 1, 128>}, {transform_indices = @transform_11, window_bounds = array<i64: 1, 1, 15>}]} {
    %c0 = arith.constant 0 : index
    %c0_0 = arith.constant 0 : index
    %c0_1 = arith.constant 0 : index
    %0 = vector.load %arg1[%c0, %c0_0, %c0_1] : memref<1x79x400xbf16, #tpu.memory_space<vmem>>, vector<1x79x400xbf16>
    %1 = vector.shape_cast %0 : vector<1x79x400xbf16> to vector<79x400xbf16>
    %c0_2 = arith.constant 0 : index
    %c0_3 = arith.constant 0 : index
    %c0_4 = arith.constant 0 : index
    %2 = vector.load %arg2[%c0_2, %c0_3, %c0_4] : memref<3x400x128xbf16, #tpu.memory_space<vmem>>, vector<1x400x128xbf16>
    %3 = vector.shape_cast %2 : vector<1x400x128xbf16> to vector<400x128xbf16>
    %cst = arith.constant dense<0.000000e+00> : vector<79x128xf32>
    %4 = tpu.matmul %1, %3, %cst {dimension_numbers = #tpu.dot_dimension_numbers<[1], [0], [0], [1], [0, 0, 1, 1], [], []>} : vector<79x400xbf16>, vector<400x128xbf16>, vector<79x128xf32> -> vector<79x128xf32>
    %c1 = arith.constant 1 : index
    %c0_5 = arith.constant 0 : index
    %c0_6 = arith.constant 0 : index
    %5 = vector.load %arg2[%c1, %c0_5, %c0_6] : memref<3x400x128xbf16, #tpu.memory_space<vmem>>, vector<1x400x128xbf16>
    %6 = vector.shape_cast %5 : vector<1x400x128xbf16> to vector<400x128xbf16>
    %cst_7 = arith.constant dense<0.000000e+00> : vector<79x128xf32>
    %7 = tpu.matmul %1, %6, %cst_7 {dimension_numbers = #tpu.dot_dimension_numbers<[1], [0], [0], [1], [0, 0, 1, 1], [], []>} : vector<79x400xbf16>, vector<400x128xbf16>, vector<79x128xf32> -> vector<79x128xf32>
    %c2 = arith.constant 2 : index
    %c0_8 = arith.constant 0 : index
    %c0_9 = arith.constant 0 : index
    %8 = vector.load %arg2[%c2, %c0_8, %c0_9] : memref<3x400x128xbf16, #tpu.memory_space<vmem>>, vector<1x400x128xbf16>
    %9 = vector.shape_cast %8 : vector<1x400x128xbf16> to vector<400x128xbf16>
    %cst_10 = arith.constant dense<0.000000e+00> : vector<79x128xf32>
    %10 = tpu.matmul %1, %9, %cst_10 {dimension_numbers = #tpu.dot_dimension_numbers<[1], [0], [0], [1], [0, 0, 1, 1], [], []>} : vector<79x400xbf16>, vector<400x128xbf16>, vector<79x128xf32> -> vector<79x128xf32>
    %11 = vector.extract_strided_slice %4 {offsets = [0, 0], sizes = [77, 128], strides = [1, 1]} : vector<79x128xf32> to vector<77x128xf32>
    %12 = vector.extract_strided_slice %7 {offsets = [1, 0], sizes = [77, 128], strides = [1, 1]} : vector<79x128xf32> to vector<77x128xf32>
    %13 = arith.addf %11, %12 : vector<77x128xf32>
    %14 = vector.extract_strided_slice %10 {offsets = [2, 0], sizes = [77, 128], strides = [1, 1]} : vector<79x128xf32> to vector<77x128xf32>
    %15 = arith.addf %13, %14 : vector<77x128xf32>
    %c0_11 = arith.constant 0 : index
    %c0_12 = arith.constant 0 : index
    %16 = vector.load %arg3[%c0_11, %c0_12] : memref<1x128xf32, #tpu.memory_space<vmem>>, vector<1x128xf32>
    %17 = vector.broadcast %16 : vector<1x128xf32> to vector<77x128xf32>
    %18 = arith.addf %15, %17 : vector<77x128xf32>
    %19 = vector.extract_strided_slice %18 {offsets = [0, 0], sizes = [73, 128], strides = [1, 1]} : vector<77x128xf32> to vector<73x128xf32>
    %20 = vector.extract_strided_slice %18 {offsets = [2, 0], sizes = [73, 128], strides = [1, 1]} : vector<77x128xf32> to vector<73x128xf32>
    %21 = arith.maximumf %19, %20 : vector<73x128xf32>
    %22 = vector.extract_strided_slice %18 {offsets = [4, 0], sizes = [73, 128], strides = [1, 1]} : vector<77x128xf32> to vector<73x128xf32>
    %23 = arith.maximumf %21, %22 : vector<73x128xf32>
    %24 = tpu.iota {dimensions = array<i32: 0>} : vector<25x73xi32>
    %25 = tpu.iota {dimensions = array<i32: 1>} : vector<25x73xi32>
    %c3_i32 = arith.constant 3 : i32
    %26 = vector.broadcast %c3_i32 : i32 to vector<25x73xi32>
    %27 = arith.muli %26, %24 : vector<25x73xi32>
    %28 = arith.cmpi eq, %25, %27 : vector<25x73xi32>
    %29 = arith.extui %28 : vector<25x73xi1> to vector<25x73xi32>
    %30 = arith.sitofp %29 : vector<25x73xi32> to vector<25x73xf32>
    %cst_13 = arith.constant dense<0.000000e+00> : vector<25x128xf32>
    %31 = tpu.matmul %30, %23, %cst_13 {dimension_numbers = #tpu.dot_dimension_numbers<[1], [0], [0], [1], [0, 0, 1, 1], [], []>} : vector<25x73xf32>, vector<73x128xf32>, vector<25x128xf32> -> vector<25x128xf32>
    %cst_14 = arith.constant 0.000000e+00 : f32
    %32 = vector.broadcast %cst_14 : f32 to vector<25x128xf32>
    %33 = arith.maximumf %31, %32 : vector<25x128xf32>
    %34 = arith.truncf %33 : vector<25x128xf32> to vector<25x128xbf16>
    %cst_15 = arith.constant 0.000000e+00 : f32
    %35 = vector.broadcast %cst_15 : f32 to vector<1x512xf32>
    %36 = vector.extract_strided_slice %34 {offsets = [0, 0], sizes = [1, 128], strides = [1, 1]} : vector<25x128xbf16> to vector<1x128xbf16>
    %c0_16 = arith.constant 0 : index
    %c0_17 = arith.constant 0 : index
    %c0_18 = arith.constant 0 : index
    %37 = vector.load %arg4[%c0_16, %c0_17, %c0_18] : memref<25x128x512xbf16, #tpu.memory_space<vmem>>, vector<1x128x512xbf16>
    %38 = vector.shape_cast %37 : vector<1x128x512xbf16> to vector<128x512xbf16>
    %cst_19 = arith.constant dense<0.000000e+00> : vector<1x512xf32>
    %39 = tpu.matmul %36, %38, %cst_19 {dimension_numbers = #tpu.dot_dimension_numbers<[1], [0], [0], [1], [0, 0, 1, 1], [], []>} : vector<1x128xbf16>, vector<128x512xbf16>, vector<1x512xf32> -> vector<1x512xf32>
    %40 = arith.addf %35, %39 : vector<1x512xf32>
    %41 = vector.extract_strided_slice %34 {offsets = [1, 0], sizes = [1, 128], strides = [1, 1]} : vector<25x128xbf16> to vector<1x128xbf16>
    %c1_20 = arith.constant 1 : index
    %c0_21 = arith.constant 0 : index
    %c0_22 = arith.constant 0 : index
    %42 = vector.load %arg4[%c1_20, %c0_21, %c0_22] : memref<25x128x512xbf16, #tpu.memory_space<vmem>>, vector<1x128x512xbf16>
    %43 = vector.shape_cast %42 : vector<1x128x512xbf16> to vector<128x512xbf16>
    %cst_23 = arith.constant dense<0.000000e+00> : vector<1x512xf32>
    %44 = tpu.matmul %41, %43, %cst_23 {dimension_numbers = #tpu.dot_dimension_numbers<[1], [0], [0], [1], [0, 0, 1, 1], [], []>} : vector<1x128xbf16>, vector<128x512xbf16>, vector<1x512xf32> -> vector<1x512xf32>
    %45 = arith.addf %40, %44 : vector<1x512xf32>
    %46 = vector.extract_strided_slice %34 {offsets = [2, 0], sizes = [1, 128], strides = [1, 1]} : vector<25x128xbf16> to vector<1x128xbf16>
    %c2_24 = arith.constant 2 : index
    %c0_25 = arith.constant 0 : index
    %c0_26 = arith.constant 0 : index
    %47 = vector.load %arg4[%c2_24, %c0_25, %c0_26] : memref<25x128x512xbf16, #tpu.memory_space<vmem>>, vector<1x128x512xbf16>
    %48 = vector.shape_cast %47 : vector<1x128x512xbf16> to vector<128x512xbf16>
    %cst_27 = arith.constant dense<0.000000e+00> : vector<1x512xf32>
    %49 = tpu.matmul %46, %48, %cst_27 {dimension_numbers = #tpu.dot_dimension_numbers<[1], [0], [0], [1], [0, 0, 1, 1], [], []>} : vector<1x128xbf16>, vector<128x512xbf16>, vector<1x512xf32> -> vector<1x512xf32>
    %50 = arith.addf %45, %49 : vector<1x512xf32>
    %51 = vector.extract_strided_slice %34 {offsets = [3, 0], sizes = [1, 128], strides = [1, 1]} : vector<25x128xbf16> to vector<1x128xbf16>
    %c3 = arith.constant 3 : index
    %c0_28 = arith.constant 0 : index
    %c0_29 = arith.constant 0 : index
    %52 = vector.load %arg4[%c3, %c0_28, %c0_29] : memref<25x128x512xbf16, #tpu.memory_space<vmem>>, vector<1x128x512xbf16>
    %53 = vector.shape_cast %52 : vector<1x128x512xbf16> to vector<128x512xbf16>
    %cst_30 = arith.constant dense<0.000000e+00> : vector<1x512xf32>
    %54 = tpu.matmul %51, %53, %cst_30 {dimension_numbers = #tpu.dot_dimension_numbers<[1], [0], [0], [1], [0, 0, 1, 1], [], []>} : vector<1x128xbf16>, vector<128x512xbf16>, vector<1x512xf32> -> vector<1x512xf32>
    %55 = arith.addf %50, %54 : vector<1x512xf32>
    %56 = vector.extract_strided_slice %34 {offsets = [4, 0], sizes = [1, 128], strides = [1, 1]} : vector<25x128xbf16> to vector<1x128xbf16>
    %c4 = arith.constant 4 : index
    %c0_31 = arith.constant 0 : index
    %c0_32 = arith.constant 0 : index
    %57 = vector.load %arg4[%c4, %c0_31, %c0_32] : memref<25x128x512xbf16, #tpu.memory_space<vmem>>, vector<1x128x512xbf16>
    %58 = vector.shape_cast %57 : vector<1x128x512xbf16> to vector<128x512xbf16>
    %cst_33 = arith.constant dense<0.000000e+00> : vector<1x512xf32>
    %59 = tpu.matmul %56, %58, %cst_33 {dimension_numbers = #tpu.dot_dimension_numbers<[1], [0], [0], [1], [0, 0, 1, 1], [], []>} : vector<1x128xbf16>, vector<128x512xbf16>, vector<1x512xf32> -> vector<1x512xf32>
    %60 = arith.addf %55, %59 : vector<1x512xf32>
    %61 = vector.extract_strided_slice %34 {offsets = [5, 0], sizes = [1, 128], strides = [1, 1]} : vector<25x128xbf16> to vector<1x128xbf16>
    %c5 = arith.constant 5 : index
    %c0_34 = arith.constant 0 : index
    %c0_35 = arith.constant 0 : index
    %62 = vector.load %arg4[%c5, %c0_34, %c0_35] : memref<25x128x512xbf16, #tpu.memory_space<vmem>>, vector<1x128x512xbf16>
    %63 = vector.shape_cast %62 : vector<1x128x512xbf16> to vector<128x512xbf16>
    %cst_36 = arith.constant dense<0.000000e+00> : vector<1x512xf32>
    %64 = tpu.matmul %61, %63, %cst_36 {dimension_numbers = #tpu.dot_dimension_numbers<[1], [0], [0], [1], [0, 0, 1, 1], [], []>} : vector<1x128xbf16>, vector<128x512xbf16>, vector<1x512xf32> -> vector<1x512xf32>
    %65 = arith.addf %60, %64 : vector<1x512xf32>
    %66 = vector.extract_strided_slice %34 {offsets = [6, 0], sizes = [1, 128], strides = [1, 1]} : vector<25x128xbf16> to vector<1x128xbf16>
    %c6 = arith.constant 6 : index
    %c0_37 = arith.constant 0 : index
    %c0_38 = arith.constant 0 : index
    %67 = vector.load %arg4[%c6, %c0_37, %c0_38] : memref<25x128x512xbf16, #tpu.memory_space<vmem>>, vector<1x128x512xbf16>
    %68 = vector.shape_cast %67 : vector<1x128x512xbf16> to vector<128x512xbf16>
    %cst_39 = arith.constant dense<0.000000e+00> : vector<1x512xf32>
    %69 = tpu.matmul %66, %68, %cst_39 {dimension_numbers = #tpu.dot_dimension_numbers<[1], [0], [0], [1], [0, 0, 1, 1], [], []>} : vector<1x128xbf16>, vector<128x512xbf16>, vector<1x512xf32> -> vector<1x512xf32>
    %70 = arith.addf %65, %69 : vector<1x512xf32>
    %71 = vector.extract_strided_slice %34 {offsets = [7, 0], sizes = [1, 128], strides = [1, 1]} : vector<25x128xbf16> to vector<1x128xbf16>
    %c7 = arith.constant 7 : index
    %c0_40 = arith.constant 0 : index
    %c0_41 = arith.constant 0 : index
    %72 = vector.load %arg4[%c7, %c0_40, %c0_41] : memref<25x128x512xbf16, #tpu.memory_space<vmem>>, vector<1x128x512xbf16>
    %73 = vector.shape_cast %72 : vector<1x128x512xbf16> to vector<128x512xbf16>
    %cst_42 = arith.constant dense<0.000000e+00> : vector<1x512xf32>
    %74 = tpu.matmul %71, %73, %cst_42 {dimension_numbers = #tpu.dot_dimension_numbers<[1], [0], [0], [1], [0, 0, 1, 1], [], []>} : vector<1x128xbf16>, vector<128x512xbf16>, vector<1x512xf32> -> vector<1x512xf32>
    %75 = arith.addf %70, %74 : vector<1x512xf32>
    %76 = vector.extract_strided_slice %34 {offsets = [8, 0], sizes = [1, 128], strides = [1, 1]} : vector<25x128xbf16> to vector<1x128xbf16>
    %c8 = arith.constant 8 : index
    %c0_43 = arith.constant 0 : index
    %c0_44 = arith.constant 0 : index
    %77 = vector.load %arg4[%c8, %c0_43, %c0_44] : memref<25x128x512xbf16, #tpu.memory_space<vmem>>, vector<1x128x512xbf16>
    %78 = vector.shape_cast %77 : vector<1x128x512xbf16> to vector<128x512xbf16>
    %cst_45 = arith.constant dense<0.000000e+00> : vector<1x512xf32>
    %79 = tpu.matmul %76, %78, %cst_45 {dimension_numbers = #tpu.dot_dimension_numbers<[1], [0], [0], [1], [0, 0, 1, 1], [], []>} : vector<1x128xbf16>, vector<128x512xbf16>, vector<1x512xf32> -> vector<1x512xf32>
    %80 = arith.addf %75, %79 : vector<1x512xf32>
    %81 = vector.extract_strided_slice %34 {offsets = [9, 0], sizes = [1, 128], strides = [1, 1]} : vector<25x128xbf16> to vector<1x128xbf16>
    %c9 = arith.constant 9 : index
    %c0_46 = arith.constant 0 : index
    %c0_47 = arith.constant 0 : index
    %82 = vector.load %arg4[%c9, %c0_46, %c0_47] : memref<25x128x512xbf16, #tpu.memory_space<vmem>>, vector<1x128x512xbf16>
    %83 = vector.shape_cast %82 : vector<1x128x512xbf16> to vector<128x512xbf16>
    %cst_48 = arith.constant dense<0.000000e+00> : vector<1x512xf32>
    %84 = tpu.matmul %81, %83, %cst_48 {dimension_numbers = #tpu.dot_dimension_numbers<[1], [0], [0], [1], [0, 0, 1, 1], [], []>} : vector<1x128xbf16>, vector<128x512xbf16>, vector<1x512xf32> -> vector<1x512xf32>
    %85 = arith.addf %80, %84 : vector<1x512xf32>
    %86 = vector.extract_strided_slice %34 {offsets = [10, 0], sizes = [1, 128], strides = [1, 1]} : vector<25x128xbf16> to vector<1x128xbf16>
    %c10 = arith.constant 10 : index
    %c0_49 = arith.constant 0 : index
    %c0_50 = arith.constant 0 : index
    %87 = vector.load %arg4[%c10, %c0_49, %c0_50] : memref<25x128x512xbf16, #tpu.memory_space<vmem>>, vector<1x128x512xbf16>
    %88 = vector.shape_cast %87 : vector<1x128x512xbf16> to vector<128x512xbf16>
    %cst_51 = arith.constant dense<0.000000e+00> : vector<1x512xf32>
    %89 = tpu.matmul %86, %88, %cst_51 {dimension_numbers = #tpu.dot_dimension_numbers<[1], [0], [0], [1], [0, 0, 1, 1], [], []>} : vector<1x128xbf16>, vector<128x512xbf16>, vector<1x512xf32> -> vector<1x512xf32>
    %90 = arith.addf %85, %89 : vector<1x512xf32>
    %91 = vector.extract_strided_slice %34 {offsets = [11, 0], sizes = [1, 128], strides = [1, 1]} : vector<25x128xbf16> to vector<1x128xbf16>
    %c11 = arith.constant 11 : index
    %c0_52 = arith.constant 0 : index
    %c0_53 = arith.constant 0 : index
    %92 = vector.load %arg4[%c11, %c0_52, %c0_53] : memref<25x128x512xbf16, #tpu.memory_space<vmem>>, vector<1x128x512xbf16>
    %93 = vector.shape_cast %92 : vector<1x128x512xbf16> to vector<128x512xbf16>
    %cst_54 = arith.constant dense<0.000000e+00> : vector<1x512xf32>
    %94 = tpu.matmul %91, %93, %cst_54 {dimension_numbers = #tpu.dot_dimension_numbers<[1], [0], [0], [1], [0, 0, 1, 1], [], []>} : vector<1x128xbf16>, vector<128x512xbf16>, vector<1x512xf32> -> vector<1x512xf32>
    %95 = arith.addf %90, %94 : vector<1x512xf32>
    %96 = vector.extract_strided_slice %34 {offsets = [12, 0], sizes = [1, 128], strides = [1, 1]} : vector<25x128xbf16> to vector<1x128xbf16>
    %c12 = arith.constant 12 : index
    %c0_55 = arith.constant 0 : index
    %c0_56 = arith.constant 0 : index
    %97 = vector.load %arg4[%c12, %c0_55, %c0_56] : memref<25x128x512xbf16, #tpu.memory_space<vmem>>, vector<1x128x512xbf16>
    %98 = vector.shape_cast %97 : vector<1x128x512xbf16> to vector<128x512xbf16>
    %cst_57 = arith.constant dense<0.000000e+00> : vector<1x512xf32>
    %99 = tpu.matmul %96, %98, %cst_57 {dimension_numbers = #tpu.dot_dimension_numbers<[1], [0], [0], [1], [0, 0, 1, 1], [], []>} : vector<1x128xbf16>, vector<128x512xbf16>, vector<1x512xf32> -> vector<1x512xf32>
    %100 = arith.addf %95, %99 : vector<1x512xf32>
    %101 = vector.extract_strided_slice %34 {offsets = [13, 0], sizes = [1, 128], strides = [1, 1]} : vector<25x128xbf16> to vector<1x128xbf16>
    %c13 = arith.constant 13 : index
    %c0_58 = arith.constant 0 : index
    %c0_59 = arith.constant 0 : index
    %102 = vector.load %arg4[%c13, %c0_58, %c0_59] : memref<25x128x512xbf16, #tpu.memory_space<vmem>>, vector<1x128x512xbf16>
    %103 = vector.shape_cast %102 : vector<1x128x512xbf16> to vector<128x512xbf16>
    %cst_60 = arith.constant dense<0.000000e+00> : vector<1x512xf32>
    %104 = tpu.matmul %101, %103, %cst_60 {dimension_numbers = #tpu.dot_dimension_numbers<[1], [0], [0], [1], [0, 0, 1, 1], [], []>} : vector<1x128xbf16>, vector<128x512xbf16>, vector<1x512xf32> -> vector<1x512xf32>
    %105 = arith.addf %100, %104 : vector<1x512xf32>
    %106 = vector.extract_strided_slice %34 {offsets = [14, 0], sizes = [1, 128], strides = [1, 1]} : vector<25x128xbf16> to vector<1x128xbf16>
    %c14 = arith.constant 14 : index
    %c0_61 = arith.constant 0 : index
    %c0_62 = arith.constant 0 : index
    %107 = vector.load %arg4[%c14, %c0_61, %c0_62] : memref<25x128x512xbf16, #tpu.memory_space<vmem>>, vector<1x128x512xbf16>
    %108 = vector.shape_cast %107 : vector<1x128x512xbf16> to vector<128x512xbf16>
    %cst_63 = arith.constant dense<0.000000e+00> : vector<1x512xf32>
    %109 = tpu.matmul %106, %108, %cst_63 {dimension_numbers = #tpu.dot_dimension_numbers<[1], [0], [0], [1], [0, 0, 1, 1], [], []>} : vector<1x128xbf16>, vector<128x512xbf16>, vector<1x512xf32> -> vector<1x512xf32>
    %110 = arith.addf %105, %109 : vector<1x512xf32>
    %111 = vector.extract_strided_slice %34 {offsets = [15, 0], sizes = [1, 128], strides = [1, 1]} : vector<25x128xbf16> to vector<1x128xbf16>
    %c15 = arith.constant 15 : index
    %c0_64 = arith.constant 0 : index
    %c0_65 = arith.constant 0 : index
    %112 = vector.load %arg4[%c15, %c0_64, %c0_65] : memref<25x128x512xbf16, #tpu.memory_space<vmem>>, vector<1x128x512xbf16>
    %113 = vector.shape_cast %112 : vector<1x128x512xbf16> to vector<128x512xbf16>
    %cst_66 = arith.constant dense<0.000000e+00> : vector<1x512xf32>
    %114 = tpu.matmul %111, %113, %cst_66 {dimension_numbers = #tpu.dot_dimension_numbers<[1], [0], [0], [1], [0, 0, 1, 1], [], []>} : vector<1x128xbf16>, vector<128x512xbf16>, vector<1x512xf32> -> vector<1x512xf32>
    %115 = arith.addf %110, %114 : vector<1x512xf32>
    %116 = vector.extract_strided_slice %34 {offsets = [16, 0], sizes = [1, 128], strides = [1, 1]} : vector<25x128xbf16> to vector<1x128xbf16>
    %c16 = arith.constant 16 : index
    %c0_67 = arith.constant 0 : index
    %c0_68 = arith.constant 0 : index
    %117 = vector.load %arg4[%c16, %c0_67, %c0_68] : memref<25x128x512xbf16, #tpu.memory_space<vmem>>, vector<1x128x512xbf16>
    %118 = vector.shape_cast %117 : vector<1x128x512xbf16> to vector<128x512xbf16>
    %cst_69 = arith.constant dense<0.000000e+00> : vector<1x512xf32>
    %119 = tpu.matmul %116, %118, %cst_69 {dimension_numbers = #tpu.dot_dimension_numbers<[1], [0], [0], [1], [0, 0, 1, 1], [], []>} : vector<1x128xbf16>, vector<128x512xbf16>, vector<1x512xf32> -> vector<1x512xf32>
    %120 = arith.addf %115, %119 : vector<1x512xf32>
    %121 = vector.extract_strided_slice %34 {offsets = [17, 0], sizes = [1, 128], strides = [1, 1]} : vector<25x128xbf16> to vector<1x128xbf16>
    %c17 = arith.constant 17 : index
    %c0_70 = arith.constant 0 : index
    %c0_71 = arith.constant 0 : index
    %122 = vector.load %arg4[%c17, %c0_70, %c0_71] : memref<25x128x512xbf16, #tpu.memory_space<vmem>>, vector<1x128x512xbf16>
    %123 = vector.shape_cast %122 : vector<1x128x512xbf16> to vector<128x512xbf16>
    %cst_72 = arith.constant dense<0.000000e+00> : vector<1x512xf32>
    %124 = tpu.matmul %121, %123, %cst_72 {dimension_numbers = #tpu.dot_dimension_numbers<[1], [0], [0], [1], [0, 0, 1, 1], [], []>} : vector<1x128xbf16>, vector<128x512xbf16>, vector<1x512xf32> -> vector<1x512xf32>
    %125 = arith.addf %120, %124 : vector<1x512xf32>
    %126 = vector.extract_strided_slice %34 {offsets = [18, 0], sizes = [1, 128], strides = [1, 1]} : vector<25x128xbf16> to vector<1x128xbf16>
    %c18 = arith.constant 18 : index
    %c0_73 = arith.constant 0 : index
    %c0_74 = arith.constant 0 : index
    %127 = vector.load %arg4[%c18, %c0_73, %c0_74] : memref<25x128x512xbf16, #tpu.memory_space<vmem>>, vector<1x128x512xbf16>
    %128 = vector.shape_cast %127 : vector<1x128x512xbf16> to vector<128x512xbf16>
    %cst_75 = arith.constant dense<0.000000e+00> : vector<1x512xf32>
    %129 = tpu.matmul %126, %128, %cst_75 {dimension_numbers = #tpu.dot_dimension_numbers<[1], [0], [0], [1], [0, 0, 1, 1], [], []>} : vector<1x128xbf16>, vector<128x512xbf16>, vector<1x512xf32> -> vector<1x512xf32>
    %130 = arith.addf %125, %129 : vector<1x512xf32>
    %131 = vector.extract_strided_slice %34 {offsets = [19, 0], sizes = [1, 128], strides = [1, 1]} : vector<25x128xbf16> to vector<1x128xbf16>
    %c19 = arith.constant 19 : index
    %c0_76 = arith.constant 0 : index
    %c0_77 = arith.constant 0 : index
    %132 = vector.load %arg4[%c19, %c0_76, %c0_77] : memref<25x128x512xbf16, #tpu.memory_space<vmem>>, vector<1x128x512xbf16>
    %133 = vector.shape_cast %132 : vector<1x128x512xbf16> to vector<128x512xbf16>
    %cst_78 = arith.constant dense<0.000000e+00> : vector<1x512xf32>
    %134 = tpu.matmul %131, %133, %cst_78 {dimension_numbers = #tpu.dot_dimension_numbers<[1], [0], [0], [1], [0, 0, 1, 1], [], []>} : vector<1x128xbf16>, vector<128x512xbf16>, vector<1x512xf32> -> vector<1x512xf32>
    %135 = arith.addf %130, %134 : vector<1x512xf32>
    %136 = vector.extract_strided_slice %34 {offsets = [20, 0], sizes = [1, 128], strides = [1, 1]} : vector<25x128xbf16> to vector<1x128xbf16>
    %c20 = arith.constant 20 : index
    %c0_79 = arith.constant 0 : index
    %c0_80 = arith.constant 0 : index
    %137 = vector.load %arg4[%c20, %c0_79, %c0_80] : memref<25x128x512xbf16, #tpu.memory_space<vmem>>, vector<1x128x512xbf16>
    %138 = vector.shape_cast %137 : vector<1x128x512xbf16> to vector<128x512xbf16>
    %cst_81 = arith.constant dense<0.000000e+00> : vector<1x512xf32>
    %139 = tpu.matmul %136, %138, %cst_81 {dimension_numbers = #tpu.dot_dimension_numbers<[1], [0], [0], [1], [0, 0, 1, 1], [], []>} : vector<1x128xbf16>, vector<128x512xbf16>, vector<1x512xf32> -> vector<1x512xf32>
    %140 = arith.addf %135, %139 : vector<1x512xf32>
    %141 = vector.extract_strided_slice %34 {offsets = [21, 0], sizes = [1, 128], strides = [1, 1]} : vector<25x128xbf16> to vector<1x128xbf16>
    %c21 = arith.constant 21 : index
    %c0_82 = arith.constant 0 : index
    %c0_83 = arith.constant 0 : index
    %142 = vector.load %arg4[%c21, %c0_82, %c0_83] : memref<25x128x512xbf16, #tpu.memory_space<vmem>>, vector<1x128x512xbf16>
    %143 = vector.shape_cast %142 : vector<1x128x512xbf16> to vector<128x512xbf16>
    %cst_84 = arith.constant dense<0.000000e+00> : vector<1x512xf32>
    %144 = tpu.matmul %141, %143, %cst_84 {dimension_numbers = #tpu.dot_dimension_numbers<[1], [0], [0], [1], [0, 0, 1, 1], [], []>} : vector<1x128xbf16>, vector<128x512xbf16>, vector<1x512xf32> -> vector<1x512xf32>
    %145 = arith.addf %140, %144 : vector<1x512xf32>
    %146 = vector.extract_strided_slice %34 {offsets = [22, 0], sizes = [1, 128], strides = [1, 1]} : vector<25x128xbf16> to vector<1x128xbf16>
    %c22 = arith.constant 22 : index
    %c0_85 = arith.constant 0 : index
    %c0_86 = arith.constant 0 : index
    %147 = vector.load %arg4[%c22, %c0_85, %c0_86] : memref<25x128x512xbf16, #tpu.memory_space<vmem>>, vector<1x128x512xbf16>
    %148 = vector.shape_cast %147 : vector<1x128x512xbf16> to vector<128x512xbf16>
    %cst_87 = arith.constant dense<0.000000e+00> : vector<1x512xf32>
    %149 = tpu.matmul %146, %148, %cst_87 {dimension_numbers = #tpu.dot_dimension_numbers<[1], [0], [0], [1], [0, 0, 1, 1], [], []>} : vector<1x128xbf16>, vector<128x512xbf16>, vector<1x512xf32> -> vector<1x512xf32>
    %150 = arith.addf %145, %149 : vector<1x512xf32>
    %151 = vector.extract_strided_slice %34 {offsets = [23, 0], sizes = [1, 128], strides = [1, 1]} : vector<25x128xbf16> to vector<1x128xbf16>
    %c23 = arith.constant 23 : index
    %c0_88 = arith.constant 0 : index
    %c0_89 = arith.constant 0 : index
    %152 = vector.load %arg4[%c23, %c0_88, %c0_89] : memref<25x128x512xbf16, #tpu.memory_space<vmem>>, vector<1x128x512xbf16>
    %153 = vector.shape_cast %152 : vector<1x128x512xbf16> to vector<128x512xbf16>
    %cst_90 = arith.constant dense<0.000000e+00> : vector<1x512xf32>
    %154 = tpu.matmul %151, %153, %cst_90 {dimension_numbers = #tpu.dot_dimension_numbers<[1], [0], [0], [1], [0, 0, 1, 1], [], []>} : vector<1x128xbf16>, vector<128x512xbf16>, vector<1x512xf32> -> vector<1x512xf32>
    %155 = arith.addf %150, %154 : vector<1x512xf32>
    %156 = vector.extract_strided_slice %34 {offsets = [24, 0], sizes = [1, 128], strides = [1, 1]} : vector<25x128xbf16> to vector<1x128xbf16>
    %c24 = arith.constant 24 : index
    %c0_91 = arith.constant 0 : index
    %c0_92 = arith.constant 0 : index
    %157 = vector.load %arg4[%c24, %c0_91, %c0_92] : memref<25x128x512xbf16, #tpu.memory_space<vmem>>, vector<1x128x512xbf16>
    %158 = vector.shape_cast %157 : vector<1x128x512xbf16> to vector<128x512xbf16>
    %cst_93 = arith.constant dense<0.000000e+00> : vector<1x512xf32>
    %159 = tpu.matmul %156, %158, %cst_93 {dimension_numbers = #tpu.dot_dimension_numbers<[1], [0], [0], [1], [0, 0, 1, 1], [], []>} : vector<1x128xbf16>, vector<128x512xbf16>, vector<1x512xf32> -> vector<1x512xf32>
    %160 = arith.addf %155, %159 : vector<1x512xf32>
    %c0_94 = arith.constant 0 : index
    %c0_95 = arith.constant 0 : index
    %161 = vector.load %arg5[%c0_94, %c0_95] : memref<1x512xf32, #tpu.memory_space<vmem>>, vector<1x512xf32>
    %162 = arith.addf %160, %161 : vector<1x512xf32>
    %cst_96 = arith.constant 0.000000e+00 : f32
    %163 = vector.broadcast %cst_96 : f32 to vector<1x512xf32>
    %164 = arith.maximumf %162, %163 : vector<1x512xf32>
    %c0_97 = arith.constant 0 : index
    %c0_98 = arith.constant 0 : index
    %c0_99 = arith.constant 0 : index
    %165 = vector.load %arg10[%c0_97, %c0_98, %c0_99] : memref<1x1x512xf32, #tpu.memory_space<vmem>>, vector<1x1x512xf32>
    %166 = vector.shape_cast %165 : vector<1x1x512xf32> to vector<1x512xf32>
    %167 = arith.mulf %164, %166 : vector<1x512xf32>
    %168 = arith.truncf %167 : vector<1x512xf32> to vector<1x512xbf16>
    %c0_100 = arith.constant 0 : index
    %c0_101 = arith.constant 0 : index
    %169 = vector.load %arg6[%c0_100, %c0_101] : memref<512x128xbf16, #tpu.memory_space<vmem>>, vector<512x128xbf16>
    %cst_102 = arith.constant dense<0.000000e+00> : vector<1x128xf32>
    %170 = tpu.matmul %168, %169, %cst_102 {dimension_numbers = #tpu.dot_dimension_numbers<[1], [0], [0], [1], [0, 0, 1, 1], [], []>} : vector<1x512xbf16>, vector<512x128xbf16>, vector<1x128xf32> -> vector<1x128xf32>
    %c0_103 = arith.constant 0 : index
    %c0_104 = arith.constant 0 : index
    %171 = vector.load %arg7[%c0_103, %c0_104] : memref<1x128xf32, #tpu.memory_space<vmem>>, vector<1x128xf32>
    %172 = arith.addf %170, %171 : vector<1x128xf32>
    %cst_105 = arith.constant 0.000000e+00 : f32
    %173 = vector.broadcast %cst_105 : f32 to vector<1x128xf32>
    %174 = arith.maximumf %172, %173 : vector<1x128xf32>
    %c0_106 = arith.constant 0 : index
    %c0_107 = arith.constant 0 : index
    %c0_108 = arith.constant 0 : index
    %175 = vector.load %arg11[%c0_106, %c0_107, %c0_108] : memref<1x1x128xf32, #tpu.memory_space<vmem>>, vector<1x1x128xf32>
    %176 = vector.shape_cast %175 : vector<1x1x128xf32> to vector<1x128xf32>
    %177 = arith.mulf %174, %176 : vector<1x128xf32>
    %178 = arith.truncf %177 : vector<1x128xf32> to vector<1x128xbf16>
    %c0_109 = arith.constant 0 : index
    %c0_110 = arith.constant 0 : index
    %179 = vector.load %arg8[%c0_109, %c0_110] : memref<128x15xbf16, #tpu.memory_space<vmem>>, vector<128x15xbf16>
    %cst_111 = arith.constant dense<0.000000e+00> : vector<1x15xf32>
    %180 = tpu.matmul %178, %179, %cst_111 {dimension_numbers = #tpu.dot_dimension_numbers<[1], [0], [0], [1], [0, 0, 1, 1], [], []>} : vector<1x128xbf16>, vector<128x15xbf16>, vector<1x15xf32> -> vector<1x15xf32>
    %c0_112 = arith.constant 0 : index
    %c0_113 = arith.constant 0 : index
    %181 = vector.load %arg9[%c0_112, %c0_113] : memref<1x15xf32, #tpu.memory_space<vmem>>, vector<1x15xf32>
    %182 = arith.addf %180, %181 : vector<1x15xf32>
    %c0_114 = arith.constant 0 : index
    %c0_115 = arith.constant 0 : index
    %c0_116 = arith.constant 0 : index
    %183 = vector.load %arg12[%c0_114, %c0_115, %c0_116] : memref<1x1x15xf32, #tpu.memory_space<vmem>>, vector<1x1x15xf32>
    %184 = vector.shape_cast %183 : vector<1x1x15xf32> to vector<1x15xf32>
    %185 = vector.shape_cast %182 : vector<1x15xf32> to vector<1x1x15xf32>
    tpu.vector_store %arg12[%c0_114, %c0_115, %c0_116], %185 {strides = array<i32>} : memref<1x1x15xf32, #tpu.memory_space<vmem>>, vector<1x1x15xf32>,
    return
  }
  func.func @transform_0(%arg0: i32) -> (i32, i32, i32) {
    %c0_i32 = arith.constant 0 : i32
    %c0_i32_0 = arith.constant 0 : i32
    %c0_i32_1 = arith.constant 0 : i32
    return %arg0, %c0_i32, %c0_i32_0 : i32, i32, i32
  }
  func.func @transform_1(%arg0: i32) -> (i32, i32, i32) {
    %c0_i32 = arith.constant 0 : i32
    %c0_i32_0 = arith.constant 0 : i32
    %c0_i32_1 = arith.constant 0 : i32
    %c0_i32_2 = arith.constant 0 : i32
    return %c0_i32, %c0_i32_0, %c0_i32_1 : i32, i32, i32
  }
  func.func @transform_2(%arg0: i32) -> (i32, i32) {
    %c0_i32 = arith.constant 0 : i32
    %c0_i32_0 = arith.constant 0 : i32
    %c0_i32_1 = arith.constant 0 : i32
    return %c0_i32, %c0_i32_0 : i32, i32
  }
  func.func @transform_3(%arg0: i32) -> (i32, i32, i32) {
    %c0_i32 = arith.constant 0 : i32
    %c0_i32_0 = arith.constant 0 : i32
    %c0_i32_1 = arith.constant 0 : i32
    %c0_i32_2 = arith.constant 0 : i32
    return %c0_i32, %c0_i32_0, %c0_i32_1 : i32, i32, i32
  }
  func.func @transform_4(%arg0: i32) -> (i32, i32) {
    %c0_i32 = arith.constant 0 : i32
    %c0_i32_0 = arith.constant 0 : i32
    %c0_i32_1 = arith.constant 0 : i32
    return %c0_i32, %c0_i32_0 : i32, i32
  }
  func.func @transform_5(%arg0: i32) -> (i32, i32) {
    %c0_i32 = arith.constant 0 : i32
    %c0_i32_0 = arith.constant 0 : i32
    %c0_i32_1 = arith.constant 0 : i32
    return %c0_i32, %c0_i32_0 : i32, i32
  }
  func.func @transform_6(%arg0: i32) -> (i32, i32) {
    %c0_i32 = arith.constant 0 : i32
    %c0_i32_0 = arith.constant 0 : i32
    %c0_i32_1 = arith.constant 0 : i32
    return %c0_i32, %c0_i32_0 : i32, i32
  }
  func.func @transform_7(%arg0: i32) -> (i32, i32) {
    %c0_i32 = arith.constant 0 : i32
    %c0_i32_0 = arith.constant 0 : i32
    %c0_i32_1 = arith.constant 0 : i32
    return %c0_i32, %c0_i32_0 : i32, i32
  }
  func.func @transform_8(%arg0: i32) -> (i32, i32) {
    %c0_i32 = arith.constant 0 : i32
    %c0_i32_0 = arith.constant 0 : i32
    %c0_i32_1 = arith.constant 0 : i32
    return %c0_i32, %c0_i32_0 : i32, i32
  }
  func.func @transform_9(%arg0: i32) -> (i32, i32, i32) {
    %c0_i32 = arith.constant 0 : i32
    %c0_i32_0 = arith.constant 0 : i32
    %c0_i32_1 = arith.constant 0 : i32
    return %arg0, %c0_i32, %c0_i32_0 : i32, i32, i32
  }
  func.func @transform_10(%arg0: i32) -> (i32, i32, i32) {
    %c0_i32 = arith.constant 0 : i32
    %c0_i32_0 = arith.constant 0 : i32
    %c0_i32_1 = arith.constant 0 : i32
    return %arg0, %c0_i32, %c0_i32_0 : i32, i32, i32
  }
  func.func @transform_11(%arg0: i32) -> (i32, i32, i32) {
    %c0_i32 = arith.constant 0 : i32
    %c0_i32_0 = arith.constant 0 : i32
    %c0_i32_1 = arith.constant 0 : i32
    return %arg0, %c0_i32, %c0_i32_0 : i32, i32, i32
  }
}

</mosaic_0001>

<bundles_post_ra>
// kernel: forward.3
= control target key start
LH: loop header
LB: loop body
LE: loop exit
PB: predicated region body
PF: predicated region fallthrough
CT: control target
= control target key end

     0   :  { %s13700_s0 = inlined_call_operand.vmem [shape: bf16[2,79,400], index: 0, kind: input, shape index: {}]   ;;  %s13701_s1 = inlined_call_operand.hbm [shape: bf16[3,400,128], index: 1, kind: input, shape index: {}]   ;;  %s13702_s2 = inlined_call_operand.hbm [shape: f32[1,128], index: 2, kind: input, shape index: {}]   ;;  %s13703_s3 = inlined_call_operand.hbm [shape: bf16[25,128,512], index: 3, kind: input, shape index: {}]   ;;  %s13704_s4 = inlined_call_operand.hbm [shape: f32[1,512], index: 4, kind: input, shape index: {}]   ;;  %s13705_s5 = inlined_call_operand.hbm [shape: bf16[512,128], index: 5, kind: input, shape index: {}]   ;;  %s13706_s6 = inlined_call_operand.hbm [shape: f32[1,128], index: 6, kind: input, shape index: {}]   ;;  %s13707_s7 = inlined_call_operand.vmem [shape: bf16[128,15], index: 7, kind: input, shape index: {}]   ;;  %s13708_s8 = inlined_call_operand.hbm [shape: f32[1,15], index: 8, kind: input, shape index: {}]   ;;  %s13709_s9 = inlined_call_operand.vmem [shape: f32[2,1,512], index: 9, kind: input, shape index: {}]   ;;  %s13710_s10 = inlined_call_operand.vmem [shape: f32[2,1,128], index: 10, kind: input, shape index: {}]   ;;  %s13711_s11 = inlined_call_operand.hbm [shape: f32[2,1,15], index: 11, kind: output, shape index: {}]  }
   0x1   :  { %13722 = sst [smem:[#allocation25_spill]] %s13701_s1 }
   0x2   :  { %13723 = sst [smem:[#allocation26_spill]] %s13702_s2 }
   0x3   :  { %13724 = sst [smem:[#allocation27_spill]] %s13704_s4 }
   0x4   :  { %13725 = sst [smem:[#allocation28_spill]] %s13706_s6 }
   0x5   :  { %16 = vsyncpa [#allocation3], 0 }
   0x6   :  { %17 = vsyncpa [#allocation6], 0 }
   0x7   :  { %18 = vsyncpa [#allocation9], 0 }
   0x8   :  { %19 = vsyncpa [#allocation12], 0 }
   0x9   :  { %20 = vsyncpa [#allocation4], 0 }
   0xa   :  { %22 = vsyncpa [#allocation4 + $0x1], 0  ;;  %s12774_s17 = smov 0   ;;  %s12776_s18 = smov 0  }
   0xb   :  { %s12778_s19 = smov 0   ;;  %s12780_s20 = smov 0  }
   0xc LB: > { %13726 = sst [smem:[#allocation20_spill]] %s12684_s17  ;;  %s12795_s21 = sadd.s32 4294967295, %s12696_s20   ;;  %s12696_s20 = sphi %s12780_s20, %s13757_s20   ;;  %s12692_s19 = sphi %s12778_s19, %s13759_s19   ;;  %s12688_s18 = sphi %s12776_s18, %s13761_s18   ;;  %s12684_s17 = sphi %s12774_s17, %s13760_s17  }
   0xd   : > { %13727 = sst [smem:[#allocation21_spill]] %s12692_s19  ;;  %s9702_s22 = sadd.s32 4294967294, %s12696_s20  }
   0xe   : > { %s12799_s23 = sadd.s32 1, %s12696_s20   ;;  %s281_s24 = sadd.s32 1, %s12692_s19 }
   0xf   : > { %13728 = sst [smem:[#allocation22_spill]] %s12799_s23  ;;  %s278_s25 = ssub.s32 %s12696_s20, %s12799_s23 }
  0x10   : > { %p291_p0 = scmp.ne.s32.totalorder %s12692_s19, %s12688_s18  ;;  %p279_p1 = scmp.eq.s32.totalorder %s278_s25, 0 }
  0x11   : > { %p292_p2 = scmp.eq.s32.totalorder %s12795_s21, 1  ;;  %p297_p3 = scmp.ne.s32.totalorder %s12688_s18, %s12684_s17 }
  0x12   : > { %p298_p4 = scmp.eq.s32.totalorder %s9702_s22, 1  ;;  %p9703_p7 = scmp.ge.s32.totalorder %s12696_s20, 1 }
  0x13   : > { %s12810_s26 = scalar_select %p279_p1, %s12692_s19, %s281_s24  }
  0x14   : > { %p12812_p5 = por %p292_p2, %p291_p0  ;;  %p12816_p6 = por %p298_p4, %p297_p3 }
  0x15   : > { %13729 = sst [smem:[#allocation23_spill]] %s12810_s26  ;;  %p305_p8 = scmp.lt.s32.totalorder %s12696_s20, 3 }
  0x16   : > { %s13730_s27 = scalar_select %p12812_p5, 1, 0 }
  0x17   : > { %s13731_s28 = scalar_select %p12816_p6, 1, 0 }
  0x18   : > { %p13715_p9 = scmp.eq.s32.totalorder %s12795_s21, 0  ;;  %p12823_p10 = pnand %p9703_p7, %p305_p8 }
  0x19   : > { %13732 = sst [smem:[#allocation24_spill]] %s13731_s28  ;;  %s12698_s30 = smov [#allocation5]  }
  0x1a   : > { %s13733_s29 = scalar_select %p12823_p10, 1, 0 }
  0x1b   : > { %s331_s12 = sshll.u32 %s12698_s30, 4  ;;  %p10989_p11 = pneg %p12823_p10  ;;  %s332_s12 = int_to_ptr.vmem [resolvable:$true] %s331_s12 }
  0x1c   : > { %s12699_s13 = smov [#allocation8]   ;;  %s12700_s16 = smov [#allocation11]  }
  0x1d   : > { %s355_s14 = sshll.u32 %s12699_s13, 4  ;;  %p12831_p12 = pnand %p13715_p9, %p10989_p11  ;;  %s12835_s14 = int_to_ptr.vmem [resolvable:$true] %s355_s14 }
  0x1e   : > { %s379_s22 = sshll.u32 %s12700_s16, 4  ;;  %s13735_s2 = sld [smem:[#allocation26_spill]]  ;;  %s12837_s22 = int_to_ptr.vmem [resolvable:$true] %s379_s22 }
  0x1f   : > { %p12847_p0 = pneg %p12831_p12 }
  0x24   : > { %s12422_s30 = scalar_lea.hbm %s13735_s2, 16 }
  0x25   : > { %p12423_p13 = scmp.ne.s32.totalorder %s13735_s2, %s12422_s30  ;;  %p12429_p3 = scmp.lt.u32.totalorder %s12422_s30, %s13735_s2 }
  0x27   : > { %p12425_p1 = pnand %p12847_p0, %p12423_p13 }
  0x29   : > { %p12426_p2 = pneg %p12425_p1 }
  0x2b   : > { %p12431_p4 = pnand %p12429_p3, %p12426_p2 }
  0x2d   : > { %12434 = shalt.err (!%p12431_p4)
}
  0x2e   : > { %s12435_s24 = scalar_lea.vmem %s332_s12, 16  ;;  %s12442_s19 = scalar_lea.vmem %s332_s12, 32 }
  0x2f   : > { %p12436_p7 = scmp.ne.s32.totalorder %s332_s12, %s12435_s24  ;;  %p12443_p9 = scmp.lt.s32.totalorder %s332_s12, %s332_s12 }
  0x30   : > { %p12444_p6 = scmp.lt.s32.totalorder %s12442_s19, %s12435_s24 }
  0x31   : > { %p12438_p8 = pnand %p12436_p7, %p12847_p0 }
  0x32   : > { %p12445_p5 = por %p12444_p6, %p12443_p9 }
  0x33   : > { %p12439_p11 = pneg %p12438_p8 }
  0x35   : > { %p12446_p10 = pnand %p12445_p5, %p12439_p11 }
  0x37   : > { %12449 = shalt.err (!%p12446_p10)
}
  0x38   : > { %10995 = dma.hbm_to_vmem [thread:$0]  (!%p12831_p12), %s13735_s2, 16, %s332_s12, [#allocation6]  }
  0x39   : > { %s13737_s4 = sld [smem:[#allocation27_spill]] }
  0x3f   : > { %s12450_s16 = scalar_lea.hbm %s13737_s4, 64 }
  0x40   : > { %p12451_p13 = scmp.ne.s32.totalorder %s13737_s4, %s12450_s16  ;;  %p12457_p5 = scmp.lt.u32.totalorder %s12450_s16, %s13737_s4 }
  0x42   : > { %p12453_p1 = pnand %p12451_p13, %p12847_p0 }
  0x44   : > { %p12454_p6 = pneg %p12453_p1 }
  0x46   : > { %p12459_p9 = pnand %p12457_p5, %p12454_p6 }
  0x48   : > { %12462 = shalt.err (!%p12459_p9)
}
  0x49   : > { %s12463_s12 = scalar_lea.vmem %s12835_s14, 64  ;;  %p12471_p4 = scmp.lt.s32.totalorder %s12835_s14, %s12835_s14 }
  0x4a   : > { %p12464_p10 = scmp.ne.s32.totalorder %s12835_s14, %s12463_s12  ;;  %p12472_p7 = scmp.lt.s32.totalorder %s12463_s12, %s12463_s12 }
  0x4c   : > { %p12466_p2 = pnand %p12464_p10, %p12847_p0  ;;  %p12473_p8 = por %p12472_p7, %p12471_p4 }
  0x4e   : > { %p12467_p3 = pneg %p12466_p2 }
  0x50   : > { %p12474_p11 = pnand %p12473_p8, %p12467_p3 }
  0x52   : > { %12477 = shalt.err (!%p12474_p11)
}
  0x53   : > { %11001 = dma.hbm_to_vmem [thread:$0]  (!%p12831_p12), %s13737_s4, 64, %s12835_s14, [#allocation9]  }
  0x54   : > { %s13738_s6 = sld [smem:[#allocation28_spill]] }
  0x5a   : > { %s12478_s23 = scalar_lea.hbm %s13738_s6, 16 }
  0x5b   : > { %p12479_p13 = scmp.ne.s32.totalorder %s13738_s6, %s12478_s23  ;;  %p12485_p5 = scmp.lt.u32.totalorder %s12478_s23, %s13738_s6 }
  0x5d   : > { %p12481_p1 = pnand %p12479_p13, %p12847_p0 }
  0x5f   : > { %p12482_p6 = pneg %p12481_p1 }
  0x61   : > { %p12487_p9 = pnand %p12485_p5, %p12482_p6 }
  0x63   : > { %12490 = shalt.err (!%p12487_p9)
}
  0x64   : > { %s12491_s14 = scalar_lea.vmem %s12837_s22, 16  ;;  %s12498_s12 = scalar_lea.vmem %s12837_s22, 32 }
  0x65   : > { %p12492_p10 = scmp.ne.s32.totalorder %s12837_s22, %s12491_s14  ;;  %p12499_p4 = scmp.lt.s32.totalorder %s12837_s22, %s12837_s22 }
  0x66   : > { %p12500_p7 = scmp.lt.s32.totalorder %s12498_s12, %s12491_s14 }
  0x67   : > { %p12494_p2 = pnand %p12492_p10, %p12847_p0 }
  0x68   : > { %p12501_p8 = por %p12500_p7, %p12499_p4 }
  0x69   : > { %p12495_p3 = pneg %p12494_p2 }
  0x6b   : > { %p12502_p11 = pnand %p12501_p8, %p12495_p3 }
  0x6d   : > { %12505 = shalt.err (!%p12502_p11)
}
  0x6e   : > { %11007 = dma.hbm_to_vmem [thread:$0]  (!%p12831_p12), %s13738_s6, 16, %s12837_s22, [#allocation12]  }
  0x6f   : > { %s12701_s26 = smov [#allocation2]   ;;  %s13739_s1 = sld [smem:[#allocation25_spill]] }
  0x70   : > { %s317_s25 = sshll.u32 %s12701_s26, 4  ;;  %s318_s25 = int_to_ptr.vmem [resolvable:$true] %s317_s25 }
  0x75   : > { %s12506_s16 = scalar_lea.hbm %s13739_s1, 9600 }
  0x76   : > { %p12507_p13 = scmp.ne.s32.totalorder %s13739_s1, %s12506_s16  ;;  %p12513_p5 = scmp.lt.u32.totalorder %s12506_s16, %s13739_s1 }
  0x78   : > { %p12509_p1 = pnand %p12507_p13, %p12847_p0 }
  0x7a   : > { %p12510_p6 = pneg %p12509_p1 }
  0x7c   : > { %p12515_p9 = pnand %p12513_p5, %p12510_p6 }
  0x7e   : > { %12518 = shalt.err (!%p12515_p9)
}
  0x7f   : > { %s12519_s22 = scalar_lea.vmem %s318_s25, 9600  ;;  %p12527_p4 = scmp.lt.s32.totalorder %s318_s25, %s318_s25 }
  0x80   : > { %p12520_p10 = scmp.ne.s32.totalorder %s318_s25, %s12519_s22  ;;  %p12528_p7 = scmp.lt.s32.totalorder %s12519_s22, %s12519_s22 }
  0x82   : > { %p12522_p2 = pnand %p12520_p10, %p12847_p0  ;;  %p12529_p8 = por %p12528_p7, %p12527_p4 }
  0x84   : > { %p12523_p3 = pneg %p12522_p2 }
  0x86   : > { %p12530_p11 = pnand %p12529_p8, %p12523_p3 }
  0x88   : > { %12533 = shalt.err (!%p12530_p11)
}
  0x89   : > { %s13720_s17 = smov 64   ;;  %s13721_s28 = smov 4  }
  0x8a   : > { %10992 = dma.hbm_to_vmem [thread:$0]  (!%p12831_p12), %s13739_s1, 9600, %s318_s25, [#allocation3], %s13720_s17, %s13720_s17, %s13721_s28  }
  0x8b   : > { %s12704_s30 = smov [#allocation7]   ;;  %s12534_s14 = scalar_lea.hbm %s13703_s3, 102400 }
  0x8c   : > { %s341_s16 = sshll.u32 %s12704_s30, 4  ;;  %p12535_p13 = scmp.ne.s32.totalorder %s13703_s3, %s12534_s14  ;;  %s342_s16 = int_to_ptr.vmem [resolvable:$true] %s341_s16 }
  0x8d   : > { %p12541_p5 = scmp.lt.u32.totalorder %s12534_s14, %s13703_s3 }
  0x8e   : > { %p12537_p1 = pnand %p12535_p13, %p12847_p0 }
  0x90   : > { %p12538_p6 = pneg %p12537_p1 }
  0x92   : > { %p12543_p9 = pnand %p12541_p5, %p12538_p6 }
  0x94   : > { %12546 = shalt.err (!%p12543_p9)
}
  0x95   : > { %s12547_s25 = scalar_lea.vmem %s342_s16, 102400  ;;  %p12555_p4 = scmp.lt.s32.totalorder %s342_s16, %s342_s16 }
  0x96   : > { %p12548_p10 = scmp.ne.s32.totalorder %s342_s16, %s12547_s25  ;;  %p12556_p7 = scmp.lt.s32.totalorder %s12547_s25, %s12547_s25 }
  0x98   : > { %p12550_p2 = pnand %p12548_p10, %p12847_p0  ;;  %p12557_p8 = por %p12556_p7, %p12555_p4 }
  0x9a   : > { %p12551_p3 = pneg %p12550_p2 }
  0x9c   : > { %p12558_p11 = pnand %p12557_p8, %p12551_p3 }
  0x9e   : > { %12561 = shalt.err (!%p12558_p11)
}
  0x9f   : > { %s12705_s26 = smov 256   ;;  %s12706_s23 = smov 16  }
  0xa0   : > { %10998 = dma.hbm_to_vmem [thread:$0]  (!%p12831_p12), %s13703_s3, 102400, %s342_s16, [#allocation6], %s12705_s26, %s12705_s26, %s12706_s23  }
  0xa1   : > { %s12707_s30 = smov [#allocation10]   ;;  %s12708_s19 = smov [#allocation13]  }
  0xa2   : > { %s365_s24 = sshll.u32 %s12707_s30, 4  ;;  %s393_s14 = sshll.u32 %s12708_s19, 4  ;;  %s366_s24 = int_to_ptr.vmem [resolvable:$true] %s365_s24  ;;  %s394_s14 = int_to_ptr.vmem [resolvable:$true] %s393_s14 }
  0xa3   : > { %s12562_s25 = scalar_lea.hbm %s13705_s5, 4096 }
  0xa4   : > { %p12563_p13 = scmp.ne.s32.totalorder %s13705_s5, %s12562_s25  ;;  %p12569_p5 = scmp.lt.u32.totalorder %s12562_s25, %s13705_s5 }
  0xa6   : > { %p12565_p1 = pnand %p12563_p13, %p12847_p0 }
  0xa8   : > { %p12566_p6 = pneg %p12565_p1 }
  0xaa   : > { %p12571_p9 = pnand %p12569_p5, %p12566_p6 }
  0xac   : > { %12574 = shalt.err (!%p12571_p9)
}
  0xad   : > { %s12575_s16 = scalar_lea.vmem %s366_s24, 4096  ;;  %p12583_p4 = scmp.lt.s32.totalorder %s366_s24, %s366_s24 }
  0xae   : > { %p12576_p10 = scmp.ne.s32.totalorder %s366_s24, %s12575_s16  ;;  %p12584_p7 = scmp.lt.s32.totalorder %s12575_s16, %s12575_s16 }
  0xb0   : > { %p12578_p2 = pnand %p12576_p10, %p12847_p0  ;;  %p12585_p8 = por %p12584_p7, %p12583_p4 }
  0xb2   : > { %p12579_p3 = pneg %p12578_p2 }
  0xb4   : > { %p12586_p11 = pnand %p12585_p8, %p12579_p3 }
  0xb6   : > { %12589 = shalt.err (!%p12586_p11)
}
  0xb7   : > { %s13740_s17 = smov 4   ;;  %s13741_s28 = smov 64  }
  0xb8   : > { %11004 = dma.hbm_to_vmem [thread:$0]  (!%p12831_p12), %s13705_s5, 4096, %s366_s24, [#allocation9], %s13741_s28, %s13741_s28, %s13740_s17  }
  0xb9   : > { %s12590_s2 = scalar_lea.hbm %s13708_s8, 16 }
  0xba   : > { %p12591_p13 = scmp.ne.s32.totalorder %s13708_s8, %s12590_s2  ;;  %p12597_p5 = scmp.lt.u32.totalorder %s12590_s2, %s13708_s8 }
  0xbc   : > { %p12593_p1 = pnand %p12591_p13, %p12847_p0 }
  0xbe   : > { %p12594_p6 = pneg %p12593_p1 }
  0xc0   : > { %p12599_p9 = pnand %p12597_p5, %p12594_p6 }
  0xc2   : > { %12602 = shalt.err (!%p12599_p9)
}
  0xc3   : > { %s12603_s22 = scalar_lea.vmem %s394_s14, 16  ;;  %s12610_s24 = scalar_lea.vmem %s394_s14, 32 }
  0xc4   : > { %p12604_p10 = scmp.ne.s32.totalorder %s394_s14, %s12603_s22  ;;  %p12611_p4 = scmp.lt.s32.totalorder %s394_s14, %s394_s14 }
  0xc5   : > { %p12612_p7 = scmp.lt.s32.totalorder %s12610_s24, %s12603_s22 }
  0xc6   : > { %p12606_p2 = pnand %p12604_p10, %p12847_p0 }
  0xc7   : > { %p12613_p8 = por %p12612_p7, %p12611_p4 }
  0xc8   : > { %p12607_p3 = pneg %p12606_p2 }
  0xca   : > { %p12614_p11 = pnand %p12613_p8, %p12607_p3 }
  0xcc   : > { %12617 = shalt.err (!%p12614_p11)
}
  0xcd   : > { %11010 = dma.hbm_to_vmem [thread:$0]  (!%p12831_p12), %s13708_s8, 16, %s394_s14, [#allocation12]  }
  0xce   : > { %p13742_p13 = scmp.ne.s32.totalorder %s13733_s29, 0 }
  0xcf   : > { %p13743_p1 = scmp.eq.s32.totalorder (!%p13742_p13), %s12795_s21, 0 }
  0xd0   : > { %427 = sbr.rel (%p13742_p13) target bundleno = 2279 (0x8e7), region = 64 }
  0xd7   : > { %12663 = dma.done.wait (%p13743_p1), [#allocation3], 9600   ;;  %p13744_p0 = pmov %p13743_p1 }
  0xd9   : > { %12665 = vsyncadd (%p13744_p0), [#allocation3], 4294957696  ;;  %p13745_p6 = pmov %p13744_p0 }
  0xda   : > { %p13746_p5 = pmov %p13744_p0 }
  0xdb   : > { %12667 = dma.done.wait (%p13745_p6), [#allocation6], 102416  }
  0xdc   : > { %12669 = vsyncadd (%p13746_p5), [#allocation6], 4294864880  ;;  %p13747_p9 = pmov %p13744_p0 }
  0xdd   : > { %p13748_p12 = pmov %p13744_p0 }
  0xde   : > { %12671 = dma.done.wait (%p13747_p9), [#allocation9], 4160  }
  0xdf   : > { %12673 = vsyncadd (%p13748_p12), [#allocation9], 4294963136  ;;  %p13749_p10 = pmov %p13744_p0 }
  0xe0   : > { %p13750_p2 = pmov %p13744_p0 }
  0xe1   : > { %12675 = dma.done.wait (%p13749_p10), [#allocation12], 32  }
  0xe2   : > { %12677 = vsyncadd (%p13750_p2), [#allocation12], 4294967264  ;;  %v12709_v0 = vmov 0   ;;  %v11077_v1 = vld [vmem:[#allocation2 + $0x40] sm:$0xff]   ;;  %v11080_v4 = vld [vmem:[#allocation2 + $0x48] sm:$0xff]   ;;  %p497_p3 = scmp.lt.s32.totalorder %s12795_s21, 1 }
  0xe3   : > { %914 = vmatprep.subr.bf16.mxu1 %v12709_v0  ;;  %v11078_v2 = vld [vmem:[#allocation2 + $0x80] sm:$0xff]   ;;  %10685 = vmatprep.subr.bf16.mxu0 %v11077_v1  ;;  %v11081_v5 = vld [vmem:[#allocation2 + $0x88] sm:$0xff]   ;;  %v11083_v7 = vld [vmem:[#allocation2 + $0x50] sm:$0xff]   ;;  %vm825_vm0 = vcmask 130048   ;;  %vm1910_vm2 = vcmask 596992   ;;  %vm1691_vm3 = vcmask 1046528  }
  0xe4   : > { %v11079_v3 = vld [vmem:[#allocation2] sm:$0xff]   ;;  %915 = vmatpush1.bf16.msra.mxu1 %v11078_v2  ;;  %v11082_v6 = vld [vmem:[#allocation2 + $0x8] sm:$0xff]   ;;  %v11084_v8 = vld [vmem:[#allocation2 + $0x90] sm:$0xff]   ;;  %s13012_s29 = scalar_select %p497_p3, %s12795_s21, 1  ;;  %vm1741_vm4 = vcmask 1045504   ;;  %vm1847_vm5 = vcmask 1043456  }
  0xe5   : > { %10686 = vmatpush3.bf16.msra.mxu0 %v11079_v3  ;;  %916 = vmatprep.subr.bf16.mxu1 %v12709_v0  ;;  %v11085_v9 = vld [vmem:[#allocation2 + $0x10] sm:$0xff]   ;;  %v11086_v10 = vld [vmem:[#allocation2 + $0x58] sm:$0xff]   ;;  %v11089_v13 = vld [vmem:[#allocation2 + $0x60] sm:$0xff]   ;;  %vm1923_vm6 = vcmask 1040384   ;;  %vm12711_vm8 = vmmov 1   ;;  %vm12712_vm12 = vmmov 0  }
  0xe6   : > { %10687 = vmatprep.subr.bf16.mxu0 %v11080_v4  ;;  %v11087_v11 = vld [vmem:[#allocation2 + $0x98] sm:$0xff]   ;;  %v11090_v14 = vld [vmem:[#allocation2 + $0xa0] sm:$0xff]   ;;  %v11092_v16 = vld [vmem:[#allocation2 + $0x68] sm:$0xff]   ;;  %s10958_s15 = smul.u32 160, %s13012_s29  ;;  %s9721_s28 = sshll.u32 %s13012_s29, 2  ;;  %vm9542_vm13 = vcmask 114688  }
  0xe7   : > { %v11088_v12 = vld [vmem:[#allocation2 + $0x18] sm:$0xff]   ;;  %v11091_v15 = vld [vmem:[#allocation2 + $0x20] sm:$0xff]   ;;  %v11093_v17 = vld [vmem:[#allocation2 + $0xa8] sm:$0xff]   ;;  %s505_s26 = scalar_lea.vmem %s13709_s9, %s9721_s28  ;;  %s508_s23 = scalar_lea.vmem %s13710_s10, %s13012_s29 }
  0xe8   : > { %917 = vmatpush1.bf16.msra.mxu1 %v11081_v5  ;;  %v11094_v18 = vld [vmem:[#allocation2 + $0x28] sm:$0xff]   ;;  %v11095_v19 = vld [vmem:[#allocation2 + $0x70] sm:$0xff]   ;;  %s13020_s17 = scalar_lea.vmem %s13700_s0, %s10958_s15  ;;  %v11098_v23 = vld [vmem:[#allocation2 + $0x78] sm:$0xff]   ;;  %s495_s2 = sand.u32 1, %s12688_s18  }
  0xe9   : > { %10688 = vmatpush3.bf16.msra.mxu0 %v11082_v6  ;;  %918 = vmatprep.subr.bf16.mxu1 %v12709_v0  ;;  %v11096_v20 = vld [vmem:[#allocation2 + $0xb0] sm:$0xff]   ;;  %v11099_v24 = vld [vmem:[#allocation2 + $0xb8] sm:$0xff]   ;;  %v11111_v27 = vld [vmem:[#allocation2 + $0x108] sm:$0xff]   ;;  %s10682_s4 = sshll.u32 %s12795_s21, 4  ;;  %s496_s30 = scalar_lea.vmem [#allocation14], %s495_s2 }
  0xea   : > { %10689 = vmatprep.subr.bf16.mxu0 %v11083_v7  ;;  %v11097_v21 = vld [vmem:[#allocation2 + $0x30] sm:$0xff]   ;;  %v13028_v25 = vld [vmem:[%s13020_s17 + $0xc] ss:$16 sps:$4 sm:$0xff]   ;;  %v11104_v29 = vld [vmem:[#allocation2 + $0xc0] sm:$0xff]   ;;  %s9557_s19 = sshll.u32 %s496_s30, 4  ;;  %s13658_s29 = scalar_lea.hbm %s13711_s11, %s10682_s4  ;;  %s13660_s19 = int_to_ptr.vmem [resolvable:$true] %s9557_s19 }
  0xeb   : > { %v13024_v22 = vld [vmem:[%s13020_s17 + $0x4] ss:$16 sps:$4 sm:$0xff]   ;;  %v11100_v26 = vld [vmem:[#allocation2 + $0x38] sm:$0xff]   ;;  %9767 = vmatprep.mubr.msk.bf16.mxu1 %vm825_vm0, %v13028_v25  ;;  %v13034_v28 = vld [vmem:[%s13020_s17] ss:$16 sps:$4 sm:$0xff]   ;;  %s9545_s21 = scalar_lea.sflag [#allocation4], %s495_s2 }
  0xec   : > { %919 = vmatpush1.bf16.msra.mxu1 %v11084_v8  ;;  %873 = vmatprep.mubr.bf16.mxu0 %v13024_v22  ;;  %v13038_v30 = vld [vmem:[%s13020_s17 + $0x8] ss:$16 sps:$4 sm:$0xff]   ;;  %v13041_v31 = vld [vmem:[%s13020_s17 + $0x24] ss:$16 sps:$4 sm:$0xff]   ;;  %v13045_v35 = vld [vmem:[%s13020_s17 + $0x2c] ss:$16 sps:$4 sm:$0xff]  }
  0xed   : > { %10690 = vmatpush3.bf16.msra.mxu0 %v11085_v9  ;;  %920 = vmatprep.subr.bf16.mxu1 %v12709_v0  ;;  %v11112_v32 = vld [vmem:[#allocation2 + $0x148] sm:$0xff]   ;;  %v11117_v34 = vld [vmem:[#allocation2 + $0x110] sm:$0xff]   ;;  %v11123_v38 = vld [vmem:[#allocation2 + $0x118] sm:$0xff]   ;;  %s12618_s24 = scalar_lea.vmem %s13660_s19, 16  ;;  %p13753_p7 = scmp.ne.s32.totalorder %s13730_s27, 0 }
  0xee   : > { %10691 = vmatprep.subr.bf16.mxu0 %v11086_v10  ;;  %v11113_v33 = vld [vmem:[#allocation2 + $0xc8] sm:$0xff]   ;;  %v13050_v36 = vld [vmem:[%s13020_s17 + $0x20] ss:$16 sps:$4 sm:$0xff]   ;;  %v13060_v41 = vld [vmem:[%s13020_s17 + $0x44] ss:$16 sps:$4 sm:$0xff]   ;;  %p12619_p4 = scmp.ne.s32.totalorder %s13660_s19, %s12618_s24  ;;  %s12713_s25 = smov [#allocation14]  }
  0xef   : > { %v11119_v37 = vld [vmem:[#allocation2 + $0xd0] sm:$0xff]   ;;  %v13056_v40 = vld [vmem:[%s13020_s17 + $0x28] ss:$16 sps:$4 sm:$0xff]   ;;  %v11129_v44 = vld [vmem:[#allocation2 + $0x120] sm:$0xff]   ;;  %s12622_s16 = sshll.u32 %s12713_s25, 4  ;;  %s12623_s16 = int_to_ptr.vmem [resolvable:$false] %s12622_s16 }
  0xf0   : > { %921 = vmatpush1.bf16.msra.mxu1 %v11087_v11  ;;  %v11118_v39 = vld [vmem:[#allocation2 + $0x150] sm:$0xff]   ;;  %v11124_v42 = vld [vmem:[#allocation2 + $0x158] sm:$0xff]   ;;  %v11131_v47 = vld [vmem:[#allocation2 + $0xe0] sm:$0xff]   ;;  %p12620_p8 = pnand %p12619_p4, %p13753_p7  ;;  %s12624_s15 = scalar_lea.vmem %s12623_s16, 32 }
  0xf1   : > { %10692 = vmatpush3.bf16.msra.mxu0 %v11088_v12  ;;  %922 = vmatprep.subr.bf16.mxu1 %v12709_v0  ;;  %v11125_v43 = vld [vmem:[#allocation2 + $0xd8] sm:$0xff]   ;;  %v13069_v46 = vld [vmem:[%s13020_s17 + $0x40] ss:$16 sps:$4 sm:$0xff]   ;;  %v11135_v49 = vld [vmem:[#allocation2 + $0x128] sm:$0xff]   ;;  %p12625_p13 = scmp.lt.s32.totalorder %s13660_s19, %s12623_s16  ;;  %p12626_p1 = scmp.lt.s32.totalorder %s12624_s15, %s12618_s24 }
  0xf2   : > { %10693 = vmatprep.subr.bf16.mxu0 %v11089_v13  ;;  %v13064_v45 = vld [vmem:[%s13020_s17 + $0x4c] ss:$16 sps:$4 sm:$0xff]   ;;  %v11130_v48 = vld [vmem:[#allocation2 + $0x160] sm:$0xff]   ;;  %v13075_v50 = vld [vmem:[%s13020_s17 + $0x48] ss:$16 sps:$4 sm:$0xff]   ;;  %p12621_p11 = pneg %p12620_p8 }
  0xf3   : > { %v13079_v51 = vld [vmem:[%s13020_s17 + $0x64] ss:$16 sps:$4 sm:$0xff]   ;;  %v11137_v52 = vld [vmem:[#allocation2 + $0xe8] sm:$0xff]   ;;  %v13089_v57 = vld [vmem:[%s13020_s17 + $0x60] ss:$16 sps:$4 sm:$0xff]   ;;  %p12627_p0 = por %p12626_p1, %p12625_p13 }
  0xf4   : > { %923 = vmatpush1.bf16.msra.mxu1 %v11090_v14  ;;  %v11136_v53 = vld [vmem:[#allocation2 + $0x168] sm:$0xff]   ;;  %v11141_v55 = vld [vmem:[#allocation2 + $0x130] sm:$0xff]   ;;  %v11147_v59 = vld [vmem:[#allocation2 + $0x138] sm:$0xff]  }
  0xf5   : > { %10694 = vmatpush3.bf16.msra.mxu0 %v11091_v15  ;;  %924 = vmatprep.subr.bf16.mxu1 %v12709_v0  ;;  %v13082_v54 = vld [vmem:[%s13020_s17 + $0x6c] ss:$16 sps:$4 sm:$0xff]   ;;  %v11143_v56 = vld [vmem:[#allocation2 + $0xf0] sm:$0xff]   ;;  %v13094_v60 = vld [vmem:[%s13020_s17 + $0x68] ss:$16 sps:$4 sm:$0xff]   ;;  %p12628_p6 = pnand %p12627_p0, %p12621_p11 }
  0xf6   : > { %10695 = vmatprep.subr.bf16.mxu0 %v11092_v16  ;;  %v11142_v58 = vld [vmem:[#allocation2 + $0x170] sm:$0xff]   ;;  %v11149_v62 = vld [vmem:[#allocation2 + $0xf8] sm:$0xff]   ;;  %v11153_v2 = vld [vmem:[#allocation2 + $0x140] sm:$0xff]  }
  0xf7   : > { %v13098_v61 = vld [vmem:[%s13020_s17 + $0x84] ss:$16 sps:$4 sm:$0xff]   ;;  %v11148_v63 = vld [vmem:[#allocation2 + $0x178] sm:$0xff]   ;;  %v13107_v3 = vld [vmem:[%s13020_s17 + $0x80] ss:$16 sps:$4 sm:$0xff]  }
  0xf8   : > { %925 = vmatpush1.bf16.msra.mxu1 %v11093_v17  ;;  %v13102_v1 = vld [vmem:[%s13020_s17 + $0x8c] ss:$16 sps:$4 sm:$0xff]   ;;  %v11155_v4 = vld [vmem:[#allocation2 + $0x100] sm:$0xff]   ;;  %v11157_v6 = vld [vmem:[#allocation2 + $0x1d0] sm:$0xff]  }
  0xf9   : > { %10696 = vmatpush3.bf16.msra.mxu0 %v11094_v18  ;;  %926 = vmatprep.subr.bf16.mxu1 %v12709_v0  ;;  %v11154_v5 = vld [vmem:[#allocation2 + $0x180] sm:$0xff]   ;;  %v13114_v7 = vld [vmem:[%s13020_s17 + $0x88] ss:$16 sps:$4 sm:$0xff]   ;;  %v11159_v9 = vld [vmem:[#allocation2 + $0x190] sm:$0xff]  }
  0xfa   : > { %10697 = vmatprep.subr.bf16.mxu0 %v11095_v19  ;;  %v11156_v8 = vld [vmem:[#allocation2 + $0x188] sm:$0xff]   ;;  %v11160_v10 = vld [vmem:[#allocation2 + $0x1d8] sm:$0xff]   ;;  %v11158_v11 = vld [vmem:[#allocation2 + $0x210] sm:$0xff]  }
  0xfb   : > { %v11162_v12 = vld [vmem:[#allocation2 + $0x198] sm:$0xff]   ;;  %v11163_v13 = vld [vmem:[#allocation2 + $0x1e0] sm:$0xff]   ;;  %v11166_v16 = vld [vmem:[#allocation2 + $0x1e8] sm:$0xff]  }
  0xfc   : > { %927 = vmatpush1.bf16.msra.mxu1 %v11096_v20  ;;  %v11161_v14 = vld [vmem:[#allocation2 + $0x218] sm:$0xff]   ;;  %v11165_v15 = vld [vmem:[#allocation2 + $0x1a0] sm:$0xff]   ;;  %v11167_v18 = vld [vmem:[#allocation2 + $0x228] sm:$0xff]  }
  0xfd   : > { %10698 = vmatpush3.bf16.msra.mxu0 %v11097_v21  ;;  %928 = vmatprep.subr.bf16.mxu1 %v12709_v0  ;;  %v11164_v17 = vld [vmem:[#allocation2 + $0x220] sm:$0xff]   ;;  %v11168_v19 = vld [vmem:[#allocation2 + $0x1a8] sm:$0xff]   ;;  %v11169_v20 = vld [vmem:[#allocation2 + $0x1f0] sm:$0xff]  }
  0xfe   : > { %10699 = vmatprep.subr.bf16.mxu0 %v11098_v23  ;;  %v11171_v21 = vld [vmem:[#allocation2 + $0x1b0] sm:$0xff]   ;;  %v11172_v23 = vld [vmem:[#allocation2 + $0x1f8] sm:$0xff]   ;;  %vm13295_vm9 = vmpackc.low %vm1923_vm6, %vm12711_vm8 }
 0x100   : > { %929 = vmatpush1.bf16.msra.mxu1 %v11099_v24  ;;  %v11170_v24 = vld [vmem:[#allocation2 + $0x230] sm:$0xff]  }
 0x101   : > { %10700 = vmatpush3.bf16.msra.mxu0 %v11100_v26  ;;  %930 = vmatprep.subr.bf16.mxu1 %v12709_v0  ;;  %v11174_v26 = vld [vmem:[#allocation2 + $0x1b8] sm:$0xff]  }
 0x102   : > { %10731 = vmatprep.subr.bf16.mxu0 %v11111_v27  ;;  %v11175_v27 = vld [vmem:[#allocation2 + $0x200] sm:$0xff]  }
 0x104   : > { %874 = vmatmul.mubr.bf16.vlgmr.msra.gmra.mrb[0].mxu0 %v13034_v28  ;;  %931 = vmatpush1.bf16.msra.mxu1 %v11104_v29  ;;  %v11173_v29 = vld [vmem:[#allocation2 + $0x238] sm:$0xff]  }
 0x105   : > { %881 = vmatprep.mubr.bf16.mxu0 %v13041_v31  ;;  %1261 = vmatprep.subr.bf16.mxu1 %v12709_v0 }
 0x106   : > { %10732 = vmatpush3.bf16.msra.mxu0 %v11113_v33  ;;  %v11178_v33 = vld [vmem:[#allocation2 + $0x208] sm:$0xff]  }
 0x107   : > { %947 = vmatmul.mubr.bf16.vlgmr.msra.gmra.mrb[0].mxu1 %v13038_v30  ;;  %10733 = vmatprep.subr.bf16.mxu0 %v11117_v34  ;;  %v11176_v34 = vld [vmem:[#allocation2 + $0x240] sm:$0xff]  }
 0x108   : > { %1262 = vmatpush1.bf16.msra.mxu1 %v11112_v32  ;;  %9768 = vmatprep.mubr.msk.bf16.mxu1 %vm825_vm0, %v13045_v35  ;;  %v11177_v32 = vld [vmem:[#allocation2 + $0x1c0] sm:$0xff]  }
 0x109   : > { %1263 = vmatprep.subr.bf16.mxu1 %v12709_v0 }
 0x10a   : > { %10734 = vmatpush3.bf16.msra.mxu0 %v11119_v37  ;;  %v11180_v37 = vld [vmem:[#allocation2 + $0x1c8] sm:$0xff]  }
 0x10b   : > { %10735 = vmatprep.subr.bf16.mxu0 %v11123_v38  ;;  %v11179_v38 = vld [vmem:[#allocation2 + $0x248] sm:$0xff]  }
 0x10c   : > { %882 = vmatmul.mubr.bf16.gmra.mrb[4].mxu0 %v13050_v36  ;;  %1264 = vmatpush1.bf16.msra.mxu1 %v11118_v39  ;;  %v11181_v39 = vld [vmem:[#allocation2 + $0x250] sm:$0xff]  }
 0x10d   : > { %889 = vmatprep.mubr.bf16.mxu0 %v13060_v41  ;;  %1265 = vmatprep.subr.bf16.mxu1 %v12709_v0 }
 0x10e   : > { %10736 = vmatpush3.bf16.msra.mxu0 %v11125_v43 }
 0x10f   : > { %955 = vmatmul.mubr.bf16.gmra.mrb[4].mxu1 %v13056_v40  ;;  %10737 = vmatprep.subr.bf16.mxu0 %v11129_v44 }
 0x110   : > { %1266 = vmatpush1.bf16.msra.mxu1 %v11124_v42  ;;  %9769 = vmatprep.mubr.msk.bf16.mxu1 %vm825_vm0, %v13064_v45 }
 0x111   : > { %1267 = vmatprep.subr.bf16.mxu1 %v12709_v0 }
 0x112   : > { %10738 = vmatpush3.bf16.msra.mxu0 %v11131_v47 }
 0x113   : > { %10739 = vmatprep.subr.bf16.mxu0 %v11135_v49 }
 0x114   : > { %890 = vmatmul.mubr.bf16.gmra.mrb[8].mxu0 %v13069_v46  ;;  %1268 = vmatpush1.bf16.msra.mxu1 %v11130_v48 }
 0x115   : > { %897 = vmatprep.mubr.bf16.mxu0 %v13079_v51  ;;  %1269 = vmatprep.subr.bf16.mxu1 %v12709_v0 }
 0x116   : > { %10740 = vmatpush3.bf16.msra.mxu0 %v11137_v52 }
 0x117   : > { %963 = vmatmul.mubr.bf16.gmra.mrb[8].mxu1 %v13075_v50  ;;  %10741 = vmatprep.subr.bf16.mxu0 %v11141_v55 }
 0x118   : > { %1270 = vmatpush1.bf16.msra.mxu1 %v11136_v53  ;;  %9770 = vmatprep.mubr.msk.bf16.mxu1 %vm825_vm0, %v13082_v54 }
 0x119   : > { %1271 = vmatprep.subr.bf16.mxu1 %v12709_v0 }
 0x11a   : > { %10742 = vmatpush3.bf16.msra.mxu0 %v11143_v56 }
 0x11b   : > { %10743 = vmatprep.subr.bf16.mxu0 %v11147_v59 }
 0x11c   : > { %898 = vmatmul.mubr.bf16.gmra.mrb[12].mxu0 %v13089_v57  ;;  %1272 = vmatpush1.bf16.msra.mxu1 %v11142_v58 }
 0x11d   : > { %905 = vmatprep.mubr.bf16.mxu0 %v13098_v61  ;;  %1273 = vmatprep.subr.bf16.mxu1 %v12709_v0 }
 0x11e   : > { %10744 = vmatpush3.bf16.msra.mxu0 %v11149_v62 }
 0x11f   : > { %971 = vmatmul.mubr.bf16.gmra.mrb[12].mxu1 %v13094_v60  ;;  %10745 = vmatprep.subr.bf16.mxu0 %v11153_v2  ;;  %v11184_v2 = vld [vmem:[#allocation7 + $0x104] ss:$16 sps:$4 sm:$0xff]  }
 0x120   : > { %1274 = vmatpush1.bf16.msra.mxu1 %v11148_v63  ;;  %9771 = vmatprep.mubr.msk.bf16.mxu1 %vm825_vm0, %v13102_v1 }
 0x121   : > { %1275 = vmatprep.subr.bf16.mxu1 %v12709_v0 }
 0x122   : > { %10746 = vmatpush3.bf16.msra.mxu0 %v11155_v4 }
 0x123   : > { %10777 = vmatprep.subr.bf16.mxu0 %v11157_v6  ;;  %v11190_v6 = vld [vmem:[#allocation7 + $0x124] ss:$16 sps:$4 sm:$0xff]  }
 0x124   : > { %906 = vmatmul.mubr.bf16.gmra.mrb[16].mxu0 %v13107_v3  ;;  %1276 = vmatpush1.bf16.msra.mxu1 %v11154_v5 }
 0x125   : > { %1220 = vmatprep.mubr.bf16.mxu0 %v13024_v22  ;;  %1277 = vmatprep.subr.bf16.mxu1 %v12709_v0 }
 0x127   : > { %979 = vmatmul.mubr.bf16.gmra.mrb[16].mxu1 %v13114_v7 }
 0x128   : > { %1278 = vmatpush1.bf16.msra.mxu1 %v11156_v8  ;;  %9797 = vmatprep.mubr.msk.bf16.mxu1 %vm825_vm0, %v13028_v25 }
 0x129   : > { %1608 = vmatprep.subr.bf16.mxu1 %v12709_v0 }
 0x12c   : > { %1221 = vmatmul.mubr.bf16.vlgmr.msra.gmra.mrb[20].mxu0 %v13034_v28 }
 0x12d   : > { %1228 = vmatprep.mubr.bf16.mxu0 %v13041_v31  ;;  %10778 = vmatpush3.bf16.msra.mxu0 %v11159_v9  ;;  %v11188_v9 = vld [vmem:[#allocation7 + $0x120] ss:$16 sps:$4 sm:$0xff]  }
 0x12e   : > { %10779 = vmatprep.subr.bf16.mxu0 %v11160_v10 }
 0x12f   : > { %1294 = vmatmul.mubr.bf16.vlgmr.msra.gmra.mrb[20].mxu1 %v13038_v30 }
 0x130   : > { %1609 = vmatpush1.bf16.msra.mxu1 %v11158_v11  ;;  %9798 = vmatprep.mubr.msk.bf16.mxu1 %vm825_vm0, %v13045_v35 }
 0x131   : > { %1610 = vmatprep.subr.bf16.mxu1 %v12709_v0  ;;  %10780 = vmatpush3.bf16.msra.mxu0 %v11162_v12 }
 0x132   : > { %10781 = vmatprep.subr.bf16.mxu0 %v11163_v13 }
 0x134   : > { %1229 = vmatmul.mubr.bf16.gmra.mrb[24].mxu0 %v13050_v36  ;;  %1611 = vmatpush1.bf16.msra.mxu1 %v11161_v14  ;;  %v11196_v14 = vld [vmem:[#allocation7 + $0x144] ss:$16 sps:$4 sm:$0xff]  }
 0x135   : > { %1236 = vmatprep.mubr.bf16.mxu0 %v13060_v41  ;;  %1612 = vmatprep.subr.bf16.mxu1 %v12709_v0 }
 0x136   : > { %10782 = vmatpush3.bf16.msra.mxu0 %v11165_v15 }
 0x137   : > { %1302 = vmatmul.mubr.bf16.gmra.mrb[24].mxu1 %v13056_v40  ;;  %10783 = vmatprep.subr.bf16.mxu0 %v11166_v16 }
 0x138   : > { %1613 = vmatpush1.bf16.msra.mxu1 %v11164_v17  ;;  %9799 = vmatprep.mubr.msk.bf16.mxu1 %vm825_vm0, %v13064_v45  ;;  %v11194_v17 = vld [vmem:[#allocation7 + $0x140] ss:$16 sps:$4 sm:$0xff]  }
 0x139   : > { %1614 = vmatprep.subr.bf16.mxu1 %v12709_v0 }
 0x13a   : > { %10784 = vmatpush3.bf16.msra.mxu0 %v11168_v19 }
 0x13b   : > { %10785 = vmatprep.subr.bf16.mxu0 %v11169_v20  ;;  %v11202_v20 = vld [vmem:[#allocation7 + $0x164] ss:$16 sps:$4 sm:$0xff]  }
 0x13c   : > { %1237 = vmatmul.mubr.bf16.gmra.mrb[28].mxu0 %v13069_v46  ;;  %1615 = vmatpush1.bf16.msra.mxu1 %v11167_v18 }
 0x13d   : > { %1244 = vmatprep.mubr.bf16.mxu0 %v13079_v51  ;;  %1616 = vmatprep.subr.bf16.mxu1 %v12709_v0 }
 0x13e   : > { %10786 = vmatpush3.bf16.msra.mxu0 %v11171_v21 }
 0x13f   : > { %1310 = vmatmul.mubr.bf16.gmra.mrb[28].mxu1 %v13075_v50  ;;  %10787 = vmatprep.subr.bf16.mxu0 %v11172_v23 }
 0x140   : > { %1617 = vmatpush1.bf16.msra.mxu1 %v11170_v24  ;;  %9800 = vmatprep.mubr.msk.bf16.mxu1 %vm825_vm0, %v13082_v54  ;;  %v11200_v24 = vld [vmem:[#allocation7 + $0x160] ss:$16 sps:$4 sm:$0xff]  }
 0x141   : > { %1618 = vmatprep.subr.bf16.mxu1 %v12709_v0 }
 0x142   : > { %10788 = vmatpush3.bf16.msra.mxu0 %v11174_v26 }
 0x143   : > { %10789 = vmatprep.subr.bf16.mxu0 %v11175_v27 }
 0x144   : > { %1245 = vmatmul.mubr.bf16.gmra.mrb[32].mxu0 %v13089_v57  ;;  %1619 = vmatpush1.bf16.msra.mxu1 %v11173_v29 }
 0x145   : > { %1252 = vmatprep.mubr.bf16.mxu0 %v13098_v61  ;;  %1620 = vmatprep.subr.bf16.mxu1 %v12709_v0 }
 0x146   : > { %10790 = vmatpush3.bf16.msra.mxu0 %v11177_v32 }
 0x147   : > { %1318 = vmatmul.mubr.bf16.gmra.mrb[32].mxu1 %v13094_v60  ;;  %10791 = vmatprep.subr.bf16.mxu0 %v11178_v33 }
 0x148   : > { %1621 = vmatpush1.bf16.msra.mxu1 %v11176_v34  ;;  %9801 = vmatprep.mubr.msk.bf16.mxu1 %vm825_vm0, %v13102_v1 }
 0x149   : > { %1622 = vmatprep.subr.bf16.mxu1 %v12709_v0 }
 0x14a   : > { %10792 = vmatpush3.bf16.msra.mxu0 %v11180_v37  ;;  %v11208_v37 = vld [vmem:[#allocation7 + $0x184] ss:$16 sps:$4 sm:$0xff]  }
 0x14c   : > { %1253 = vmatmul.mubr.bf16.gmra.mrb[36].mxu0 %v13107_v3  ;;  %1623 = vmatpush1.bf16.msra.mxu1 %v11179_v38 }
 0x14d   : > { %1567 = vmatprep.mubr.bf16.mxu0 %v13024_v22  ;;  %1624 = vmatprep.subr.bf16.mxu1 %v12709_v0 }
 0x14f   : > { %1326 = vmatmul.mubr.bf16.gmra.mrb[36].mxu1 %v13114_v7 }
 0x150   : > { %1625 = vmatpush1.bf16.msra.mxu1 %v11181_v39  ;;  %9827 = vmatprep.mubr.msk.bf16.mxu1 %vm825_vm0, %v13028_v25 }
 0x151   : > { %2247 = vmatprep.subr.bf16.mxu1 %v11184_v2 }
 0x154   : > { %1568 = vmatmul.mubr.bf16.vlgmr.msra.gmra.mrb[40].mxu0 %v13034_v28 }
 0x155   : > { %1575 = vmatprep.mubr.bf16.mxu0 %v13041_v31 }
 0x157   : > { %1641 = vmatmul.mubr.bf16.vlgmr.msra.gmra.mrb[40].mxu1 %v13038_v30 }
 0x158   : > { %9828 = vmatprep.mubr.msk.bf16.mxu1 %vm825_vm0, %v13045_v35 }
 0x15c   : > { %1576 = vmatmul.mubr.bf16.gmra.mrb[44].mxu0 %v13050_v36 }
 0x15d   : > { %1583 = vmatprep.mubr.bf16.mxu0 %v13060_v41 }
 0x15f   : > { %1649 = vmatmul.mubr.bf16.gmra.mrb[44].mxu1 %v13056_v40 }
 0x160   : > { %9829 = vmatprep.mubr.msk.bf16.mxu1 %vm825_vm0, %v13064_v45  ;;  %v1887_v45 = vlaneseq }
 0x162   : > { %v13183_v47 = vshrl.u32 %v1887_v45, 7  ;;  %v13185_v53 = vand.u32 127, %v1887_v45 }
 0x164   : > { %1584 = vmatmul.mubr.bf16.gmra.mrb[48].mxu0 %v13069_v46 }
 0x165   : > { %1591 = vmatprep.mubr.bf16.mxu0 %v13079_v51 }
 0x167   : > { %1657 = vmatmul.mubr.bf16.gmra.mrb[48].mxu1 %v13075_v50 }
 0x168   : > { %9830 = vmatprep.mubr.msk.bf16.mxu1 %vm825_vm0, %v13082_v54  ;;  %v1894_v54 = vmul.u32 3, %v13183_v47 }
 0x16a   : > { %vm1898_vm1 = vcmp.eq.s32.totalorder %v13185_v53, %v1894_v54 }
 0x16c   : > { %1592 = vmatmul.mubr.bf16.gmra.mrb[52].mxu0 %v13089_v57 }
 0x16d   : > { %1599 = vmatprep.mubr.bf16.mxu0 %v13098_v61  ;;  %v12710_v61 = vmov 0.0  }
 0x16e   : > { %v9833_v62 = vsel %vm1898_vm1, 1.0, %v12710_v61 }
 0x16f   : > { %1665 = vmatmul.mubr.bf16.gmra.mrb[52].mxu1 %v13094_v60 }
 0x170   : > { %9831 = vmatprep.mubr.msk.bf16.mxu1 %vm825_vm0, %v13102_v1  ;;  %v11182_v1 = vld [vmem:[#allocation7 + $0x100] ss:$16 sps:$4 sm:$0xff]  }
 0x171   : > { %2248 = vmatpush1.bf16.msra.mxu1 %v11182_v1 }
 0x172   : > { %2249 = vmatprep.subr.bf16.mxu1 %v11190_v6 }
 0x174   : > { %1600 = vmatmul.mubr.bf16.gmra.mrb[56].mxu0 %v13107_v3 }
 0x175   : > { %10910 = vmatprep.mubr.msk.f32.mxu0 %vm1910_vm2, %v9833_v62  ;;  %2250 = vmatpush1.bf16.msra.mxu1 %v11188_v9 }
 0x176   : > { %2251 = vmatprep.subr.bf16.mxu1 %v11196_v14 }
 0x177   : > { %1673 = vmatmul.mubr.bf16.gmra.mrb[56].mxu1 %v13114_v7 }
 0x178   : > { %2279 = vmatprep.mubr.bf16.mxu1 %v12709_v0 }
 0x179   : > { %2252 = vmatpush1.bf16.msra.mxu1 %v11194_v17 }
 0x17a   : > { %2253 = vmatprep.subr.bf16.mxu1 %v11202_v20 }
 0x17d   : > { %2254 = vmatpush1.bf16.msra.mxu1 %v11200_v24 }
 0x17e   : > { %2255 = vmatprep.subr.bf16.mxu1 %v11208_v37 }
 0x1d7   : > { %v10701_v22 = vpop.f32.mrb[0].mxu0 }
 0x1d8   : > { %v10702_v25 = vpop.f32.mrb[1].mxu0 }
 0x1d9   : > { %v10703_v28 = vadd.f32 %v10702_v25, %v10701_v22  ;;  %v10704_v30 = vpop.f32.mrb[2].mxu0  ;;  %v11206_v22 = vld [vmem:[#allocation7 + $0x180] ss:$16 sps:$4 sm:$0xff]  }
 0x1da   : > { %v10705_v31 = vpop.f32.mrb[3].mxu0  ;;  %v948_v35 = vpop.f32.mrb[0].mxu1  ;;  %2256 = vmatpush1.bf16.msra.mxu1 %v11206_v22 }
 0x1db   : > { %v10706_v36 = vadd.f32 %v10705_v31, %v10704_v30  ;;  %v13179_v40 = vadd.f32 %v10703_v28, %v948_v35  ;;  %v950_v41 = vpop.f32.mrb[1].mxu1  ;;  %v11214_v30 = vld [vmem:[#allocation7 + $0x1a4] ss:$16 sps:$4 sm:$0xff]  }
 0x1dc   : > { %v951_v42 = vpop.f32.mrb[2].mxu1  ;;  %2257 = vmatprep.subr.bf16.mxu1 %v11214_v30 }
 0x1dd   : > { %v13181_v43 = vadd.f32 %v10706_v36, %v951_v42  ;;  %v953_v44 = vpop.f32.mrb[3].mxu1  ;;  %v11212_v36 = vld [vmem:[#allocation7 + $0x1a0] ss:$16 sps:$4 sm:$0xff]  }
 0x1de   : > { %2258 = vmatpush1.bf16.msra.mxu1 %v11212_v36 }
 0x1df   : > { %v10707_v46 = vpop.f32.mrb[4].mxu0 }
 0x1e0   : > { %v10708_v48 = vpop.f32.mrb[5].mxu0 }
 0x1e1   : > { %v10709_v49 = vadd.f32 %v10708_v48, %v10707_v46  ;;  %v10710_v50 = vpop.f32.mrb[6].mxu0 }
 0x1e2   : > { %v10711_v51 = vpop.f32.mrb[7].mxu0  ;;  %v956_v52 = vpop.f32.mrb[4].mxu1 }
 0x1e3   : > { %v10712_v55 = vadd.f32 %v10711_v51, %v10710_v50  ;;  %v13188_v56 = vadd.f32 %v10709_v49, %v956_v52  ;;  %v958_v57 = vpop.f32.mrb[5].mxu1  ;;  %v11220_v49 = vld [vmem:[#allocation7 + $0x1c4] ss:$16 sps:$4 sm:$0xff]   ;;  %v11218_v52 = vld [vmem:[#allocation7 + $0x1c0] ss:$16 sps:$4 sm:$0xff]  }
 0x1e4   : > { %v959_v58 = vpop.f32.mrb[6].mxu1  ;;  %2259 = vmatprep.subr.bf16.mxu1 %v11220_v49 }
 0x1e5   : > { %v13191_v59 = vadd.f32 %v10712_v55, %v959_v58  ;;  %v961_v60 = vpop.f32.mrb[7].mxu1  ;;  %2260 = vmatpush1.bf16.msra.mxu1 %v11218_v52 }
 0x1e7   : > { %v10713_v63 = vpop.f32.mrb[8].mxu0 }
 0x1e8   : > { %v10714_v3 = vpop.f32.mrb[9].mxu0 }
 0x1e9   : > { %v10715_v4 = vadd.f32 %v10714_v3, %v10713_v63  ;;  %v10716_v5 = vpop.f32.mrb[10].mxu0 }
 0x1ea   : > { %v10717_v7 = vpop.f32.mrb[11].mxu0  ;;  %v964_v8 = vpop.f32.mrb[8].mxu1 }
 0x1eb   : > { %v10718_v10 = vadd.f32 %v10717_v7, %v10716_v5  ;;  %v13195_v11 = vadd.f32 %v10715_v4, %v964_v8  ;;  %v966_v12 = vpop.f32.mrb[9].mxu1 }
 0x1ec   : > { %v967_v13 = vpop.f32.mrb[10].mxu1 }
 0x1ed   : > { %v13197_v15 = vadd.f32 %v10718_v10, %v967_v13  ;;  %v969_v16 = vpop.f32.mrb[11].mxu1 }
 0x1ef   : > { %v10719_v18 = vpop.f32.mrb[12].mxu0 }
 0x1f0   : > { %v10720_v19 = vpop.f32.mrb[13].mxu0 }
 0x1f1   : > { %v10721_v21 = vadd.f32 %v10720_v19, %v10719_v18  ;;  %v10722_v23 = vpop.f32.mrb[14].mxu0 }
 0x1f2   : > { %v10723_v26 = vpop.f32.mrb[15].mxu0  ;;  %v972_v27 = vpop.f32.mrb[12].mxu1 }
 0x1f3   : > { %v10724_v29 = vadd.f32 %v10723_v26, %v10722_v23  ;;  %v13199_v32 = vadd.f32 %v10721_v21, %v972_v27  ;;  %v974_v33 = vpop.f32.mrb[13].mxu1 }
 0x1f4   : > { %v975_v34 = vpop.f32.mrb[14].mxu1 }
 0x1f5   : > { %v13201_v38 = vadd.f32 %v10724_v29, %v975_v34  ;;  %v977_v39 = vpop.f32.mrb[15].mxu1 }
 0x1f7   : > { %v10725_v25 = vpop.f32.mrb[16].mxu0 }
 0x1f8   : > { %v10726_v28 = vpop.f32.mrb[17].mxu0 }
 0x1f9   : > { %v10727_v31 = vadd.f32 %v10726_v28, %v10725_v25  ;;  %v10728_v35 = vpop.f32.mrb[18].mxu0 }
 0x1fa   : > { %v10729_v41 = vpop.f32.mrb[19].mxu0  ;;  %v980_v42 = vpop.f32.mrb[16].mxu1 }
 0x1fb   : > { %v10730_v44 = vadd.f32 %v10729_v41, %v10728_v35  ;;  %v13203_v45 = vadd.f32 %v10727_v31, %v980_v42  ;;  %v982_v46 = vpop.f32.mrb[17].mxu1 }
 0x1fc   : > { %v983_v48 = vpop.f32.mrb[18].mxu1 }
 0x1fd   : > { %v13205_v50 = vadd.f32 %v10730_v44, %v983_v48  ;;  %v985_v51 = vpop.f32.mrb[19].mxu1 }
 0x1ff   : > { %v10747_v54 = vpop.f32.mrb[20].mxu0 }
 0x200   : > { %v10748_v55 = vpop.f32.mrb[21].mxu0 }
 0x201   : > { %v10749_v57 = vadd.f32 %v10748_v55, %v10747_v54  ;;  %v10750_v58 = vpop.f32.mrb[22].mxu0 }
 0x202   : > { %v10751_v60 = vpop.f32.mrb[23].mxu0  ;;  %v1295_v62 = vpop.f32.mrb[20].mxu1 }
 0x203   : > { %v10752_v63 = vadd.f32 %v10751_v60, %v10750_v58  ;;  %v1296_v1 = vadd.f32 %v10749_v57, %v1295_v62  ;;  %v1297_v2 = vpop.f32.mrb[21].mxu1 }
 0x204   : > { %v1298_v3 = vpop.f32.mrb[22].mxu1 }
 0x205   : > { %v1299_v4 = vadd.f32 %v10752_v63, %v1298_v3  ;;  %v1300_v5 = vpop.f32.mrb[23].mxu1  ;;  %v1692_v6 = vrot.slane %v1296_v1, 1 }
 0x207   : > { %v1693_v7 = vrot.slane %v1299_v4, 1  ;;  %v10753_v8 = vpop.f32.mrb[24].mxu0 }
 0x208   : > { %v10754_v9 = vpop.f32.mrb[25].mxu0 }
 0x209   : > { %v1694_v10 = vsel %vm1691_vm3, %v1692_v6, %v1693_v7  ;;  %v10755_v12 = vadd.f32 %v10754_v9, %v10753_v8  ;;  %v10756_v13 = vpop.f32.mrb[26].mxu0 }
 0x20a   : > { %v13209_v14 = vadd.f32 %v1694_v10, %v13179_v40  ;;  %v10757_v16 = vpop.f32.mrb[27].mxu0  ;;  %v1303_v17 = vpop.f32.mrb[24].mxu1 }
 0x20b   : > { %v10758_v18 = vadd.f32 %v10757_v16, %v10756_v13  ;;  %v1304_v19 = vadd.f32 %v10755_v12, %v1303_v17  ;;  %v1305_v20 = vpop.f32.mrb[25].mxu1 }
 0x20c   : > { %v1306_v21 = vpop.f32.mrb[26].mxu1 }
 0x20d   : > { %v1695_v23 = vrot.slane %v1304_v19, 1  ;;  %v1307_v24 = vadd.f32 %v10758_v18, %v1306_v21  ;;  %v1308_v26 = vpop.f32.mrb[27].mxu1 }
 0x20f   : > { %v1696_v27 = vsel %vm1691_vm3, %v1693_v7, %v1695_v23  ;;  %v1697_v29 = vrot.slane %v1307_v24, 1  ;;  %v10759_v33 = vpop.f32.mrb[28].mxu0 }
 0x210   : > { %v13213_v34 = vadd.f32 %v1696_v27, %v13181_v43  ;;  %v10760_v37 = vpop.f32.mrb[29].mxu0 }
 0x211   : > { %v1698_v40 = vsel %vm1691_vm3, %v1695_v23, %v1697_v29  ;;  %v10761_v39 = vadd.f32 %v10760_v37, %v10759_v33  ;;  %v10762_v22 = vpop.f32.mrb[30].mxu0 }
 0x212   : > { %v13217_v25 = vadd.f32 %v1698_v40, %v13188_v56  ;;  %v10763_v28 = vpop.f32.mrb[31].mxu0  ;;  %v1311_v30 = vpop.f32.mrb[28].mxu1 }
 0x213   : > { %v10764_v31 = vadd.f32 %v10763_v28, %v10762_v22  ;;  %v1312_v35 = vadd.f32 %v10761_v39, %v1311_v30  ;;  %v1313_v36 = vpop.f32.mrb[29].mxu1 }
 0x214   : > { %v1314_v41 = vpop.f32.mrb[30].mxu1 }
 0x215   : > { %v1699_v42 = vrot.slane %v1312_v35, 1  ;;  %v1315_v44 = vadd.f32 %v10764_v31, %v1314_v41  ;;  %v1316_v46 = vpop.f32.mrb[31].mxu1 }
 0x217   : > { %v1700_v43 = vsel %vm1691_vm3, %v1697_v29, %v1699_v42  ;;  %v1701_v48 = vrot.slane %v1315_v44, 1  ;;  %v10765_v49 = vpop.f32.mrb[32].mxu0 }
 0x218   : > { %v13221_v51 = vadd.f32 %v1700_v43, %v13191_v59  ;;  %v10766_v52 = vpop.f32.mrb[33].mxu0 }
 0x219   : > { %v1702_v56 = vsel %vm1691_vm3, %v1699_v42, %v1701_v48  ;;  %v10767_v54 = vadd.f32 %v10766_v52, %v10765_v49  ;;  %v10768_v55 = vpop.f32.mrb[34].mxu0 }
 0x21a   : > { %v13225_v57 = vadd.f32 %v1702_v56, %v13195_v11  ;;  %v10769_v58 = vpop.f32.mrb[35].mxu0  ;;  %v1319_v60 = vpop.f32.mrb[32].mxu1 }
 0x21b   : > { %v10770_v62 = vadd.f32 %v10769_v58, %v10768_v55  ;;  %v1320_v63 = vadd.f32 %v10767_v54, %v1319_v60  ;;  %v1321_v1 = vpop.f32.mrb[33].mxu1  ;;  %v13248_v54 = vld [vmem:[#allocation5] ss:$0 sm:$0xff] }
 0x21c   : > { %v1322_v2 = vpop.f32.mrb[34].mxu1 }
 0x21d   : > { %v1703_v3 = vrot.slane %v1320_v63, 1  ;;  %v1323_v4 = vadd.f32 %v10770_v62, %v1322_v2  ;;  %v1324_v5 = vpop.f32.mrb[35].mxu1 }
 0x21f   : > { %v1704_v59 = vsel %vm1691_vm3, %v1701_v48, %v1703_v3  ;;  %v1705_v6 = vrot.slane %v1323_v4, 1  ;;  %v10771_v7 = vpop.f32.mrb[36].mxu0 }
 0x220   : > { %v13229_v8 = vadd.f32 %v1704_v59, %v13197_v15  ;;  %v10772_v9 = vpop.f32.mrb[37].mxu0 }
 0x221   : > { %v1706_v11 = vsel %vm1691_vm3, %v1703_v3, %v1705_v6  ;;  %v10773_v10 = vadd.f32 %v10772_v9, %v10771_v7  ;;  %v10774_v12 = vpop.f32.mrb[38].mxu0 }
 0x222   : > { %v13233_v13 = vadd.f32 %v1706_v11, %v13199_v32  ;;  %v10775_v16 = vpop.f32.mrb[39].mxu0  ;;  %v1327_v17 = vpop.f32.mrb[36].mxu1 }
 0x223   : > { %v10776_v18 = vadd.f32 %v10775_v16, %v10774_v12  ;;  %v1328_v19 = vadd.f32 %v10773_v10, %v1327_v17  ;;  %v1329_v20 = vpop.f32.mrb[37].mxu1 }
 0x224   : > { %v1330_v21 = vpop.f32.mrb[38].mxu1 }
 0x225   : > { %v1707_v23 = vrot.slane %v1328_v19, 1  ;;  %v1331_v24 = vadd.f32 %v10776_v18, %v1330_v21  ;;  %v1332_v26 = vpop.f32.mrb[39].mxu1 }
 0x227   : > { %v1708_v15 = vsel %vm1691_vm3, %v1705_v6, %v1707_v23  ;;  %v1709_v27 = vrot.slane %v1331_v24, 1  ;;  %v10793_v29 = vpop.f32.mrb[40].mxu0 }
 0x228   : > { %v13237_v33 = vadd.f32 %v1708_v15, %v13201_v38  ;;  %v10794_v37 = vpop.f32.mrb[41].mxu0 }
 0x229   : > { %v1710_v32 = vsel %vm1691_vm3, %v1707_v23, %v1709_v27  ;;  %v13241_v40 = vadd.f32 %v1709_v27, %v13205_v50  ;;  %v10795_v39 = vadd.f32 %v10794_v37, %v10793_v29  ;;  %v10796_v22 = vpop.f32.mrb[42].mxu0 }
 0x22a   : > { %v13244_v28 = vadd.f32 %v1710_v32, %v13203_v45  ;;  %v10797_v30 = vpop.f32.mrb[43].mxu0  ;;  %v1642_v31 = vpop.f32.mrb[40].mxu1 }
 0x22b   : > { %v10798_v35 = vadd.f32 %v10797_v30, %v10796_v22  ;;  %v1643_v36 = vadd.f32 %v10795_v39, %v1642_v31  ;;  %v1644_v41 = vpop.f32.mrb[41].mxu1 }
 0x22c   : > { %v1645_v42 = vpop.f32.mrb[42].mxu1 }
 0x22d   : > { %v1646_v44 = vadd.f32 %v10798_v35, %v1645_v42  ;;  %v1647_v38 = vpop.f32.mrb[43].mxu1  ;;  %v1742_v46 = vrot.slane %v1643_v36, 2 }
 0x22f   : > { %v1743_v43 = vrot.slane %v1646_v44, 2  ;;  %v10799_v48 = vpop.f32.mrb[44].mxu0 }
 0x230   : > { %v10800_v49 = vpop.f32.mrb[45].mxu0 }
 0x231   : > { %v1744_v50 = vsel %vm1741_vm4, %v1742_v46, %v1743_v43  ;;  %v10801_v52 = vadd.f32 %v10800_v49, %v10799_v48  ;;  %v10802_v56 = vpop.f32.mrb[46].mxu0 }
 0x232   : > { %v1771_v45 = vadd.f32 %v1744_v50, %v13209_v14  ;;  %v10803_v55 = vpop.f32.mrb[47].mxu0  ;;  %v1650_v58 = vpop.f32.mrb[44].mxu1 }
 0x233   : > { %v10804_v60 = vadd.f32 %v10803_v55, %v10802_v56  ;;  %v1651_v62 = vadd.f32 %v10801_v52, %v1650_v58  ;;  %v1652_v63 = vpop.f32.mrb[45].mxu1 }
 0x234   : > { %v1653_v1 = vpop.f32.mrb[46].mxu1  ;;  %v1788_v5 = vadd.f32 %v13248_v54, %v1771_v45 }
 0x235   : > { %v1745_v2 = vrot.slane %v1651_v62, 2  ;;  %v1654_v3 = vadd.f32 %v10804_v60, %v1653_v1  ;;  %v1655_v4 = vpop.f32.mrb[47].mxu1 }
 0x236   : > { %v1808_v20 = vrot.slane %v1788_v5, 2  ;;  %v1848_v26 = vrot.slane %v1788_v5, 4 }
 0x237   : > { %v1746_v59 = vsel %vm1741_vm4, %v1743_v43, %v1745_v2  ;;  %v1747_v6 = vrot.slane %v1654_v3, 2  ;;  %v10805_v7 = vpop.f32.mrb[48].mxu0 }
 0x238   : > { %v1772_v9 = vadd.f32 %v1746_v59, %v13213_v34  ;;  %v10806_v14 = vpop.f32.mrb[49].mxu0 }
 0x239   : > { %v1748_v11 = vsel %vm1741_vm4, %v1745_v2, %v1747_v6  ;;  %v10807_v10 = vadd.f32 %v10806_v14, %v10805_v7  ;;  %v10808_v12 = vpop.f32.mrb[50].mxu0  ;;  %v1889_v2 = vadd.s32 8, %v13183_v47 }
 0x23a   : > { %v1789_v16 = vadd.f32 %v13248_v54, %v1772_v9  ;;  %v1773_v17 = vadd.f32 %v1748_v11, %v13217_v25  ;;  %v10809_v18 = vpop.f32.mrb[51].mxu0  ;;  %v1658_v19 = vpop.f32.mrb[48].mxu1 }
 0x23b   : > { %v10810_v21 = vadd.f32 %v10809_v18, %v10808_v12  ;;  %v1659_v23 = vadd.f32 %v10807_v10, %v1658_v19  ;;  %v1660_v24 = vpop.f32.mrb[49].mxu1 }
 0x23c   : > { %v1809_v15 = vrot.slane %v1789_v16, 2  ;;  %v1790_v34 = vadd.f32 %v13248_v54, %v1773_v17  ;;  %v1661_v27 = vpop.f32.mrb[50].mxu1  ;;  %v1849_v29 = vrot.slane %v1789_v16, 4 }
 0x23d   : > { %v1749_v37 = vrot.slane %v1659_v23, 2  ;;  %v1662_v32 = vadd.f32 %v10810_v21, %v1661_v27  ;;  %v1663_v39 = vpop.f32.mrb[51].mxu1 }
 0x23e   : > { %v1811_v22 = vrot.slane %v1790_v34, 2  ;;  %v1810_v30 = vsel %vm1741_vm4, %v1808_v20, %v1809_v15  ;;  %v1850_v25 = vsel %vm1847_vm5, %v1848_v26, %v1849_v29  ;;  %v1851_v31 = vrot.slane %v1790_v34, 4 }
 0x23f   : > { %v1750_v35 = vsel %vm1741_vm4, %v1747_v6, %v1749_v37  ;;  %v1751_v36 = vrot.slane %v1662_v32, 2  ;;  %v10811_v41 = vpop.f32.mrb[52].mxu0  ;;  %v1837_v42 = vmax.f32 %v1788_v5, %v1810_v30  ;;  %v1895_v26 = vmul.u32 3, %v1889_v2 }
 0x240   : > { %v1774_v44 = vadd.f32 %v1750_v35, %v13221_v51  ;;  %v10812_v38 = vpop.f32.mrb[53].mxu0  ;;  %v1812_v46 = vsel %vm1741_vm4, %v1809_v15, %v1811_v22  ;;  %v1852_v43 = vsel %vm1847_vm5, %v1849_v29, %v1851_v31 }
 0x241   : > { %v1752_v48 = vsel %vm1741_vm4, %v1749_v37, %v1751_v36  ;;  %v10813_v49 = vadd.f32 %v10812_v38, %v10811_v41  ;;  %v10814_v50 = vpop.f32.mrb[54].mxu0  ;;  %v1838_v52 = vmax.f32 %v1789_v16, %v1812_v46  ;;  %v1877_v56 = vmax.f32 %v1837_v42, %v1850_v25 }
 0x242   : > { %v1791_v45 = vadd.f32 %v13248_v54, %v1774_v44  ;;  %v1775_v55 = vadd.f32 %v1752_v48, %v13225_v57  ;;  %v10815_v58 = vpop.f32.mrb[55].mxu0  ;;  %v1666_v60 = vpop.f32.mrb[52].mxu1  ;;  %vm1899_vm7 = vcmp.eq.s32.totalorder %v13185_v53, %v1895_v26 }
 0x243   : > { %v10816_v62 = vadd.f32 %v10815_v58, %v10814_v50  ;;  %v1667_v63 = vadd.f32 %v10813_v49, %v1666_v60  ;;  %v1668_v51 = vpop.f32.mrb[53].mxu1  ;;  %v1878_v1 = vmax.f32 %v1838_v52, %v1852_v43  ;;  %v9834_v58 = vsel %vm1899_vm7, 1.0, %v12710_v61 }
 0x244   : > { %v1813_v3 = vrot.slane %v1791_v45, 2  ;;  %v1792_v4 = vadd.f32 %v13248_v54, %v1775_v55  ;;  %v1669_v5 = vpop.f32.mrb[54].mxu1  ;;  %v1853_v59 = vrot.slane %v1791_v45, 4 }
 0x245   : > { %v1753_v6 = vrot.slane %v1667_v63, 2  ;;  %v1670_v7 = vadd.f32 %v10816_v62, %v1669_v5  ;;  %v1671_v9 = vpop.f32.mrb[55].mxu1  ;;  %v10936_v14 = vpack.c.bf16 %v1878_v1, %v1877_v56 }
 0x246   : > { %v1815_v11 = vrot.slane %v1792_v4, 2  ;;  %v1814_v57 = vsel %vm1741_vm4, %v1811_v22, %v1813_v3  ;;  %v1854_v10 = vsel %vm1847_vm5, %v1851_v31, %v1853_v59  ;;  %v1855_v12 = vrot.slane %v1792_v4, 4 }
 0x247   : > { %v1754_v16 = vsel %vm1741_vm4, %v1751_v36, %v1753_v6  ;;  %v1755_v17 = vrot.slane %v1670_v7, 2  ;;  %v10817_v18 = vpop.f32.mrb[56].mxu0  ;;  %10937 = vmatprep.subr.bf16.mxu0 %v10936_v14  ;;  %v1839_v19 = vmax.f32 %v1790_v34, %v1814_v57 }
 0x248   : > { %v1776_v20 = vadd.f32 %v1754_v16, %v13229_v8  ;;  %v10818_v21 = vpop.f32.mrb[57].mxu0  ;;  %10939 = vmatpush3.bf16.msra.mxu0 %v10936_v14  ;;  %v1816_v23 = vsel %vm1741_vm4, %v1813_v3, %v1815_v11  ;;  %v1856_v24 = vsel %vm1847_vm5, %v1853_v59, %v1855_v12 }
 0x249   : > { %v1756_v15 = vsel %vm1741_vm4, %v1753_v6, %v1755_v17  ;;  %v10819_v27 = vadd.f32 %v10818_v21, %v10817_v18  ;;  %v10820_v29 = vpop.f32.mrb[58].mxu0  ;;  %v1840_v37 = vmax.f32 %v1791_v45, %v1816_v23  ;;  %v1879_v32 = vmax.f32 %v1839_v19, %v1854_v10 }
 0x24a   : > { %v1793_v39 = vadd.f32 %v13248_v54, %v1776_v20  ;;  %v1777_v22 = vadd.f32 %v1756_v15, %v13233_v13  ;;  %v10821_v34 = vpop.f32.mrb[59].mxu0  ;;  %v1674_v30 = vpop.f32.mrb[56].mxu1 }
 0x24b   : > { %v10822_v8 = vadd.f32 %v10821_v34, %v10820_v29  ;;  %v1675_v25 = vadd.f32 %v10819_v27, %v1674_v30  ;;  %v1676_v31 = vpop.f32.mrb[57].mxu1  ;;  %v1880_v35 = vmax.f32 %v1840_v37, %v1856_v24  ;;  %v11193_v34 = vld [vmem:[#allocation7 + $0x12c] ss:$16 sps:$4 sm:$0xff]   ;;  %v11191_v30 = vld [vmem:[#allocation7 + $0x128] ss:$16 sps:$4 sm:$0xff]  }
 0x24c   : > { %v1817_v36 = vrot.slane %v1793_v39, 2  ;;  %v1794_v41 = vadd.f32 %v13248_v54, %v1777_v22  ;;  %v1677_v42 = vpop.f32.mrb[58].mxu1  ;;  %v1857_v44 = vrot.slane %v1793_v39, 4  ;;  %v11185_v22 = vld [vmem:[#allocation7 + $0x108] ss:$16 sps:$4 sm:$0xff]  }
 0x24d   : > { %v1757_v38 = vrot.slane %v1675_v25, 2  ;;  %v1678_v46 = vadd.f32 %v10822_v8, %v1677_v42  ;;  %v1679_v43 = vpop.f32.mrb[59].mxu1  ;;  %v10940_v48 = vpack.c.bf16 %v1880_v35, %v1879_v32  ;;  %v11199_v8 = vld [vmem:[#allocation7 + $0x14c] ss:$16 sps:$4 sm:$0xff]   ;;  %v11197_v25 = vld [vmem:[#allocation7 + $0x148] ss:$16 sps:$4 sm:$0xff]  }
 0x24e   : > { %v1819_v49 = vrot.slane %v1794_v41, 2  ;;  %v1818_v13 = vsel %vm1741_vm4, %v1815_v11, %v1817_v36  ;;  %v1858_v50 = vsel %vm1847_vm5, %v1855_v12, %v1857_v44  ;;  %v1859_v52 = vrot.slane %v1794_v41, 4  ;;  %v11205_v31 = vld [vmem:[#allocation7 + $0x16c] ss:$16 sps:$4 sm:$0xff]   ;;  %v11203_v35 = vld [vmem:[#allocation7 + $0x168] ss:$16 sps:$4 sm:$0xff]  }
 0x24f   : > { %v1758_v56 = vsel %vm1741_vm4, %v1755_v17, %v1757_v38  ;;  %v1759_v45 = vrot.slane %v1678_v46, 2  ;;  %10941 = vmatprep.subr.bf16.mxu0 %v10940_v48  ;;  %v1841_v55 = vmax.f32 %v1792_v4, %v1818_v13  ;;  %v11217_v42 = vld [vmem:[#allocation7 + $0x1ac] ss:$16 sps:$4 sm:$0xff]   ;;  %v11221_v46 = vld [vmem:[#allocation7 + $0x1c8] ss:$16 sps:$4 sm:$0xff]   ;;  %v1890_v43 = vadd.s32 16, %v13183_v47 }
 0x250   : > { %v1778_v60 = vadd.f32 %v1758_v56, %v13237_v33  ;;  %10943 = vmatpush3.bf16.msra.mxu0 %v10940_v48  ;;  %v1820_v62 = vsel %vm1741_vm4, %v1817_v36, %v1819_v49  ;;  %v1860_v63 = vsel %vm1847_vm5, %v1857_v44, %v1859_v52  ;;  %v11211_v36 = vld [vmem:[#allocation7 + $0x18c] ss:$16 sps:$4 sm:$0xff]   ;;  %v11215_v44 = vld [vmem:[#allocation7 + $0x1a8] ss:$16 sps:$4 sm:$0xff]   ;;  %v1891_v48 = vadd.s32 24, %v13183_v47 }
 0x251   : > { %v1760_v51 = vsel %vm1741_vm4, %v1757_v38, %v1759_v45  ;;  %v1780_v1 = vadd.f32 %v1759_v45, %v13241_v40  ;;  %v1842_v2 = vmax.f32 %v1793_v39, %v1820_v62  ;;  %v1881_v3 = vmax.f32 %v1841_v55, %v1858_v50  ;;  %v11187_v39 = vld [vmem:[#allocation7 + $0x10c] ss:$16 sps:$4 sm:$0xff]   ;;  %v11226_v50 = vld [vmem:[#allocation7 + $0x1e4] ss:$16 sps:$4 sm:$0xff]   ;;  %v11224_v45 = vld [vmem:[#allocation7 + $0x1e0] ss:$16 sps:$4 sm:$0xff]  }
 0x252   : > { %v1795_v5 = vadd.f32 %v13248_v54, %v1778_v60  ;;  %v1779_v59 = vadd.f32 %v1760_v51, %v13244_v28  ;;  %v11223_v38 = vld [vmem:[#allocation7 + $0x1cc] ss:$16 sps:$4 sm:$0xff]   ;;  %v1897_v13 = vmul.u32 3, %v1891_v48  ;;  %v11227_v55 = vld [vmem:[#allocation7 + $0x1e8] ss:$16 sps:$4 sm:$0xff]   ;;  %2261 = vmatprep.subr.bf16.mxu1 %v11226_v50 }
 0x253   : > { %v1797_v4 = vadd.f32 %v13248_v54, %v1780_v1  ;;  %v1882_v6 = vmax.f32 %v1842_v2, %v1860_v63  ;;  %v11232_v60 = vld [vmem:[#allocation7 + $0x4] ss:$16 sps:$4 sm:$0xff]   ;;  %2262 = vmatpush1.bf16.msra.mxu1 %v11224_v45  ;;  %v11235_v62 = vld [vmem:[#allocation7 + $0xc] ss:$16 sps:$4 sm:$0xff]   ;;  %v11296_v48 = vld [vmem:[#allocation7 + $0x260] ss:$16 sps:$4 sm:$0xff]  }
 0x254   : > { %v1821_v7 = vrot.slane %v1795_v5, 2  ;;  %v1796_v33 = vadd.f32 %v13248_v54, %v1779_v59  ;;  %v1861_v9 = vrot.slane %v1795_v5, 4  ;;  %vm1901_vm11 = vcmp.eq.s32.totalorder %v13185_v53, %v1897_v13  ;;  %2489 = vmatprep.subr.bf16.mxu1 %v11232_v60  ;;  %v11256_v28 = vld [vmem:[#allocation7 + $0x84] ss:$16 sps:$4 sm:$0xff]   ;;  %v11307_v50 = vld [vmem:[#allocation7 + $0x28c] ss:$16 sps:$4 sm:$0xff]  }
 0x255   : > { %v1825_v14 = vrot.slane %v1797_v4, 2  ;;  %v1865_v11 = vrot.slane %v1797_v4, 4  ;;  %v10944_v57 = vpack.c.bf16 %v1882_v6, %v1881_v3  ;;  %v11230_v3 = vld [vmem:[#allocation7] ss:$16 sps:$4 sm:$0xff]   ;;  %v11241_v6 = vld [vmem:[#allocation7 + $0x2c] ss:$16 sps:$4 sm:$0xff]  }
 0x256   : > { %v1823_v10 = vrot.slane %v1796_v33, 2  ;;  %v1822_v12 = vsel %vm1741_vm4, %v1819_v49, %v1821_v7  ;;  %v1862_v40 = vsel %vm1847_vm5, %v1859_v52, %v1861_v9  ;;  %v1863_v16 = vrot.slane %v1796_v33, 4  ;;  %v11229_v52 = vld [vmem:[#allocation7 + $0x1ec] ss:$16 sps:$4 sm:$0xff]   ;;  %v11304_v13 = vld [vmem:[#allocation7 + $0x284] ss:$16 sps:$4 sm:$0xff]  }
 0x257   : > { %v1846_v17 = vmax.f32 %v1797_v4, %v1825_v14  ;;  %10945 = vmatprep.subr.bf16.mxu0 %v10944_v57  ;;  %v1843_v18 = vmax.f32 %v1794_v41, %v1822_v12  ;;  %v11209_v41 = vld [vmem:[#allocation7 + $0x188] ss:$16 sps:$4 sm:$0xff]   ;;  %v1896_v49 = vmul.u32 3, %v1890_v43  ;;  %v11238_v4 = vld [vmem:[#allocation7 + $0x24] ss:$16 sps:$4 sm:$0xff]  }
 0x258   : > { %10947 = vmatpush3.bf16.msra.mxu0 %v10944_v57  ;;  %v1824_v54 = vsel %vm1741_vm4, %v1821_v7, %v1823_v10  ;;  %v1864_v19 = vsel %vm1847_vm5, %v1861_v9, %v1863_v16  ;;  %v1826_v20 = vsel %vm1741_vm4, %v1823_v10, %v1825_v14  ;;  %v1866_v21 = vsel %vm1847_vm5, %v1863_v16, %v1865_v11  ;;  %v11236_v7 = vld [vmem:[#allocation7 + $0x20] ss:$16 sps:$4 sm:$0xff]   ;;  %v11244_v9 = vld [vmem:[#allocation7 + $0x44] ss:$16 sps:$4 sm:$0xff]   ;;  %v11247_v14 = vld [vmem:[#allocation7 + $0x4c] ss:$16 sps:$4 sm:$0xff]  }
 0x259   : > { %v1844_v23 = vmax.f32 %v1795_v5, %v1824_v54  ;;  %v1883_v24 = vmax.f32 %v1843_v18, %v1862_v40  ;;  %v1845_v26 = vmax.f32 %v1796_v33, %v1826_v20  ;;  %v1886_v29 = vmax.f32 %v1846_v17, %v1865_v11  ;;  %v11233_v5 = vld [vmem:[#allocation7 + $0x8] ss:$16 sps:$4 sm:$0xff]   ;;  %v11242_v11 = vld [vmem:[#allocation7 + $0x40] ss:$16 sps:$4 sm:$0xff]   ;;  %v11250_v10 = vld [vmem:[#allocation7 + $0x64] ss:$16 sps:$4 sm:$0xff]  }
 0x25a   : > { %vm1900_vm10 = vcmp.eq.s32.totalorder %v13185_v53, %v1896_v49  ;;  %v11239_v33 = vld [vmem:[#allocation7 + $0x28] ss:$16 sps:$4 sm:$0xff]   ;;  %v11253_v12 = vld [vmem:[#allocation7 + $0x6c] ss:$16 sps:$4 sm:$0xff]   ;;  %v11248_v40 = vld [vmem:[#allocation7 + $0x60] ss:$16 sps:$4 sm:$0xff]  }
 0x25b   : > { %v1884_v15 = vmax.f32 %v1844_v23, %v1864_v19  ;;  %v1885_v27 = vmax.f32 %v1845_v26, %v1866_v21  ;;  %v9835_v56 = vsel %vm1900_vm10, 1.0, %v12710_v61  ;;  %v11245_v57 = vld [vmem:[#allocation7 + $0x48] ss:$16 sps:$4 sm:$0xff]   ;;  %v11259_v17 = vld [vmem:[#allocation7 + $0x8c] ss:$16 sps:$4 sm:$0xff]  }
 0x25c   : > { %v11251_v16 = vld [vmem:[#allocation7 + $0x68] ss:$16 sps:$4 sm:$0xff]   ;;  %v11254_v18 = vld [vmem:[#allocation7 + $0x80] ss:$16 sps:$4 sm:$0xff]   ;;  %v11262_v19 = vld [vmem:[#allocation7 + $0xa4] ss:$16 sps:$4 sm:$0xff]  }
 0x25d   : > { %v10948_v37 = vpack.c.bf16 %v1884_v15, %v1883_v24  ;;  %v10952_v32 = vpack.c.bf16 %v1886_v29, %v1885_v27  ;;  %v11257_v54 = vld [vmem:[#allocation7 + $0x88] ss:$16 sps:$4 sm:$0xff]   ;;  %v11265_v20 = vld [vmem:[#allocation7 + $0xac] ss:$16 sps:$4 sm:$0xff]   ;;  %v11260_v21 = vld [vmem:[#allocation7 + $0xa0] ss:$16 sps:$4 sm:$0xff]  }
 0x25e   : > { %v11263_v23 = vld [vmem:[#allocation7 + $0xa8] ss:$16 sps:$4 sm:$0xff]   ;;  %v11268_v24 = vld [vmem:[#allocation7 + $0xc4] ss:$16 sps:$4 sm:$0xff]   ;;  %v11271_v26 = vld [vmem:[#allocation7 + $0xcc] ss:$16 sps:$4 sm:$0xff]  }
 0x25f   : > { %10949 = vmatprep.subr.bf16.mxu0 %v10948_v37  ;;  %v11266_v15 = vld [vmem:[#allocation7 + $0xc0] ss:$16 sps:$4 sm:$0xff]   ;;  %v11269_v27 = vld [vmem:[#allocation7 + $0xc8] ss:$16 sps:$4 sm:$0xff]   ;;  %v11274_v29 = vld [vmem:[#allocation7 + $0xe4] ss:$16 sps:$4 sm:$0xff]  }
 0x260   : > { %10951 = vmatpush3.bf16.msra.mxu0 %v10948_v37  ;;  %v11277_v37 = vld [vmem:[#allocation7 + $0xec] ss:$16 sps:$4 sm:$0xff]   ;;  %v11299_v49 = vld [vmem:[#allocation7 + $0x268] ss:$16 sps:$4 sm:$0xff]   ;;  %v11310_v45 = vld [vmem:[#allocation7 + $0x2a4] ss:$16 sps:$4 sm:$0xff]  }
 0x261   : > { %10954 = vmatprep.subr.msk.bf16.mxu0 %vm13295_vm9, %v10952_v32  ;;  %v11301_v43 = vld [vmem:[#allocation7 + $0x26c] ss:$16 sps:$4 sm:$0xff]   ;;  %v11311_v60 = vld [vmem:[#allocation7 + $0x2a8] ss:$16 sps:$4 sm:$0xff]  }
 0x264   : > { %10957 = vmatpush3.bf16.msk.msra.mxu0 %vm13295_vm9, %v10952_v32  ;;  %v11272_v32 = vld [vmem:[#allocation7 + $0xe0] ss:$16 sps:$4 sm:$0xff]  }
 0x265   : > { %2288 = vmatprep.subr.bf16.mxu0 %v11187_v39  ;;  %v11275_v39 = vld [vmem:[#allocation7 + $0xe8] ss:$16 sps:$4 sm:$0xff]  }
 0x267   : > { %10911 = vmatmul.mubr.msk.f32.vlgmr.msra.gmra.mrb[60].mxu0 %vm1910_vm2, %v9834_v58  ;;  %v9836_v58 = vsel %vm1901_vm11, 1.0, %v12710_v61 }
 0x268   : > { %2289 = vmatpush1.bf16.msra.mxu0 %v11185_v22  ;;  %10913 = vmatprep.mubr.msk.f32.mxu0 %vm1910_vm2, %v9835_v56  ;;  %v11280_v22 = vld [vmem:[#allocation7 + $0x204] ss:$16 sps:$4 sm:$0xff]   ;;  %v11305_v56 = vld [vmem:[#allocation7 + $0x288] ss:$16 sps:$4 sm:$0xff]  }
 0x269   : > { %2290 = vmatprep.subr.bf16.mxu0 %v11193_v34  ;;  %v11283_v34 = vld [vmem:[#allocation7 + $0x20c] ss:$16 sps:$4 sm:$0xff]  }
 0x26b   : > { %10914 = vmatmul.mubr.msk.f32.gmra.mrb[62].mxu0 %vm1910_vm2, %v9836_v58  ;;  %v11308_v58 = vld [vmem:[#allocation7 + $0x2a0] ss:$16 sps:$4 sm:$0xff]  }
 0x26c   : > { %2291 = vmatpush1.bf16.msra.mxu0 %v11191_v30  ;;  %2320 = vmatprep.mubr.bf16.mxu0 %v12709_v0  ;;  %v11278_v30 = vld [vmem:[#allocation7 + $0x200] ss:$16 sps:$4 sm:$0xff]  }
 0x26d   : > { %2292 = vmatprep.subr.bf16.mxu0 %v11199_v8  ;;  %v11281_v8 = vld [vmem:[#allocation7 + $0x208] ss:$16 sps:$4 sm:$0xff]  }
 0x270   : > { %2293 = vmatpush1.bf16.msra.mxu0 %v11197_v25  ;;  %v11286_v25 = vld [vmem:[#allocation7 + $0x224] ss:$16 sps:$4 sm:$0xff]  }
 0x271   : > { %2294 = vmatprep.subr.bf16.mxu0 %v11205_v31  ;;  %v11289_v31 = vld [vmem:[#allocation7 + $0x22c] ss:$16 sps:$4 sm:$0xff]  }
 0x274   : > { %2295 = vmatpush1.bf16.msra.mxu0 %v11203_v35  ;;  %v11284_v35 = vld [vmem:[#allocation7 + $0x220] ss:$16 sps:$4 sm:$0xff]  }
 0x275   : > { %2296 = vmatprep.subr.bf16.mxu0 %v11211_v36  ;;  %v11287_v36 = vld [vmem:[#allocation7 + $0x228] ss:$16 sps:$4 sm:$0xff]  }
 0x278   : > { %2297 = vmatpush1.bf16.msra.mxu0 %v11209_v41  ;;  %v11292_v41 = vld [vmem:[#allocation7 + $0x244] ss:$16 sps:$4 sm:$0xff]  }
 0x279   : > { %2298 = vmatprep.subr.bf16.mxu0 %v11217_v42  ;;  %v11295_v42 = vld [vmem:[#allocation7 + $0x24c] ss:$16 sps:$4 sm:$0xff]  }
 0x27c   : > { %2299 = vmatpush1.bf16.msra.mxu0 %v11215_v44  ;;  %v11290_v44 = vld [vmem:[#allocation7 + $0x240] ss:$16 sps:$4 sm:$0xff]  }
 0x27d   : > { %2300 = vmatprep.subr.bf16.mxu0 %v11223_v38  ;;  %v11293_v38 = vld [vmem:[#allocation7 + $0x248] ss:$16 sps:$4 sm:$0xff]  }
 0x280   : > { %2301 = vmatpush1.bf16.msra.mxu0 %v11221_v46  ;;  %v11298_v46 = vld [vmem:[#allocation7 + $0x264] ss:$16 sps:$4 sm:$0xff]  }
 0x281   : > { %2302 = vmatprep.subr.bf16.mxu0 %v11229_v52  ;;  %v11302_v52 = vld [vmem:[#allocation7 + $0x280] ss:$16 sps:$4 sm:$0xff]  }
 0x284   : > { %2303 = vmatpush1.bf16.msra.mxu0 %v11227_v55  ;;  %v11313_v55 = vld [vmem:[#allocation7 + $0x2ac] ss:$16 sps:$4 sm:$0xff]  }
 0x285   : > { %2530 = vmatprep.subr.bf16.mxu0 %v11235_v62  ;;  %v11316_v62 = vld [vmem:[#allocation7 + $0x2c4] ss:$16 sps:$4 sm:$0xff]  }
 0x33a   : > { %v10912_v63 = vpop.f32.mrb[60].mxu0 }
 0x33b   : > { %v2013_v51 = vmax.f32 %v10912_v63, 0.0  ;;  %v1993_v1 = vpop.f32.mrb[61].mxu0  ;;  %v11319_v63 = vld [vmem:[#allocation7 + $0x2cc] ss:$16 sps:$4 sm:$0xff]  }
 0x33c   : > { %v2012_v53 = vmax.f32 %v1993_v1, 0.0  ;;  %v11317_v1 = vld [vmem:[#allocation7 + $0x2c8] ss:$16 sps:$4 sm:$0xff]  }
 0x33e   : > { %v13317_v2 = vpack.c.bf16 %v2013_v51, %v2012_v53  ;;  %v11314_v51 = vld [vmem:[#allocation7 + $0x2c0] ss:$16 sps:$4 sm:$0xff]   ;;  %v11322_v53 = vld [vmem:[#allocation7 + $0x2e4] ss:$16 sps:$4 sm:$0xff]  }
 0x340   : > { %v13320_v59 = vshrl.u32 %v13317_v2, 16 }
 0x342   : > { %2280 = vmatmul.mubr.bf16.vlgmr.msra.gmra.mrb[60].mxu1 %v13320_v59  ;;  %2321 = vmatmul.mubr.bf16.vlgmr.msra.gmra.mrb[64].mxu0 %v13320_v59 }
 0x343   : > { %2490 = vmatpush1.bf16.msra.mxu1 %v11230_v3  ;;  %2531 = vmatpush1.bf16.msra.mxu0 %v11233_v5  ;;  %v11325_v3 = vld [vmem:[#allocation7 + $0x2ec] ss:$16 sps:$4 sm:$0xff]   ;;  %v11320_v5 = vld [vmem:[#allocation7 + $0x2e0] ss:$16 sps:$4 sm:$0xff]  }
 0x344   : > { %2491 = vmatprep.subr.bf16.mxu1 %v11238_v4  ;;  %2532 = vmatprep.subr.bf16.mxu0 %v11241_v6  ;;  %v11323_v4 = vld [vmem:[#allocation7 + $0x2e8] ss:$16 sps:$4 sm:$0xff]   ;;  %v11328_v6 = vld [vmem:[#allocation7 + $0x304] ss:$16 sps:$4 sm:$0xff]  }
 0x345   : > { %2521 = vmatprep.mubr.bf16.mxu1 %v12709_v0  ;;  %2562 = vmatprep.mubr.bf16.mxu0 %v12709_v0 }
 0x347   : > { %2492 = vmatpush1.bf16.msra.mxu1 %v11236_v7  ;;  %2533 = vmatpush1.bf16.msra.mxu0 %v11239_v33  ;;  %v11331_v7 = vld [vmem:[#allocation7 + $0x30c] ss:$16 sps:$4 sm:$0xff]   ;;  %v11326_v33 = vld [vmem:[#allocation7 + $0x300] ss:$16 sps:$4 sm:$0xff]  }
 0x348   : > { %2493 = vmatprep.subr.bf16.mxu1 %v11244_v9  ;;  %2534 = vmatprep.subr.bf16.mxu0 %v11247_v14  ;;  %v11329_v9 = vld [vmem:[#allocation7 + $0x308] ss:$16 sps:$4 sm:$0xff]   ;;  %v2605_v14 = vrot.slane %v13317_v2, 1 }
 0x34b   : > { %2494 = vmatpush1.bf16.msra.mxu1 %v11242_v11  ;;  %2535 = vmatpush1.bf16.msra.mxu0 %v11245_v57  ;;  %v11334_v11 = vld [vmem:[#allocation7 + $0x324] ss:$16 sps:$4 sm:$0xff]   ;;  %v11337_v57 = vld [vmem:[#allocation7 + $0x32c] ss:$16 sps:$4 sm:$0xff]  }
 0x34c   : > { %2495 = vmatprep.subr.bf16.mxu1 %v11250_v10  ;;  %2536 = vmatprep.subr.bf16.mxu0 %v11253_v12  ;;  %v11332_v10 = vld [vmem:[#allocation7 + $0x320] ss:$16 sps:$4 sm:$0xff]   ;;  %v11335_v12 = vld [vmem:[#allocation7 + $0x328] ss:$16 sps:$4 sm:$0xff]  }
 0x34f   : > { %2496 = vmatpush1.bf16.msra.mxu1 %v11248_v40  ;;  %2537 = vmatpush1.bf16.msra.mxu0 %v11251_v16  ;;  %v11340_v40 = vld [vmem:[#allocation7 + $0x344] ss:$16 sps:$4 sm:$0xff]   ;;  %v11343_v16 = vld [vmem:[#allocation7 + $0x34c] ss:$16 sps:$4 sm:$0xff]  }
 0x350   : > { %2497 = vmatprep.subr.bf16.mxu1 %v11256_v28  ;;  %2538 = vmatprep.subr.bf16.mxu0 %v11259_v17  ;;  %v11338_v28 = vld [vmem:[#allocation7 + $0x340] ss:$16 sps:$4 sm:$0xff]   ;;  %v11341_v17 = vld [vmem:[#allocation7 + $0x348] ss:$16 sps:$4 sm:$0xff]  }
 0x353   : > { %2498 = vmatpush1.bf16.msra.mxu1 %v11254_v18  ;;  %2539 = vmatpush1.bf16.msra.mxu0 %v11257_v54  ;;  %v11346_v18 = vld [vmem:[#allocation7 + $0x364] ss:$16 sps:$4 sm:$0xff]   ;;  %v11349_v54 = vld [vmem:[#allocation7 + $0x36c] ss:$16 sps:$4 sm:$0xff]  }
 0x354   : > { %2499 = vmatprep.subr.bf16.mxu1 %v11262_v19  ;;  %2540 = vmatprep.subr.bf16.mxu0 %v11265_v20  ;;  %v11344_v19 = vld [vmem:[#allocation7 + $0x360] ss:$16 sps:$4 sm:$0xff]   ;;  %v11347_v20 = vld [vmem:[#allocation7 + $0x368] ss:$16 sps:$4 sm:$0xff]  }
 0x357   : > { %2500 = vmatpush1.bf16.msra.mxu1 %v11260_v21  ;;  %2541 = vmatpush1.bf16.msra.mxu0 %v11263_v23  ;;  %v11352_v21 = vld [vmem:[#allocation7 + $0x384] ss:$16 sps:$4 sm:$0xff]   ;;  %v11355_v23 = vld [vmem:[#allocation7 + $0x38c] ss:$16 sps:$4 sm:$0xff]  }
 0x358   : > { %2501 = vmatprep.subr.bf16.mxu1 %v11268_v24  ;;  %2542 = vmatprep.subr.bf16.mxu0 %v11271_v26  ;;  %v11350_v24 = vld [vmem:[#allocation7 + $0x380] ss:$16 sps:$4 sm:$0xff]   ;;  %v11353_v26 = vld [vmem:[#allocation7 + $0x388] ss:$16 sps:$4 sm:$0xff]  }
 0x35b   : > { %2502 = vmatpush1.bf16.msra.mxu1 %v11266_v15  ;;  %2543 = vmatpush1.bf16.msra.mxu0 %v11269_v27  ;;  %v11358_v15 = vld [vmem:[#allocation7 + $0x3a4] ss:$16 sps:$4 sm:$0xff]   ;;  %v11361_v27 = vld [vmem:[#allocation7 + $0x3ac] ss:$16 sps:$4 sm:$0xff]  }
 0x35c   : > { %2503 = vmatprep.subr.bf16.mxu1 %v11274_v29  ;;  %2544 = vmatprep.subr.bf16.mxu0 %v11277_v37  ;;  %v11356_v29 = vld [vmem:[#allocation7 + $0x3a0] ss:$16 sps:$4 sm:$0xff]   ;;  %v11359_v37 = vld [vmem:[#allocation7 + $0x3a8] ss:$16 sps:$4 sm:$0xff]  }
 0x35f   : > { %2504 = vmatpush1.bf16.msra.mxu1 %v11272_v32  ;;  %2545 = vmatpush1.bf16.msra.mxu0 %v11275_v39  ;;  %v10915_v32 = vpop.f32.mrb[62].mxu0  ;;  %v11364_v39 = vld [vmem:[#allocation7 + $0x3c4] ss:$16 sps:$4 sm:$0xff]  }
 0x360   : > { %2767 = vmatprep.subr.bf16.mxu1 %v11280_v22  ;;  %2808 = vmatprep.subr.bf16.mxu0 %v11283_v34  ;;  %v11367_v22 = vld [vmem:[#allocation7 + $0x3cc] ss:$16 sps:$4 sm:$0xff]   ;;  %v2003_v34 = vpop.f32.mrb[63].mxu0 }
 0x362   : > { %2522 = vmatmul.mubr.bf16.vlgmr.msra.gmra.mrb[64].mxu1 %v13317_v2  ;;  %2563 = vmatmul.mubr.bf16.vlgmr.msra.gmra.mrb[68].mxu0 %v13317_v2 }
 0x363   : > { %2768 = vmatpush1.bf16.msra.mxu1 %v11278_v30  ;;  %2809 = vmatpush1.bf16.msra.mxu0 %v11281_v8  ;;  %v2015_v30 = vmax.f32 %v10915_v32, 0.0  ;;  %v2014_v8 = vmax.f32 %v2003_v34, 0.0  ;;  %v11442_v32 = vld [vmem:[#allocation7 + $0x564] ss:$16 sps:$4 sm:$0xff]   ;;  %v11443_v34 = vld [vmem:[#allocation7 + $0x568] ss:$16 sps:$4 sm:$0xff]  }
 0x364   : > { %2769 = vmatprep.subr.bf16.mxu1 %v11286_v25  ;;  %2810 = vmatprep.subr.bf16.mxu0 %v11289_v31  ;;  %v11362_v25 = vld [vmem:[#allocation7 + $0x3c0] ss:$16 sps:$4 sm:$0xff]   ;;  %v11365_v31 = vld [vmem:[#allocation7 + $0x3c8] ss:$16 sps:$4 sm:$0xff]  }
 0x365   : > { %2799 = vmatprep.mubr.bf16.mxu1 %v12709_v0  ;;  %2840 = vmatprep.mubr.bf16.mxu0 %v12709_v0 }
 0x367   : > { %2770 = vmatpush1.bf16.msra.mxu1 %v11284_v35  ;;  %2811 = vmatpush1.bf16.msra.mxu0 %v11287_v36  ;;  %v13333_v35 = vpack.c.bf16 %v2015_v30, %v2014_v8  ;;  %v11370_v36 = vld [vmem:[#allocation7 + $0x3e4] ss:$16 sps:$4 sm:$0xff]   ;;  %v11451_v8 = vld [vmem:[#allocation7 + $0x58c] ss:$16 sps:$4 sm:$0xff]  }
 0x368   : > { %2771 = vmatprep.subr.bf16.mxu1 %v11292_v41  ;;  %2812 = vmatprep.subr.bf16.mxu0 %v11295_v42  ;;  %v11373_v41 = vld [vmem:[#allocation7 + $0x3ec] ss:$16 sps:$4 sm:$0xff]   ;;  %v11368_v42 = vld [vmem:[#allocation7 + $0x3e0] ss:$16 sps:$4 sm:$0xff]   ;;  %v11448_v30 = vld [vmem:[#allocation7 + $0x584] ss:$16 sps:$4 sm:$0xff]  }
 0x36b   : > { %2772 = vmatpush1.bf16.msra.mxu1 %v11290_v44  ;;  %2813 = vmatpush1.bf16.msra.mxu0 %v11293_v38  ;;  %v11371_v44 = vld [vmem:[#allocation7 + $0x3e8] ss:$16 sps:$4 sm:$0xff]   ;;  %v11376_v38 = vld [vmem:[#allocation7 + $0x404] ss:$16 sps:$4 sm:$0xff]  }
 0x36c   : > { %2773 = vmatprep.subr.bf16.mxu1 %v11298_v46  ;;  %2814 = vmatprep.subr.bf16.mxu0 %v11301_v43  ;;  %v11379_v46 = vld [vmem:[#allocation7 + $0x40c] ss:$16 sps:$4 sm:$0xff]   ;;  %v11374_v43 = vld [vmem:[#allocation7 + $0x400] ss:$16 sps:$4 sm:$0xff]  }
 0x36f   : > { %2774 = vmatpush1.bf16.msra.mxu1 %v11296_v48  ;;  %2815 = vmatpush1.bf16.msra.mxu0 %v11299_v49  ;;  %v11377_v48 = vld [vmem:[#allocation7 + $0x408] ss:$16 sps:$4 sm:$0xff]   ;;  %v2886_v49 = vrot.slane %v13320_v59, 1 }
 0x370   : > { %2775 = vmatprep.subr.bf16.mxu1 %v11304_v13  ;;  %2816 = vmatprep.subr.bf16.mxu0 %v11307_v50  ;;  %v11382_v13 = vld [vmem:[#allocation7 + $0x424] ss:$16 sps:$4 sm:$0xff]   ;;  %v11385_v50 = vld [vmem:[#allocation7 + $0x42c] ss:$16 sps:$4 sm:$0xff]  }
 0x373   : > { %2776 = vmatpush1.bf16.msra.mxu1 %v11302_v52  ;;  %2817 = vmatpush1.bf16.msra.mxu0 %v11305_v56  ;;  %v11380_v52 = vld [vmem:[#allocation7 + $0x420] ss:$16 sps:$4 sm:$0xff]   ;;  %v11383_v56 = vld [vmem:[#allocation7 + $0x428] ss:$16 sps:$4 sm:$0xff]  }
 0x374   : > { %2777 = vmatprep.subr.bf16.mxu1 %v11310_v45  ;;  %2818 = vmatprep.subr.bf16.mxu0 %v11313_v55  ;;  %v11388_v45 = vld [vmem:[#allocation7 + $0x444] ss:$16 sps:$4 sm:$0xff]   ;;  %v11391_v55 = vld [vmem:[#allocation7 + $0x44c] ss:$16 sps:$4 sm:$0xff]  }
 0x377   : > { %2778 = vmatpush1.bf16.msra.mxu1 %v11308_v58  ;;  %2819 = vmatpush1.bf16.msra.mxu0 %v11311_v60  ;;  %v11386_v58 = vld [vmem:[#allocation7 + $0x440] ss:$16 sps:$4 sm:$0xff]   ;;  %v11389_v60 = vld [vmem:[#allocation7 + $0x448] ss:$16 sps:$4 sm:$0xff]  }
 0x378   : > { %2779 = vmatprep.subr.bf16.mxu1 %v11316_v62  ;;  %2820 = vmatprep.subr.bf16.mxu0 %v11319_v63  ;;  %v11394_v62 = vld [vmem:[#allocation7 + $0x464] ss:$16 sps:$4 sm:$0xff]   ;;  %v11397_v63 = vld [vmem:[#allocation7 + $0x46c] ss:$16 sps:$4 sm:$0xff]  }
 0x37b   : > { %2780 = vmatpush1.bf16.msra.mxu1 %v11314_v51  ;;  %2821 = vmatpush1.bf16.msra.mxu0 %v11317_v1  ;;  %v11392_v51 = vld [vmem:[#allocation7 + $0x460] ss:$16 sps:$4 sm:$0xff]   ;;  %v11395_v1 = vld [vmem:[#allocation7 + $0x468] ss:$16 sps:$4 sm:$0xff]  }
 0x37c   : > { %2781 = vmatprep.subr.bf16.mxu1 %v11322_v53  ;;  %2822 = vmatprep.subr.bf16.mxu0 %v11325_v3  ;;  %v11400_v53 = vld [vmem:[#allocation7 + $0x484] ss:$16 sps:$4 sm:$0xff]   ;;  %v11403_v3 = vld [vmem:[#allocation7 + $0x48c] ss:$16 sps:$4 sm:$0xff]  }
 0x37f   : > { %2782 = vmatpush1.bf16.msra.mxu1 %v11320_v5  ;;  %2823 = vmatpush1.bf16.msra.mxu0 %v11323_v4  ;;  %v11398_v5 = vld [vmem:[#allocation7 + $0x480] ss:$16 sps:$4 sm:$0xff]   ;;  %v11401_v4 = vld [vmem:[#allocation7 + $0x488] ss:$16 sps:$4 sm:$0xff]  }
 0x380   : > { %3048 = vmatprep.subr.bf16.mxu1 %v11328_v6  ;;  %3089 = vmatprep.subr.bf16.mxu0 %v11331_v7  ;;  %v11406_v6 = vld [vmem:[#allocation7 + $0x4a4] ss:$16 sps:$4 sm:$0xff]   ;;  %v11409_v7 = vld [vmem:[#allocation7 + $0x4ac] ss:$16 sps:$4 sm:$0xff]  }
 0x382   : > { %2800 = vmatmul.mubr.bf16.vlgmr.msra.gmra.mrb[68].mxu1 %v2605_v14  ;;  %2841 = vmatmul.mubr.bf16.vlgmr.msra.gmra.mrb[72].mxu0 %v2605_v14  ;;  %v11412_v14 = vld [vmem:[#allocation7 + $0x4c4] ss:$16 sps:$4 sm:$0xff]  }
 0x383   : > { %3049 = vmatpush1.bf16.msra.mxu1 %v11326_v33  ;;  %3090 = vmatpush1.bf16.msra.mxu0 %v11329_v9  ;;  %v11404_v33 = vld [vmem:[#allocation7 + $0x4a0] ss:$16 sps:$4 sm:$0xff]   ;;  %v11407_v9 = vld [vmem:[#allocation7 + $0x4a8] ss:$16 sps:$4 sm:$0xff]  }
 0x384   : > { %3050 = vmatprep.subr.bf16.mxu1 %v11334_v11  ;;  %3091 = vmatprep.subr.bf16.mxu0 %v11337_v57  ;;  %v11415_v11 = vld [vmem:[#allocation7 + $0x4cc] ss:$16 sps:$4 sm:$0xff]   ;;  %v11410_v57 = vld [vmem:[#allocation7 + $0x4c0] ss:$16 sps:$4 sm:$0xff]  }
 0x385   : > { %3080 = vmatprep.mubr.bf16.mxu1 %v12709_v0  ;;  %3121 = vmatprep.mubr.bf16.mxu0 %v12709_v0 }
 0x387   : > { %3051 = vmatpush1.bf16.msra.mxu1 %v11332_v10  ;;  %3092 = vmatpush1.bf16.msra.mxu0 %v11335_v12  ;;  %v11413_v10 = vld [vmem:[#allocation7 + $0x4c8] ss:$16 sps:$4 sm:$0xff]   ;;  %v11418_v12 = vld [vmem:[#allocation7 + $0x4e4] ss:$16 sps:$4 sm:$0xff]  }
 0x388   : > { %3052 = vmatprep.subr.bf16.mxu1 %v11340_v40  ;;  %3093 = vmatprep.subr.bf16.mxu0 %v11343_v16  ;;  %v11421_v40 = vld [vmem:[#allocation7 + $0x4ec] ss:$16 sps:$4 sm:$0xff]   ;;  %v11416_v16 = vld [vmem:[#allocation7 + $0x4e0] ss:$16 sps:$4 sm:$0xff]  }
 0x38b   : > { %3053 = vmatpush1.bf16.msra.mxu1 %v11338_v28  ;;  %3094 = vmatpush1.bf16.msra.mxu0 %v11341_v17  ;;  %v11419_v28 = vld [vmem:[#allocation7 + $0x4e8] ss:$16 sps:$4 sm:$0xff]   ;;  %v11424_v17 = vld [vmem:[#allocation7 + $0x504] ss:$16 sps:$4 sm:$0xff]  }
 0x38c   : > { %3054 = vmatprep.subr.bf16.mxu1 %v11346_v18  ;;  %3095 = vmatprep.subr.bf16.mxu0 %v11349_v54  ;;  %v11427_v18 = vld [vmem:[#allocation7 + $0x50c] ss:$16 sps:$4 sm:$0xff]   ;;  %v11422_v54 = vld [vmem:[#allocation7 + $0x500] ss:$16 sps:$4 sm:$0xff]  }
 0x38f   : > { %3055 = vmatpush1.bf16.msra.mxu1 %v11344_v19  ;;  %3096 = vmatpush1.bf16.msra.mxu0 %v11347_v20  ;;  %v11425_v19 = vld [vmem:[#allocation7 + $0x508] ss:$16 sps:$4 sm:$0xff]   ;;  %v3167_v20 = vrot.slane %v13317_v2, 2 }
 0x390   : > { %3056 = vmatprep.subr.bf16.mxu1 %v11352_v21  ;;  %3097 = vmatprep.subr.bf16.mxu0 %v11355_v23  ;;  %v11430_v21 = vld [vmem:[#allocation7 + $0x524] ss:$16 sps:$4 sm:$0xff]   ;;  %v11433_v23 = vld [vmem:[#allocation7 + $0x52c] ss:$16 sps:$4 sm:$0xff]  }
 0x393   : > { %3057 = vmatpush1.bf16.msra.mxu1 %v11350_v24  ;;  %3098 = vmatpush1.bf16.msra.mxu0 %v11353_v26  ;;  %v11428_v24 = vld [vmem:[#allocation7 + $0x520] ss:$16 sps:$4 sm:$0xff]   ;;  %v11431_v26 = vld [vmem:[#allocation7 + $0x528] ss:$16 sps:$4 sm:$0xff]  }
 0x394   : > { %3058 = vmatprep.subr.bf16.mxu1 %v11358_v15  ;;  %3099 = vmatprep.subr.bf16.mxu0 %v11361_v27  ;;  %v11436_v15 = vld [vmem:[#allocation7 + $0x544] ss:$16 sps:$4 sm:$0xff]   ;;  %v11439_v27 = vld [vmem:[#allocation7 + $0x54c] ss:$16 sps:$4 sm:$0xff]  }
 0x397   : > { %3059 = vmatpush1.bf16.msra.mxu1 %v11356_v29  ;;  %3100 = vmatpush1.bf16.msra.mxu0 %v11359_v37  ;;  %v11434_v29 = vld [vmem:[#allocation7 + $0x540] ss:$16 sps:$4 sm:$0xff]   ;;  %v11437_v37 = vld [vmem:[#allocation7 + $0x548] ss:$16 sps:$4 sm:$0xff]  }
 0x398   : > { %3060 = vmatprep.subr.bf16.mxu1 %v11364_v39  ;;  %3101 = vmatprep.subr.bf16.mxu0 %v11367_v22  ;;  %v11445_v39 = vld [vmem:[#allocation7 + $0x56c] ss:$16 sps:$4 sm:$0xff]   ;;  %v11440_v22 = vld [vmem:[#allocation7 + $0x560] ss:$16 sps:$4 sm:$0xff]  }
 0x39b   : > { %3061 = vmatpush1.bf16.msra.mxu1 %v11362_v25  ;;  %3102 = vmatpush1.bf16.msra.mxu0 %v11365_v31  ;;  %v11446_v25 = vld [vmem:[#allocation7 + $0x580] ss:$16 sps:$4 sm:$0xff]   ;;  %v11449_v31 = vld [vmem:[#allocation7 + $0x588] ss:$16 sps:$4 sm:$0xff]  }
 0x39c   : > { %3062 = vmatprep.subr.bf16.mxu1 %v11370_v36  ;;  %3103 = vmatprep.subr.bf16.mxu0 %v11373_v41  ;;  %v11454_v36 = vld [vmem:[#allocation7 + $0x5a4] ss:$16 sps:$4 sm:$0xff]   ;;  %v11457_v41 = vld [vmem:[#allocation7 + $0x5ac] ss:$16 sps:$4 sm:$0xff]  }
 0x39f   : > { %3063 = vmatpush1.bf16.msra.mxu1 %v11368_v42  ;;  %3104 = vmatpush1.bf16.msra.mxu0 %v11371_v44  ;;  %v11452_v42 = vld [vmem:[#allocation7 + $0x5a0] ss:$16 sps:$4 sm:$0xff]   ;;  %v11455_v44 = vld [vmem:[#allocation7 + $0x5a8] ss:$16 sps:$4 sm:$0xff]  }
 0x3a0   : > { %3329 = vmatprep.subr.bf16.mxu1 %v11376_v38  ;;  %3370 = vmatprep.subr.bf16.mxu0 %v11379_v46  ;;  %v11460_v38 = vld [vmem:[#allocation7 + $0x5c4] ss:$16 sps:$4 sm:$0xff]   ;;  %v11463_v46 = vld [vmem:[#allocation7 + $0x5cc] ss:$16 sps:$4 sm:$0xff]  }
 0x3a2   : > { %3081 = vmatmul.mubr.bf16.vlgmr.msra.gmra.mrb[72].mxu1 %v2886_v49  ;;  %3122 = vmatmul.mubr.bf16.vlgmr.msra.gmra.mrb[76].mxu0 %v2886_v49  ;;  %v11466_v49 = vld [vmem:[#allocation7 + $0x5e4] ss:$16 sps:$4 sm:$0xff]  }
 0x3a3   : > { %3330 = vmatpush1.bf16.msra.mxu1 %v11374_v43  ;;  %3371 = vmatpush1.bf16.msra.mxu0 %v11377_v48  ;;  %v11458_v43 = vld [vmem:[#allocation7 + $0x5c0] ss:$16 sps:$4 sm:$0xff]   ;;  %v11461_v48 = vld [vmem:[#allocation7 + $0x5c8] ss:$16 sps:$4 sm:$0xff]  }
 0x3a4   : > { %3331 = vmatprep.subr.bf16.mxu1 %v11382_v13  ;;  %3372 = vmatprep.subr.bf16.mxu0 %v11385_v50  ;;  %v11469_v13 = vld [vmem:[#allocation7 + $0x5ec] ss:$16 sps:$4 sm:$0xff]   ;;  %v11464_v50 = vld [vmem:[#allocation7 + $0x5e0] ss:$16 sps:$4 sm:$0xff]  }
 0x3a5   : > { %3361 = vmatprep.mubr.bf16.mxu1 %v12709_v0  ;;  %3402 = vmatprep.mubr.bf16.mxu0 %v12709_v0 }
 0x3a7   : > { %3332 = vmatpush1.bf16.msra.mxu1 %v11380_v52  ;;  %3373 = vmatpush1.bf16.msra.mxu0 %v11383_v56  ;;  %v11467_v52 = vld [vmem:[#allocation7 + $0x5e8] ss:$16 sps:$4 sm:$0xff]   ;;  %v11472_v56 = vld [vmem:[#allocation7 + $0x604] ss:$16 sps:$4 sm:$0xff]  }
 0x3a8   : > { %3333 = vmatprep.subr.bf16.mxu1 %v11388_v45  ;;  %3374 = vmatprep.subr.bf16.mxu0 %v11391_v55  ;;  %v11475_v45 = vld [vmem:[#allocation7 + $0x60c] ss:$16 sps:$4 sm:$0xff]   ;;  %v11470_v55 = vld [vmem:[#allocation7 + $0x600] ss:$16 sps:$4 sm:$0xff]  }
 0x3ab   : > { %3334 = vmatpush1.bf16.msra.mxu1 %v11386_v58  ;;  %3375 = vmatpush1.bf16.msra.mxu0 %v11389_v60  ;;  %v11473_v58 = vld [vmem:[#allocation7 + $0x608] ss:$16 sps:$4 sm:$0xff]   ;;  %v3448_v60 = vrot.slane %v13320_v59, 2 }
 0x3ac   : > { %3335 = vmatprep.subr.bf16.mxu1 %v11394_v62  ;;  %3376 = vmatprep.subr.bf16.mxu0 %v11397_v63  ;;  %v11478_v62 = vld [vmem:[#allocation7 + $0x624] ss:$16 sps:$4 sm:$0xff]   ;;  %v11481_v63 = vld [vmem:[#allocation7 + $0x62c] ss:$16 sps:$4 sm:$0xff]  }
 0x3af   : > { %3336 = vmatpush1.bf16.msra.mxu1 %v11392_v51  ;;  %3377 = vmatpush1.bf16.msra.mxu0 %v11395_v1  ;;  %v11476_v51 = vld [vmem:[#allocation7 + $0x620] ss:$16 sps:$4 sm:$0xff]   ;;  %v11479_v1 = vld [vmem:[#allocation7 + $0x628] ss:$16 sps:$4 sm:$0xff]  }
 0x3b0   : > { %3337 = vmatprep.subr.bf16.mxu1 %v11400_v53  ;;  %3378 = vmatprep.subr.bf16.mxu0 %v11403_v3  ;;  %v11484_v53 = vld [vmem:[#allocation7 + $0x644] ss:$16 sps:$4 sm:$0xff]   ;;  %v11487_v3 = vld [vmem:[#allocation7 + $0x64c] ss:$16 sps:$4 sm:$0xff]  }
 0x3b3   : > { %3338 = vmatpush1.bf16.msra.mxu1 %v11398_v5  ;;  %3379 = vmatpush1.bf16.msra.mxu0 %v11401_v4  ;;  %v11482_v5 = vld [vmem:[#allocation7 + $0x640] ss:$16 sps:$4 sm:$0xff]   ;;  %v11485_v4 = vld [vmem:[#allocation7 + $0x648] ss:$16 sps:$4 sm:$0xff]  }
 0x3b4   : > { %3339 = vmatprep.subr.bf16.mxu1 %v11406_v6  ;;  %3380 = vmatprep.subr.bf16.mxu0 %v11409_v7  ;;  %v11490_v6 = vld [vmem:[#allocation7 + $0x664] ss:$16 sps:$4 sm:$0xff]   ;;  %v11493_v7 = vld [vmem:[#allocation7 + $0x66c] ss:$16 sps:$4 sm:$0xff]  }
 0x3b7   : > { %3340 = vmatpush1.bf16.msra.mxu1 %v11404_v33  ;;  %3381 = vmatpush1.bf16.msra.mxu0 %v11407_v9  ;;  %v11488_v33 = vld [vmem:[#allocation7 + $0x660] ss:$16 sps:$4 sm:$0xff]   ;;  %v11491_v9 = vld [vmem:[#allocation7 + $0x668] ss:$16 sps:$4 sm:$0xff]  }
 0x3b8   : > { %3341 = vmatprep.subr.bf16.mxu1 %v11412_v14  ;;  %3382 = vmatprep.subr.bf16.mxu0 %v11415_v11  ;;  %v11496_v14 = vld [vmem:[#allocation7 + $0x684] ss:$16 sps:$4 sm:$0xff]   ;;  %v11499_v11 = vld [vmem:[#allocation7 + $0x68c] ss:$16 sps:$4 sm:$0xff]  }
 0x3bb   : > { %3342 = vmatpush1.bf16.msra.mxu1 %v11410_v57  ;;  %3383 = vmatpush1.bf16.msra.mxu0 %v11413_v10  ;;  %v11494_v57 = vld [vmem:[#allocation7 + $0x680] ss:$16 sps:$4 sm:$0xff]   ;;  %v11497_v10 = vld [vmem:[#allocation7 + $0x688] ss:$16 sps:$4 sm:$0xff]  }
 0x3bc   : > { %3343 = vmatprep.subr.bf16.mxu1 %v11418_v12  ;;  %3384 = vmatprep.subr.bf16.mxu0 %v11421_v40  ;;  %v11502_v12 = vld [vmem:[#allocation7 + $0x6a4] ss:$16 sps:$4 sm:$0xff]   ;;  %v11505_v40 = vld [vmem:[#allocation7 + $0x6ac] ss:$16 sps:$4 sm:$0xff]  }
 0x3bf   : > { %3344 = vmatpush1.bf16.msra.mxu1 %v11416_v16  ;;  %3385 = vmatpush1.bf16.msra.mxu0 %v11419_v28  ;;  %v11500_v16 = vld [vmem:[#allocation7 + $0x6a0] ss:$16 sps:$4 sm:$0xff]   ;;  %v11503_v28 = vld [vmem:[#allocation7 + $0x6a8] ss:$16 sps:$4 sm:$0xff]  }
 0x3c0   : > { %3610 = vmatprep.subr.bf16.mxu1 %v11424_v17  ;;  %3651 = vmatprep.subr.bf16.mxu0 %v11427_v18  ;;  %v11508_v17 = vld [vmem:[#allocation7 + $0x6c4] ss:$16 sps:$4 sm:$0xff]   ;;  %v11511_v18 = vld [vmem:[#allocation7 + $0x6cc] ss:$16 sps:$4 sm:$0xff]  }
 0x3c2   : > { %3362 = vmatmul.mubr.bf16.vlgmr.msra.gmra.mrb[76].mxu1 %v3167_v20  ;;  %3403 = vmatmul.mubr.bf16.vlgmr.msra.gmra.mrb[80].mxu0 %v3167_v20  ;;  %v11514_v20 = vld [vmem:[#allocation7 + $0x6e4] ss:$16 sps:$4 sm:$0xff]  }
 0x3c3   : > { %3611 = vmatpush1.bf16.msra.mxu1 %v11422_v54  ;;  %3652 = vmatpush1.bf16.msra.mxu0 %v11425_v19  ;;  %v11506_v54 = vld [vmem:[#allocation7 + $0x6c0] ss:$16 sps:$4 sm:$0xff]   ;;  %v11509_v19 = vld [vmem:[#allocation7 + $0x6c8] ss:$16 sps:$4 sm:$0xff]  }
 0x3c4   : > { %3612 = vmatprep.subr.bf16.mxu1 %v11430_v21  ;;  %3653 = vmatprep.subr.bf16.mxu0 %v11433_v23  ;;  %v11517_v21 = vld [vmem:[#allocation7 + $0x6ec] ss:$16 sps:$4 sm:$0xff]   ;;  %v11512_v23 = vld [vmem:[#allocation7 + $0x6e0] ss:$16 sps:$4 sm:$0xff]  }
 0x3c5   : > { %3642 = vmatprep.mubr.bf16.mxu1 %v12709_v0  ;;  %3683 = vmatprep.mubr.bf16.mxu0 %v12709_v0 }
 0x3c7   : > { %3613 = vmatpush1.bf16.msra.mxu1 %v11428_v24  ;;  %3654 = vmatpush1.bf16.msra.mxu0 %v11431_v26  ;;  %v11515_v24 = vld [vmem:[#allocation7 + $0x6e8] ss:$16 sps:$4 sm:$0xff]   ;;  %v11520_v26 = vld [vmem:[#allocation7 + $0x704] ss:$16 sps:$4 sm:$0xff]  }
 0x3c8   : > { %3614 = vmatprep.subr.bf16.mxu1 %v11436_v15  ;;  %3655 = vmatprep.subr.bf16.mxu0 %v11439_v27  ;;  %v11523_v15 = vld [vmem:[#allocation7 + $0x70c] ss:$16 sps:$4 sm:$0xff]   ;;  %v11518_v27 = vld [vmem:[#allocation7 + $0x700] ss:$16 sps:$4 sm:$0xff]  }
 0x3cb   : > { %3615 = vmatpush1.bf16.msra.mxu1 %v11434_v29  ;;  %3656 = vmatpush1.bf16.msra.mxu0 %v11437_v37  ;;  %v11521_v29 = vld [vmem:[#allocation7 + $0x708] ss:$16 sps:$4 sm:$0xff]   ;;  %v3729_v37 = vrot.slane %v13317_v2, 3 }
 0x3cc   : > { %3616 = vmatprep.subr.bf16.mxu1 %v11442_v32  ;;  %3657 = vmatprep.subr.bf16.mxu0 %v11445_v39  ;;  %v11526_v32 = vld [vmem:[#allocation7 + $0x724] ss:$16 sps:$4 sm:$0xff]   ;;  %v11529_v39 = vld [vmem:[#allocation7 + $0x72c] ss:$16 sps:$4 sm:$0xff]  }
 0x3cf   : > { %3617 = vmatpush1.bf16.msra.mxu1 %v11440_v22  ;;  %3658 = vmatpush1.bf16.msra.mxu0 %v11443_v34  ;;  %v11524_v22 = vld [vmem:[#allocation7 + $0x720] ss:$16 sps:$4 sm:$0xff]   ;;  %v11527_v34 = vld [vmem:[#allocation7 + $0x728] ss:$16 sps:$4 sm:$0xff]  }
 0x3d0   : > { %3618 = vmatprep.subr.bf16.mxu1 %v11448_v30  ;;  %3659 = vmatprep.subr.bf16.mxu0 %v11451_v8  ;;  %v11532_v30 = vld [vmem:[#allocation7 + $0x744] ss:$16 sps:$4 sm:$0xff]   ;;  %v11535_v8 = vld [vmem:[#allocation7 + $0x74c] ss:$16 sps:$4 sm:$0xff]  }
 0x3d3   : > { %3619 = vmatpush1.bf16.msra.mxu1 %v11446_v25  ;;  %3660 = vmatpush1.bf16.msra.mxu0 %v11449_v31  ;;  %v11530_v25 = vld [vmem:[#allocation7 + $0x740] ss:$16 sps:$4 sm:$0xff]   ;;  %v11533_v31 = vld [vmem:[#allocation7 + $0x748] ss:$16 sps:$4 sm:$0xff]  }
 0x3d4   : > { %3620 = vmatprep.subr.bf16.mxu1 %v11454_v36  ;;  %3661 = vmatprep.subr.bf16.mxu0 %v11457_v41  ;;  %v11538_v36 = vld [vmem:[#allocation7 + $0x764] ss:$16 sps:$4 sm:$0xff]   ;;  %v11541_v41 = vld [vmem:[#allocation7 + $0x76c] ss:$16 sps:$4 sm:$0xff]  }
 0x3d7   : > { %3621 = vmatpush1.bf16.msra.mxu1 %v11452_v42  ;;  %3662 = vmatpush1.bf16.msra.mxu0 %v11455_v44  ;;  %v11536_v42 = vld [vmem:[#allocation7 + $0x760] ss:$16 sps:$4 sm:$0xff]   ;;  %v11539_v44 = vld [vmem:[#allocation7 + $0x768] ss:$16 sps:$4 sm:$0xff]  }
 0x3d8   : > { %3622 = vmatprep.subr.bf16.mxu1 %v11460_v38  ;;  %3663 = vmatprep.subr.bf16.mxu0 %v11463_v46  ;;  %v11544_v38 = vld [vmem:[#allocation7 + $0x784] ss:$16 sps:$4 sm:$0xff]   ;;  %v11547_v46 = vld [vmem:[#allocation7 + $0x78c] ss:$16 sps:$4 sm:$0xff]  }
 0x3db   : > { %3623 = vmatpush1.bf16.msra.mxu1 %v11458_v43  ;;  %3664 = vmatpush1.bf16.msra.mxu0 %v11461_v48  ;;  %v11542_v43 = vld [vmem:[#allocation7 + $0x780] ss:$16 sps:$4 sm:$0xff]   ;;  %v11545_v48 = vld [vmem:[#allocation7 + $0x788] ss:$16 sps:$4 sm:$0xff]  }
 0x3dc   : > { %3624 = vmatprep.subr.bf16.mxu1 %v11466_v49  ;;  %3665 = vmatprep.subr.bf16.mxu0 %v11469_v13  ;;  %v11550_v49 = vld [vmem:[#allocation7 + $0x7a4] ss:$16 sps:$4 sm:$0xff]   ;;  %v11553_v13 = vld [vmem:[#allocation7 + $0x7ac] ss:$16 sps:$4 sm:$0xff]  }
 0x3df   : > { %3625 = vmatpush1.bf16.msra.mxu1 %v11464_v50  ;;  %3666 = vmatpush1.bf16.msra.mxu0 %v11467_v52  ;;  %v11548_v50 = vld [vmem:[#allocation7 + $0x7a0] ss:$16 sps:$4 sm:$0xff]   ;;  %v11551_v52 = vld [vmem:[#allocation7 + $0x7a8] ss:$16 sps:$4 sm:$0xff]  }
 0x3e0   : > { %3891 = vmatprep.subr.bf16.mxu1 %v11472_v56  ;;  %3932 = vmatprep.subr.bf16.mxu0 %v11475_v45  ;;  %v11556_v56 = vld [vmem:[#allocation7 + $0x7c4] ss:$16 sps:$4 sm:$0xff]   ;;  %v11559_v45 = vld [vmem:[#allocation7 + $0x7cc] ss:$16 sps:$4 sm:$0xff]  }
 0x3e2   : > { %3643 = vmatmul.mubr.bf16.vlgmr.msra.gmra.mrb[80].mxu1 %v3448_v60  ;;  %3684 = vmatmul.mubr.bf16.vlgmr.msra.gmra.mrb[84].mxu0 %v3448_v60 }
 0x3e3   : > { %3892 = vmatpush1.bf16.msra.mxu1 %v11470_v55  ;;  %3933 = vmatpush1.bf16.msra.mxu0 %v11473_v58 }
 0x3e4   : > { %3893 = vmatprep.subr.bf16.mxu1 %v11478_v62  ;;  %3934 = vmatprep.subr.bf16.mxu0 %v11481_v63  ;;  %v11554_v63 = vld [vmem:[#allocation7 + $0x7c0] ss:$16 sps:$4 sm:$0xff]  }
 0x3e5   : > { %3923 = vmatprep.mubr.bf16.mxu1 %v12709_v0  ;;  %3964 = vmatprep.mubr.bf16.mxu0 %v12709_v0 }
 0x3e7   : > { %3894 = vmatpush1.bf16.msra.mxu1 %v11476_v51  ;;  %3935 = vmatpush1.bf16.msra.mxu0 %v11479_v1  ;;  %v11557_v51 = vld [vmem:[#allocation7 + $0x7c8] ss:$16 sps:$4 sm:$0xff]  }
 0x3e8   : > { %3895 = vmatprep.subr.bf16.mxu1 %v11484_v53  ;;  %3936 = vmatprep.subr.bf16.mxu0 %v11487_v3 }
 0x3eb   : > { %3896 = vmatpush1.bf16.msra.mxu1 %v11482_v5  ;;  %3937 = vmatpush1.bf16.msra.mxu0 %v11485_v4  ;;  %v11562_v4 = vld [vmem:[#allocation7 + $0x7e4] ss:$16 sps:$4 sm:$0xff]  }
 0x3ec   : > { %3897 = vmatprep.subr.bf16.mxu1 %v11490_v6  ;;  %3938 = vmatprep.subr.bf16.mxu0 %v11493_v7  ;;  %v11565_v6 = vld [vmem:[#allocation7 + $0x7ec] ss:$16 sps:$4 sm:$0xff]   ;;  %v11560_v7 = vld [vmem:[#allocation7 + $0x7e0] ss:$16 sps:$4 sm:$0xff]  }
 0x3ef   : > { %3898 = vmatpush1.bf16.msra.mxu1 %v11488_v33  ;;  %3939 = vmatpush1.bf16.msra.mxu0 %v11491_v9  ;;  %v11563_v33 = vld [vmem:[#allocation7 + $0x7e8] ss:$16 sps:$4 sm:$0xff]   ;;  %v11568_v9 = vld [vmem:[#allocation7 + $0x804] ss:$16 sps:$4 sm:$0xff]  }
 0x3f0   : > { %3899 = vmatprep.subr.bf16.mxu1 %v11496_v14  ;;  %3940 = vmatprep.subr.bf16.mxu0 %v11499_v11  ;;  %v11571_v14 = vld [vmem:[#allocation7 + $0x80c] ss:$16 sps:$4 sm:$0xff]   ;;  %v11566_v11 = vld [vmem:[#allocation7 + $0x800] ss:$16 sps:$4 sm:$0xff]  }
 0x3f3   : > { %3900 = vmatpush1.bf16.msra.mxu1 %v11494_v57  ;;  %3941 = vmatpush1.bf16.msra.mxu0 %v11497_v10  ;;  %v11569_v57 = vld [vmem:[#allocation7 + $0x808] ss:$16 sps:$4 sm:$0xff]   ;;  %v4010_v10 = vrot.slane %v13320_v59, 3 }
 0x3f4   : > { %3901 = vmatprep.subr.bf16.mxu1 %v11502_v12  ;;  %3942 = vmatprep.subr.bf16.mxu0 %v11505_v40  ;;  %v11574_v12 = vld [vmem:[#allocation7 + $0x824] ss:$16 sps:$4 sm:$0xff]   ;;  %v11577_v40 = vld [vmem:[#allocation7 + $0x82c] ss:$16 sps:$4 sm:$0xff]  }
 0x3f7   : > { %3902 = vmatpush1.bf16.msra.mxu1 %v11500_v16  ;;  %3943 = vmatpush1.bf16.msra.mxu0 %v11503_v28  ;;  %v11572_v16 = vld [vmem:[#allocation7 + $0x820] ss:$16 sps:$4 sm:$0xff]   ;;  %v11575_v28 = vld [vmem:[#allocation7 + $0x828] ss:$16 sps:$4 sm:$0xff]  }
 0x3f8   : > { %3903 = vmatprep.subr.bf16.mxu1 %v11508_v17  ;;  %3944 = vmatprep.subr.bf16.mxu0 %v11511_v18  ;;  %v11580_v17 = vld [vmem:[#allocation7 + $0x844] ss:$16 sps:$4 sm:$0xff]   ;;  %v11583_v18 = vld [vmem:[#allocation7 + $0x84c] ss:$16 sps:$4 sm:$0xff]  }
 0x3fb   : > { %3904 = vmatpush1.bf16.msra.mxu1 %v11506_v54  ;;  %3945 = vmatpush1.bf16.msra.mxu0 %v11509_v19  ;;  %v11578_v54 = vld [vmem:[#allocation7 + $0x840] ss:$16 sps:$4 sm:$0xff]   ;;  %v11581_v19 = vld [vmem:[#allocation7 + $0x848] ss:$16 sps:$4 sm:$0xff]  }
 0x3fc   : > { %3905 = vmatprep.subr.bf16.mxu1 %v11514_v20  ;;  %3946 = vmatprep.subr.bf16.mxu0 %v11517_v21  ;;  %v11586_v20 = vld [vmem:[#allocation7 + $0x864] ss:$16 sps:$4 sm:$0xff]   ;;  %v11589_v21 = vld [vmem:[#allocation7 + $0x86c] ss:$16 sps:$4 sm:$0xff]  }
 0x3ff   : > { %3906 = vmatpush1.bf16.msra.mxu1 %v11512_v23  ;;  %3947 = vmatpush1.bf16.msra.mxu0 %v11515_v24  ;;  %v11584_v23 = vld [vmem:[#allocation7 + $0x860] ss:$16 sps:$4 sm:$0xff]   ;;  %v11587_v24 = vld [vmem:[#allocation7 + $0x868] ss:$16 sps:$4 sm:$0xff]  }
 0x400   : > { %4172 = vmatprep.subr.bf16.mxu1 %v11520_v26  ;;  %4213 = vmatprep.subr.bf16.mxu0 %v11523_v15  ;;  %v11592_v26 = vld [vmem:[#allocation7 + $0x884] ss:$16 sps:$4 sm:$0xff]   ;;  %v11595_v15 = vld [vmem:[#allocation7 + $0x88c] ss:$16 sps:$4 sm:$0xff]  }
 0x402   : > { %3924 = vmatmul.mubr.bf16.vlgmr.msra.gmra.mrb[84].mxu1 %v3729_v37  ;;  %3965 = vmatmul.mubr.bf16.vlgmr.msra.gmra.mrb[88].mxu0 %v3729_v37  ;;  %v11598_v37 = vld [vmem:[#allocation7 + $0x8a4] ss:$16 sps:$4 sm:$0xff]  }
 0x403   : > { %4173 = vmatpush1.bf16.msra.mxu1 %v11518_v27  ;;  %4214 = vmatpush1.bf16.msra.mxu0 %v11521_v29  ;;  %v11590_v27 = vld [vmem:[#allocation7 + $0x880] ss:$16 sps:$4 sm:$0xff]   ;;  %v11593_v29 = vld [vmem:[#allocation7 + $0x888] ss:$16 sps:$4 sm:$0xff]  }
 0x404   : > { %4174 = vmatprep.subr.bf16.mxu1 %v11526_v32  ;;  %4215 = vmatprep.subr.bf16.mxu0 %v11529_v39  ;;  %v11601_v32 = vld [vmem:[#allocation7 + $0x8ac] ss:$16 sps:$4 sm:$0xff]   ;;  %v11596_v39 = vld [vmem:[#allocation7 + $0x8a0] ss:$16 sps:$4 sm:$0xff]  }
 0x405   : > { %4204 = vmatprep.mubr.bf16.mxu1 %v12709_v0  ;;  %4245 = vmatprep.mubr.bf16.mxu0 %v12709_v0 }
 0x407   : > { %4175 = vmatpush1.bf16.msra.mxu1 %v11524_v22  ;;  %4216 = vmatpush1.bf16.msra.mxu0 %v11527_v34  ;;  %v11599_v22 = vld [vmem:[#allocation7 + $0x8a8] ss:$16 sps:$4 sm:$0xff]   ;;  %v11604_v34 = vld [vmem:[#allocation7 + $0x8c4] ss:$16 sps:$4 sm:$0xff]  }
 0x408   : > { %4176 = vmatprep.subr.bf16.mxu1 %v11532_v30  ;;  %4217 = vmatprep.subr.bf16.mxu0 %v11535_v8  ;;  %v11607_v30 = vld [vmem:[#allocation7 + $0x8cc] ss:$16 sps:$4 sm:$0xff]  }
 0x40b   : > { %4177 = vmatpush1.bf16.msra.mxu1 %v11530_v25  ;;  %4218 = vmatpush1.bf16.msra.mxu0 %v11533_v31 }
 0x40c   : > { %4178 = vmatprep.subr.bf16.mxu1 %v11538_v36  ;;  %4219 = vmatprep.subr.bf16.mxu0 %v11541_v41 }
 0x40f   : > { %4179 = vmatpush1.bf16.msra.mxu1 %v11536_v42  ;;  %4220 = vmatpush1.bf16.msra.mxu0 %v11539_v44 }
 0x410   : > { %4180 = vmatprep.subr.bf16.mxu1 %v11544_v38  ;;  %4221 = vmatprep.subr.bf16.mxu0 %v11547_v46 }
 0x413   : > { %4181 = vmatpush1.bf16.msra.mxu1 %v11542_v43  ;;  %4222 = vmatpush1.bf16.msra.mxu0 %v11545_v48  ;;  %v11602_v48 = vld [vmem:[#allocation7 + $0x8c0] ss:$16 sps:$4 sm:$0xff]  }
 0x414   : > { %4182 = vmatprep.subr.bf16.mxu1 %v11550_v49  ;;  %4223 = vmatprep.subr.bf16.mxu0 %v11553_v13  ;;  %v11605_v49 = vld [vmem:[#allocation7 + $0x8c8] ss:$16 sps:$4 sm:$0xff]  }
 0x415   : > { %v13347_v55 = vpop.f32.mrb[60].mxu1  ;;  %v13349_v58 = vpop.f32.mrb[64].mxu0 }
 0x416   : > { %v13351_v60 = vpop.f32.mrb[61].mxu1  ;;  %v13353_v62 = vpop.f32.mrb[65].mxu0 }
 0x417   : > { %4183 = vmatpush1.bf16.msra.mxu1 %v11548_v50  ;;  %4224 = vmatpush1.bf16.msra.mxu0 %v11551_v52  ;;  %v2285_v1 = vpop.f32.mrb[62].mxu1  ;;  %v2326_v53 = vpop.f32.mrb[66].mxu0  ;;  %v11610_v52 = vld [vmem:[#allocation7 + $0x8e4] ss:$16 sps:$4 sm:$0xff]  }
 0x418   : > { %4184 = vmatprep.subr.bf16.mxu1 %v11556_v56  ;;  %4225 = vmatprep.subr.bf16.mxu0 %v11559_v45  ;;  %v2286_v3 = vpop.f32.mrb[63].mxu1  ;;  %v2327_v5 = vpop.f32.mrb[67].mxu0  ;;  %v11613_v56 = vld [vmem:[#allocation7 + $0x8ec] ss:$16 sps:$4 sm:$0xff]   ;;  %v11608_v45 = vld [vmem:[#allocation7 + $0x8e0] ss:$16 sps:$4 sm:$0xff]  }
 0x419   : > { %v11622_v1 = vld [vmem:[#allocation7 + $0x924] ss:$16 sps:$4 sm:$0xff]   ;;  %v11625_v53 = vld [vmem:[#allocation7 + $0x92c] ss:$16 sps:$4 sm:$0xff]   ;;  %v11620_v3 = vld [vmem:[#allocation7 + $0x920] ss:$16 sps:$4 sm:$0xff]  }
 0x41a   : > { %v11623_v5 = vld [vmem:[#allocation7 + $0x928] ss:$16 sps:$4 sm:$0xff]  }
 0x41b   : > { %4185 = vmatpush1.bf16.msra.mxu1 %v11554_v63  ;;  %4226 = vmatpush1.bf16.msra.mxu0 %v11557_v51  ;;  %v11617_v63 = vld [vmem:[#allocation7 + $0x908] ss:$16 sps:$4 sm:$0xff]   ;;  %v4291_v51 = vrot.slane %v13317_v2, 4 }
 0x41c   : > { %4186 = vmatprep.subr.bf16.mxu1 %v11562_v4  ;;  %4227 = vmatprep.subr.bf16.mxu0 %v11565_v6  ;;  %v11628_v4 = vld [vmem:[#allocation7 + $0x944] ss:$16 sps:$4 sm:$0xff]   ;;  %v11631_v6 = vld [vmem:[#allocation7 + $0x94c] ss:$16 sps:$4 sm:$0xff]  }
 0x41f   : > { %4187 = vmatpush1.bf16.msra.mxu1 %v11560_v7  ;;  %4228 = vmatpush1.bf16.msra.mxu0 %v11563_v33  ;;  %v11626_v7 = vld [vmem:[#allocation7 + $0x940] ss:$16 sps:$4 sm:$0xff]   ;;  %v11629_v33 = vld [vmem:[#allocation7 + $0x948] ss:$16 sps:$4 sm:$0xff]  }
 0x420   : > { %4453 = vmatprep.subr.bf16.mxu1 %v11568_v9  ;;  %4494 = vmatprep.subr.bf16.mxu0 %v11571_v14  ;;  %v11634_v9 = vld [vmem:[#allocation7 + $0x964] ss:$16 sps:$4 sm:$0xff]   ;;  %v11637_v14 = vld [vmem:[#allocation7 + $0x96c] ss:$16 sps:$4 sm:$0xff]  }
 0x422   : > { %4205 = vmatmul.mubr.bf16.vlgmr.msra.gmra.mrb[88].mxu1 %v4010_v10  ;;  %4246 = vmatmul.mubr.bf16.vlgmr.msra.gmra.mrb[92].mxu0 %v4010_v10  ;;  %v11640_v10 = vld [vmem:[#allocation7 + $0x984] ss:$16 sps:$4 sm:$0xff]  }
 0x423   : > { %4454 = vmatpush1.bf16.msra.mxu1 %v11566_v11  ;;  %4495 = vmatpush1.bf16.msra.mxu0 %v11569_v57  ;;  %v11632_v11 = vld [vmem:[#allocation7 + $0x960] ss:$16 sps:$4 sm:$0xff]   ;;  %v11635_v57 = vld [vmem:[#allocation7 + $0x968] ss:$16 sps:$4 sm:$0xff]  }
 0x424   : > { %4455 = vmatprep.subr.bf16.mxu1 %v11574_v12  ;;  %4496 = vmatprep.subr.bf16.mxu0 %v11577_v40  ;;  %v11643_v12 = vld [vmem:[#allocation7 + $0x98c] ss:$16 sps:$4 sm:$0xff]   ;;  %v11638_v40 = vld [vmem:[#allocation7 + $0x980] ss:$16 sps:$4 sm:$0xff]  }
 0x425   : > { %4485 = vmatprep.mubr.bf16.mxu1 %v12709_v0  ;;  %4526 = vmatprep.mubr.bf16.mxu0 %v12709_v0 }
 0x427   : > { %4456 = vmatpush1.bf16.msra.mxu1 %v11572_v16  ;;  %4497 = vmatpush1.bf16.msra.mxu0 %v11575_v28  ;;  %v11641_v16 = vld [vmem:[#allocation7 + $0x988] ss:$16 sps:$4 sm:$0xff]   ;;  %v11646_v28 = vld [vmem:[#allocation7 + $0x9a4] ss:$16 sps:$4 sm:$0xff]  }
 0x428   : > { %4457 = vmatprep.subr.bf16.mxu1 %v11580_v17  ;;  %4498 = vmatprep.subr.bf16.mxu0 %v11583_v18  ;;  %v11649_v17 = vld [vmem:[#allocation7 + $0x9ac] ss:$16 sps:$4 sm:$0xff]   ;;  %v11644_v18 = vld [vmem:[#allocation7 + $0x9a0] ss:$16 sps:$4 sm:$0xff]  }
 0x42b   : > { %4458 = vmatpush1.bf16.msra.mxu1 %v11578_v54  ;;  %4499 = vmatpush1.bf16.msra.mxu0 %v11581_v19  ;;  %v11647_v54 = vld [vmem:[#allocation7 + $0x9a8] ss:$16 sps:$4 sm:$0xff]   ;;  %v11652_v19 = vld [vmem:[#allocation7 + $0x9c4] ss:$16 sps:$4 sm:$0xff]  }
 0x42c   : > { %4459 = vmatprep.subr.bf16.mxu1 %v11586_v20  ;;  %4500 = vmatprep.subr.bf16.mxu0 %v11589_v21  ;;  %v11655_v20 = vld [vmem:[#allocation7 + $0x9cc] ss:$16 sps:$4 sm:$0xff]  }
 0x42f   : > { %4460 = vmatpush1.bf16.msra.mxu1 %v11584_v23  ;;  %4501 = vmatpush1.bf16.msra.mxu0 %v11587_v24 }
 0x430   : > { %4461 = vmatprep.subr.bf16.mxu1 %v11592_v26  ;;  %4502 = vmatprep.subr.bf16.mxu0 %v11595_v15 }
 0x433   : > { %4462 = vmatpush1.bf16.msra.mxu1 %v11590_v27  ;;  %4503 = vmatpush1.bf16.msra.mxu0 %v11593_v29 }
 0x434   : > { %4463 = vmatprep.subr.bf16.mxu1 %v11598_v37  ;;  %4504 = vmatprep.subr.bf16.mxu0 %v11601_v32 }
 0x435   : > { %v2523_v8 = vpop.f32.mrb[64].mxu1  ;;  %v2564_v25 = vpop.f32.mrb[68].mxu0 }
 0x436   : > { %v13359_v31 = vadd.f32 %v2523_v8, %v13347_v55  ;;  %v13362_v36 = vadd.f32 %v2564_v25, %v13349_v58  ;;  %v2525_v41 = vpop.f32.mrb[65].mxu1  ;;  %v2566_v42 = vpop.f32.mrb[69].mxu0  ;;  %v11611_v55 = vld [vmem:[#allocation7 + $0x8e8] ss:$16 sps:$4 sm:$0xff]   ;;  %v11616_v58 = vld [vmem:[#allocation7 + $0x904] ss:$16 sps:$4 sm:$0xff]  }
 0x437   : > { %v13365_v44 = vadd.f32 %v2525_v41, %v13351_v60  ;;  %v13368_v38 = vadd.f32 %v2566_v42, %v13353_v62  ;;  %v2527_v46 = vpop.f32.mrb[66].mxu1  ;;  %v2568_v43 = vpop.f32.mrb[70].mxu0  ;;  %4464 = vmatpush1.bf16.msra.mxu1 %v11596_v39  ;;  %4505 = vmatpush1.bf16.msra.mxu0 %v11599_v22  ;;  %v11619_v60 = vld [vmem:[#allocation7 + $0x90c] ss:$16 sps:$4 sm:$0xff]   ;;  %v11614_v62 = vld [vmem:[#allocation7 + $0x900] ss:$16 sps:$4 sm:$0xff]  }
 0x438   : > { %v2528_v13 = vpop.f32.mrb[67].mxu1  ;;  %v2569_v50 = vpop.f32.mrb[71].mxu0  ;;  %4465 = vmatprep.subr.bf16.mxu1 %v11604_v34  ;;  %4506 = vmatprep.subr.bf16.mxu0 %v11607_v30  ;;  %v11650_v22 = vld [vmem:[#allocation7 + $0x9c0] ss:$16 sps:$4 sm:$0xff]   ;;  %v11653_v34 = vld [vmem:[#allocation7 + $0x9c8] ss:$16 sps:$4 sm:$0xff]  }
 0x439   : > { %v11658_v25 = vld [vmem:[#allocation7 + $0x9e4] ss:$16 sps:$4 sm:$0xff]   ;;  %v11659_v41 = vld [vmem:[#allocation7 + $0x9e8] ss:$16 sps:$4 sm:$0xff]   ;;  %v4572_v43 = vrot.slane %v13320_v59, 4 }
 0x43a   : > { %v11664_v42 = vld [vmem:[#allocation7 + $0xa04] ss:$16 sps:$4 sm:$0xff]   ;;  %v11665_v46 = vld [vmem:[#allocation7 + $0xa08] ss:$16 sps:$4 sm:$0xff]   ;;  %v11668_v13 = vld [vmem:[#allocation7 + $0xa20] ss:$16 sps:$4 sm:$0xff]  }
 0x43b   : > { %4466 = vmatpush1.bf16.msra.mxu1 %v11602_v48  ;;  %4507 = vmatpush1.bf16.msra.mxu0 %v11605_v49  ;;  %v11670_v48 = vld [vmem:[#allocation7 + $0xa24] ss:$16 sps:$4 sm:$0xff]   ;;  %v11673_v49 = vld [vmem:[#allocation7 + $0xa2c] ss:$16 sps:$4 sm:$0xff]   ;;  %v11671_v50 = vld [vmem:[#allocation7 + $0xa28] ss:$16 sps:$4 sm:$0xff]  }
 0x43c   : > { %4467 = vmatprep.subr.bf16.mxu1 %v11610_v52  ;;  %4508 = vmatprep.subr.bf16.mxu0 %v11613_v56  ;;  %v11676_v52 = vld [vmem:[#allocation7 + $0xa44] ss:$16 sps:$4 sm:$0xff]   ;;  %v11679_v56 = vld [vmem:[#allocation7 + $0xa4c] ss:$16 sps:$4 sm:$0xff]  }
 0x43f   : > { %4468 = vmatpush1.bf16.msra.mxu1 %v11608_v45  ;;  %4509 = vmatpush1.bf16.msra.mxu0 %v11611_v55  ;;  %v11674_v45 = vld [vmem:[#allocation7 + $0xa40] ss:$16 sps:$4 sm:$0xff]   ;;  %v11677_v55 = vld [vmem:[#allocation7 + $0xa48] ss:$16 sps:$4 sm:$0xff]  }
 0x440   : > { %4734 = vmatprep.subr.bf16.mxu1 %v11616_v58  ;;  %4775 = vmatprep.subr.bf16.mxu0 %v11619_v60  ;;  %v11682_v58 = vld [vmem:[#allocation7 + $0xa64] ss:$16 sps:$4 sm:$0xff]   ;;  %v11685_v60 = vld [vmem:[#allocation7 + $0xa6c] ss:$16 sps:$4 sm:$0xff]  }
 0x442   : > { %4486 = vmatmul.mubr.bf16.vlgmr.msra.gmra.mrb[92].mxu1 %v4291_v51  ;;  %4527 = vmatmul.mubr.bf16.vlgmr.msra.gmra.mrb[96].mxu0 %v4291_v51  ;;  %v11688_v51 = vld [vmem:[#allocation7 + $0xa84] ss:$16 sps:$4 sm:$0xff]  }
 0x443   : > { %4735 = vmatpush1.bf16.msra.mxu1 %v11614_v62  ;;  %4776 = vmatpush1.bf16.msra.mxu0 %v11617_v63  ;;  %v11680_v62 = vld [vmem:[#allocation7 + $0xa60] ss:$16 sps:$4 sm:$0xff]   ;;  %v11683_v63 = vld [vmem:[#allocation7 + $0xa68] ss:$16 sps:$4 sm:$0xff]  }
 0x444   : > { %4736 = vmatprep.subr.bf16.mxu1 %v11622_v1  ;;  %4777 = vmatprep.subr.bf16.mxu0 %v11625_v53  ;;  %v11691_v1 = vld [vmem:[#allocation7 + $0xa8c] ss:$16 sps:$4 sm:$0xff]   ;;  %v11686_v53 = vld [vmem:[#allocation7 + $0xa80] ss:$16 sps:$4 sm:$0xff]  }
 0x445   : > { %4766 = vmatprep.mubr.bf16.mxu1 %v12709_v0  ;;  %4807 = vmatprep.mubr.bf16.mxu0 %v12709_v0 }
 0x447   : > { %4737 = vmatpush1.bf16.msra.mxu1 %v11620_v3  ;;  %4778 = vmatpush1.bf16.msra.mxu0 %v11623_v5  ;;  %v11689_v3 = vld [vmem:[#allocation7 + $0xa88] ss:$16 sps:$4 sm:$0xff]   ;;  %v11694_v5 = vld [vmem:[#allocation7 + $0xaa4] ss:$16 sps:$4 sm:$0xff]  }
 0x448   : > { %4738 = vmatprep.subr.bf16.mxu1 %v11628_v4  ;;  %4779 = vmatprep.subr.bf16.mxu0 %v11631_v6  ;;  %v11697_v4 = vld [vmem:[#allocation7 + $0xaac] ss:$16 sps:$4 sm:$0xff]   ;;  %v11692_v6 = vld [vmem:[#allocation7 + $0xaa0] ss:$16 sps:$4 sm:$0xff]  }
 0x44b   : > { %4739 = vmatpush1.bf16.msra.mxu1 %v11626_v7  ;;  %4780 = vmatpush1.bf16.msra.mxu0 %v11629_v33  ;;  %v11695_v7 = vld [vmem:[#allocation7 + $0xaa8] ss:$16 sps:$4 sm:$0xff]   ;;  %v11700_v33 = vld [vmem:[#allocation7 + $0xac4] ss:$16 sps:$4 sm:$0xff]  }
 0x44c   : > { %4740 = vmatprep.subr.bf16.mxu1 %v11634_v9  ;;  %4781 = vmatprep.subr.bf16.mxu0 %v11637_v14  ;;  %v11703_v9 = vld [vmem:[#allocation7 + $0xacc] ss:$16 sps:$4 sm:$0xff]  }
 0x44f   : > { %4741 = vmatpush1.bf16.msra.mxu1 %v11632_v11  ;;  %4782 = vmatpush1.bf16.msra.mxu0 %v11635_v57 }
 0x450   : > { %4742 = vmatprep.subr.bf16.mxu1 %v11640_v10  ;;  %4783 = vmatprep.subr.bf16.mxu0 %v11643_v12 }
 0x453   : > { %4743 = vmatpush1.bf16.msra.mxu1 %v11638_v40  ;;  %4784 = vmatpush1.bf16.msra.mxu0 %v11641_v16 }
 0x454   : > { %4744 = vmatprep.subr.bf16.mxu1 %v11646_v28  ;;  %4785 = vmatprep.subr.bf16.mxu0 %v11649_v17 }
 0x455   : > { %v2801_v21 = vpop.f32.mrb[68].mxu1  ;;  %v2842_v23 = vpop.f32.mrb[72].mxu0 }
 0x456   : > { %v13374_v24 = vadd.f32 %v2801_v21, %v13359_v31  ;;  %v13377_v26 = vadd.f32 %v2842_v23, %v13362_v36  ;;  %v2803_v15 = vpop.f32.mrb[69].mxu1  ;;  %v2844_v27 = vpop.f32.mrb[73].mxu0  ;;  %v11661_v31 = vld [vmem:[#allocation7 + $0x9ec] ss:$16 sps:$4 sm:$0xff]   ;;  %v11656_v36 = vld [vmem:[#allocation7 + $0x9e0] ss:$16 sps:$4 sm:$0xff]  }
 0x457   : > { %v13380_v29 = vadd.f32 %v2803_v15, %v13365_v44  ;;  %v13383_v37 = vadd.f32 %v2844_v27, %v13368_v38  ;;  %v2805_v32 = vpop.f32.mrb[70].mxu1  ;;  %v2846_v39 = vpop.f32.mrb[74].mxu0  ;;  %4745 = vmatpush1.bf16.msra.mxu1 %v11644_v18  ;;  %4786 = vmatpush1.bf16.msra.mxu0 %v11647_v54  ;;  %v11667_v44 = vld [vmem:[#allocation7 + $0xa0c] ss:$16 sps:$4 sm:$0xff]   ;;  %v11662_v38 = vld [vmem:[#allocation7 + $0xa00] ss:$16 sps:$4 sm:$0xff]  }
 0x458   : > { %v2806_v30 = vpop.f32.mrb[71].mxu1  ;;  %v2847_v8 = vpop.f32.mrb[75].mxu0  ;;  %4746 = vmatprep.subr.bf16.mxu1 %v11652_v19  ;;  %4787 = vmatprep.subr.bf16.mxu0 %v11655_v20  ;;  %v11698_v54 = vld [vmem:[#allocation7 + $0xac0] ss:$16 sps:$4 sm:$0xff]   ;;  %v11701_v19 = vld [vmem:[#allocation7 + $0xac8] ss:$16 sps:$4 sm:$0xff]  }
 0x459   : > { %v11706_v23 = vld [vmem:[#allocation7 + $0xae4] ss:$16 sps:$4 sm:$0xff]   ;;  %v11707_v15 = vld [vmem:[#allocation7 + $0xae8] ss:$16 sps:$4 sm:$0xff]   ;;  %v4853_v39 = vrot.slane %v13317_v2, 5 }
 0x45a   : > { %v11712_v27 = vld [vmem:[#allocation7 + $0xb04] ss:$16 sps:$4 sm:$0xff]   ;;  %v11713_v32 = vld [vmem:[#allocation7 + $0xb08] ss:$16 sps:$4 sm:$0xff]   ;;  %v11716_v30 = vld [vmem:[#allocation7 + $0xb20] ss:$16 sps:$4 sm:$0xff]  }
 0x45b   : > { %4747 = vmatpush1.bf16.msra.mxu1 %v11650_v22  ;;  %4788 = vmatpush1.bf16.msra.mxu0 %v11653_v34  ;;  %v11718_v22 = vld [vmem:[#allocation7 + $0xb24] ss:$16 sps:$4 sm:$0xff]   ;;  %v11721_v34 = vld [vmem:[#allocation7 + $0xb2c] ss:$16 sps:$4 sm:$0xff]   ;;  %v11719_v8 = vld [vmem:[#allocation7 + $0xb28] ss:$16 sps:$4 sm:$0xff]  }
 0x45c   : > { %4748 = vmatprep.subr.bf16.mxu1 %v11658_v25  ;;  %4789 = vmatprep.subr.bf16.mxu0 %v11661_v31  ;;  %v11724_v25 = vld [vmem:[#allocation7 + $0xb44] ss:$16 sps:$4 sm:$0xff]   ;;  %v11727_v31 = vld [vmem:[#allocation7 + $0xb4c] ss:$16 sps:$4 sm:$0xff]  }
 0x45f   : > { %4749 = vmatpush1.bf16.msra.mxu1 %v11656_v36  ;;  %4790 = vmatpush1.bf16.msra.mxu0 %v11659_v41  ;;  %v11722_v36 = vld [vmem:[#allocation7 + $0xb40] ss:$16 sps:$4 sm:$0xff]   ;;  %v11725_v41 = vld [vmem:[#allocation7 + $0xb48] ss:$16 sps:$4 sm:$0xff]  }
 0x460   : > { %5015 = vmatprep.subr.bf16.mxu1 %v11664_v42  ;;  %5056 = vmatprep.subr.bf16.mxu0 %v11667_v44  ;;  %v11730_v42 = vld [vmem:[#allocation7 + $0xb64] ss:$16 sps:$4 sm:$0xff]   ;;  %v11733_v44 = vld [vmem:[#allocation7 + $0xb6c] ss:$16 sps:$4 sm:$0xff]  }
 0x462   : > { %4767 = vmatmul.mubr.bf16.vlgmr.msra.gmra.mrb[96].mxu1 %v4572_v43  ;;  %4808 = vmatmul.mubr.bf16.vlgmr.msra.gmra.mrb[100].mxu0 %v4572_v43  ;;  %v11736_v43 = vld [vmem:[#allocation7 + $0xb84] ss:$16 sps:$4 sm:$0xff]  }
 0x463   : > { %5016 = vmatpush1.bf16.msra.mxu1 %v11662_v38  ;;  %5057 = vmatpush1.bf16.msra.mxu0 %v11665_v46  ;;  %v11728_v38 = vld [vmem:[#allocation7 + $0xb60] ss:$16 sps:$4 sm:$0xff]   ;;  %v11731_v46 = vld [vmem:[#allocation7 + $0xb68] ss:$16 sps:$4 sm:$0xff]  }
 0x464   : > { %5017 = vmatprep.subr.bf16.mxu1 %v11670_v48  ;;  %5058 = vmatprep.subr.bf16.mxu0 %v11673_v49  ;;  %v11739_v48 = vld [vmem:[#allocation7 + $0xb8c] ss:$16 sps:$4 sm:$0xff]   ;;  %v11734_v49 = vld [vmem:[#allocation7 + $0xb80] ss:$16 sps:$4 sm:$0xff]  }
 0x465   : > { %5047 = vmatprep.mubr.bf16.mxu1 %v12709_v0  ;;  %5088 = vmatprep.mubr.bf16.mxu0 %v12709_v0 }
 0x467   : > { %5018 = vmatpush1.bf16.msra.mxu1 %v11668_v13  ;;  %5059 = vmatpush1.bf16.msra.mxu0 %v11671_v50  ;;  %v11737_v13 = vld [vmem:[#allocation7 + $0xb88] ss:$16 sps:$4 sm:$0xff]   ;;  %v11742_v50 = vld [vmem:[#allocation7 + $0xba4] ss:$16 sps:$4 sm:$0xff]  }
 0x468   : > { %5019 = vmatprep.subr.bf16.mxu1 %v11676_v52  ;;  %5060 = vmatprep.subr.bf16.mxu0 %v11679_v56  ;;  %v11745_v52 = vld [vmem:[#allocation7 + $0xbac] ss:$16 sps:$4 sm:$0xff]   ;;  %v11740_v56 = vld [vmem:[#allocation7 + $0xba0] ss:$16 sps:$4 sm:$0xff]  }
 0x46b   : > { %5020 = vmatpush1.bf16.msra.mxu1 %v11674_v45  ;;  %5061 = vmatpush1.bf16.msra.mxu0 %v11677_v55  ;;  %v11743_v45 = vld [vmem:[#allocation7 + $0xba8] ss:$16 sps:$4 sm:$0xff]   ;;  %v11748_v55 = vld [vmem:[#allocation7 + $0xbc4] ss:$16 sps:$4 sm:$0xff]  }
 0x46c   : > { %5021 = vmatprep.subr.bf16.mxu1 %v11682_v58  ;;  %5062 = vmatprep.subr.bf16.mxu0 %v11685_v60  ;;  %v11751_v58 = vld [vmem:[#allocation7 + $0xbcc] ss:$16 sps:$4 sm:$0xff]  }
 0x46f   : > { %5022 = vmatpush1.bf16.msra.mxu1 %v11680_v62  ;;  %5063 = vmatpush1.bf16.msra.mxu0 %v11683_v63 }
 0x470   : > { %5023 = vmatprep.subr.bf16.mxu1 %v11688_v51  ;;  %5064 = vmatprep.subr.bf16.mxu0 %v11691_v1 }
 0x473   : > { %5024 = vmatpush1.bf16.msra.mxu1 %v11686_v53  ;;  %5065 = vmatpush1.bf16.msra.mxu0 %v11689_v3 }
 0x474   : > { %5025 = vmatprep.subr.bf16.mxu1 %v11694_v5  ;;  %5066 = vmatprep.subr.bf16.mxu0 %v11697_v4 }
 0x475   : > { %v3082_v14 = vpop.f32.mrb[72].mxu1  ;;  %v3123_v11 = vpop.f32.mrb[76].mxu0 }
 0x476   : > { %v13389_v57 = vadd.f32 %v3082_v14, %v13374_v24  ;;  %v13392_v10 = vadd.f32 %v3123_v11, %v13377_v26  ;;  %v3084_v12 = vpop.f32.mrb[73].mxu1  ;;  %v3125_v40 = vpop.f32.mrb[77].mxu0  ;;  %v11709_v24 = vld [vmem:[#allocation7 + $0xaec] ss:$16 sps:$4 sm:$0xff]   ;;  %v11704_v26 = vld [vmem:[#allocation7 + $0xae0] ss:$16 sps:$4 sm:$0xff]  }
 0x477   : > { %v13395_v16 = vadd.f32 %v3084_v12, %v13380_v29  ;;  %v13398_v28 = vadd.f32 %v3125_v40, %v13383_v37  ;;  %v3086_v17 = vpop.f32.mrb[74].mxu1  ;;  %v3127_v18 = vpop.f32.mrb[78].mxu0  ;;  %5026 = vmatpush1.bf16.msra.mxu1 %v11692_v6  ;;  %5067 = vmatpush1.bf16.msra.mxu0 %v11695_v7  ;;  %v11715_v29 = vld [vmem:[#allocation7 + $0xb0c] ss:$16 sps:$4 sm:$0xff]   ;;  %v11710_v37 = vld [vmem:[#allocation7 + $0xb00] ss:$16 sps:$4 sm:$0xff]  }
 0x478   : > { %v3087_v20 = vpop.f32.mrb[75].mxu1  ;;  %v3128_v21 = vpop.f32.mrb[79].mxu0  ;;  %5027 = vmatprep.subr.bf16.mxu1 %v11700_v33  ;;  %5068 = vmatprep.subr.bf16.mxu0 %v11703_v9  ;;  %v11746_v7 = vld [vmem:[#allocation7 + $0xbc0] ss:$16 sps:$4 sm:$0xff]   ;;  %v11749_v33 = vld [vmem:[#allocation7 + $0xbc8] ss:$16 sps:$4 sm:$0xff]  }
 0x479   : > { %v11754_v11 = vld [vmem:[#allocation7 + $0xbe4] ss:$16 sps:$4 sm:$0xff]   ;;  %v11755_v12 = vld [vmem:[#allocation7 + $0xbe8] ss:$16 sps:$4 sm:$0xff]   ;;  %v5134_v18 = vrot.slane %v13320_v59, 5 }
 0x47a   : > { %v11760_v40 = vld [vmem:[#allocation7 + $0xc04] ss:$16 sps:$4 sm:$0xff]   ;;  %v11761_v17 = vld [vmem:[#allocation7 + $0xc08] ss:$16 sps:$4 sm:$0xff]   ;;  %v11764_v20 = vld [vmem:[#allocation7 + $0xc20] ss:$16 sps:$4 sm:$0xff]  }
 0x47b   : > { %5028 = vmatpush1.bf16.msra.mxu1 %v11698_v54  ;;  %5069 = vmatpush1.bf16.msra.mxu0 %v11701_v19  ;;  %v11766_v54 = vld [vmem:[#allocation7 + $0xc24] ss:$16 sps:$4 sm:$0xff]   ;;  %v11769_v19 = vld [vmem:[#allocation7 + $0xc2c] ss:$16 sps:$4 sm:$0xff]   ;;  %v11767_v21 = vld [vmem:[#allocation7 + $0xc28] ss:$16 sps:$4 sm:$0xff]  }
 0x47c   : > { %5029 = vmatprep.subr.bf16.mxu1 %v11706_v23  ;;  %5070 = vmatprep.subr.bf16.mxu0 %v11709_v24  ;;  %v11772_v23 = vld [vmem:[#allocation7 + $0xc44] ss:$16 sps:$4 sm:$0xff]   ;;  %v11775_v24 = vld [vmem:[#allocation7 + $0xc4c] ss:$16 sps:$4 sm:$0xff]  }
 0x47f   : > { %5030 = vmatpush1.bf16.msra.mxu1 %v11704_v26  ;;  %5071 = vmatpush1.bf16.msra.mxu0 %v11707_v15  ;;  %v11770_v26 = vld [vmem:[#allocation7 + $0xc40] ss:$16 sps:$4 sm:$0xff]   ;;  %v11773_v15 = vld [vmem:[#allocation7 + $0xc48] ss:$16 sps:$4 sm:$0xff]  }
 0x480   : > { %5296 = vmatprep.subr.bf16.mxu1 %v11712_v27  ;;  %5337 = vmatprep.subr.bf16.mxu0 %v11715_v29  ;;  %v11778_v27 = vld [vmem:[#allocation7 + $0xc64] ss:$16 sps:$4 sm:$0xff]   ;;  %v11781_v29 = vld [vmem:[#allocation7 + $0xc6c] ss:$16 sps:$4 sm:$0xff]  }
 0x482   : > { %5048 = vmatmul.mubr.bf16.vlgmr.msra.gmra.mrb[100].mxu1 %v4853_v39  ;;  %5089 = vmatmul.mubr.bf16.vlgmr.msra.gmra.mrb[104].mxu0 %v4853_v39  ;;  %v11784_v39 = vld [vmem:[#allocation7 + $0xc84] ss:$16 sps:$4 sm:$0xff]  }
 0x483   : > { %5297 = vmatpush1.bf16.msra.mxu1 %v11710_v37  ;;  %5338 = vmatpush1.bf16.msra.mxu0 %v11713_v32  ;;  %v11776_v37 = vld [vmem:[#allocation7 + $0xc60] ss:$16 sps:$4 sm:$0xff]   ;;  %v11779_v32 = vld [vmem:[#allocation7 + $0xc68] ss:$16 sps:$4 sm:$0xff]  }
 0x484   : > { %5298 = vmatprep.subr.bf16.mxu1 %v11718_v22  ;;  %5339 = vmatprep.subr.bf16.mxu0 %v11721_v34  ;;  %v11787_v22 = vld [vmem:[#allocation7 + $0xc8c] ss:$16 sps:$4 sm:$0xff]   ;;  %v11782_v34 = vld [vmem:[#allocation7 + $0xc80] ss:$16 sps:$4 sm:$0xff]  }
 0x485   : > { %5328 = vmatprep.mubr.bf16.mxu1 %v12709_v0  ;;  %5369 = vmatprep.mubr.bf16.mxu0 %v12709_v0 }
 0x487   : > { %5299 = vmatpush1.bf16.msra.mxu1 %v11716_v30  ;;  %5340 = vmatpush1.bf16.msra.mxu0 %v11719_v8  ;;  %v11785_v30 = vld [vmem:[#allocation7 + $0xc88] ss:$16 sps:$4 sm:$0xff]   ;;  %v11790_v8 = vld [vmem:[#allocation7 + $0xca4] ss:$16 sps:$4 sm:$0xff]  }
 0x488   : > { %5300 = vmatprep.subr.bf16.mxu1 %v11724_v25  ;;  %5341 = vmatprep.subr.bf16.mxu0 %v11727_v31  ;;  %v11793_v25 = vld [vmem:[#allocation7 + $0xcac] ss:$16 sps:$4 sm:$0xff]   ;;  %v11788_v31 = vld [vmem:[#allocation7 + $0xca0] ss:$16 sps:$4 sm:$0xff]  }
 0x48b   : > { %5301 = vmatpush1.bf16.msra.mxu1 %v11722_v36  ;;  %5342 = vmatpush1.bf16.msra.mxu0 %v11725_v41  ;;  %v11791_v36 = vld [vmem:[#allocation7 + $0xca8] ss:$16 sps:$4 sm:$0xff]   ;;  %v11796_v41 = vld [vmem:[#allocation7 + $0xcc4] ss:$16 sps:$4 sm:$0xff]  }
 0x48c   : > { %5302 = vmatprep.subr.bf16.mxu1 %v11730_v42  ;;  %5343 = vmatprep.subr.bf16.mxu0 %v11733_v44  ;;  %v11799_v42 = vld [vmem:[#allocation7 + $0xccc] ss:$16 sps:$4 sm:$0xff]  }
 0x48f   : > { %5303 = vmatpush1.bf16.msra.mxu1 %v11728_v38  ;;  %5344 = vmatpush1.bf16.msra.mxu0 %v11731_v46 }
 0x490   : > { %5304 = vmatprep.subr.bf16.mxu1 %v11736_v43  ;;  %5345 = vmatprep.subr.bf16.mxu0 %v11739_v48 }
 0x493   : > { %5305 = vmatpush1.bf16.msra.mxu1 %v11734_v49  ;;  %5346 = vmatpush1.bf16.msra.mxu0 %v11737_v13 }
 0x494   : > { %5306 = vmatprep.subr.bf16.mxu1 %v11742_v50  ;;  %5347 = vmatprep.subr.bf16.mxu0 %v11745_v52 }
 0x495   : > { %v3363_v60 = vpop.f32.mrb[76].mxu1  ;;  %v3404_v62 = vpop.f32.mrb[80].mxu0 }
 0x496   : > { %v13404_v63 = vadd.f32 %v3363_v60, %v13389_v57  ;;  %v13407_v51 = vadd.f32 %v3404_v62, %v13392_v10  ;;  %v3365_v1 = vpop.f32.mrb[77].mxu1  ;;  %v3406_v53 = vpop.f32.mrb[81].mxu0  ;;  %v11757_v57 = vld [vmem:[#allocation7 + $0xbec] ss:$16 sps:$4 sm:$0xff]   ;;  %v11752_v10 = vld [vmem:[#allocation7 + $0xbe0] ss:$16 sps:$4 sm:$0xff]  }
 0x497   : > { %v13410_v3 = vadd.f32 %v3365_v1, %v13395_v16  ;;  %v13413_v5 = vadd.f32 %v3406_v53, %v13398_v28  ;;  %v3367_v4 = vpop.f32.mrb[78].mxu1  ;;  %v3408_v6 = vpop.f32.mrb[82].mxu0  ;;  %5307 = vmatpush1.bf16.msra.mxu1 %v11740_v56  ;;  %5348 = vmatpush1.bf16.msra.mxu0 %v11743_v45  ;;  %v11763_v16 = vld [vmem:[#allocation7 + $0xc0c] ss:$16 sps:$4 sm:$0xff]   ;;  %v11758_v28 = vld [vmem:[#allocation7 + $0xc00] ss:$16 sps:$4 sm:$0xff]  }
 0x498   : > { %v3368_v9 = vpop.f32.mrb[79].mxu1  ;;  %v3409_v14 = vpop.f32.mrb[83].mxu0  ;;  %5308 = vmatprep.subr.bf16.mxu1 %v11748_v55  ;;  %5349 = vmatprep.subr.bf16.mxu0 %v11751_v58  ;;  %v11794_v45 = vld [vmem:[#allocation7 + $0xcc0] ss:$16 sps:$4 sm:$0xff]   ;;  %v11797_v55 = vld [vmem:[#allocation7 + $0xcc8] ss:$16 sps:$4 sm:$0xff]  }
 0x499   : > { %v11802_v62 = vld [vmem:[#allocation7 + $0xce4] ss:$16 sps:$4 sm:$0xff]   ;;  %v11803_v1 = vld [vmem:[#allocation7 + $0xce8] ss:$16 sps:$4 sm:$0xff]   ;;  %v5415_v6 = vrot.slane %v13317_v2, 6 }
 0x49a   : > { %v11808_v53 = vld [vmem:[#allocation7 + $0xd04] ss:$16 sps:$4 sm:$0xff]   ;;  %v11809_v4 = vld [vmem:[#allocation7 + $0xd08] ss:$16 sps:$4 sm:$0xff]   ;;  %v11812_v9 = vld [vmem:[#allocation7 + $0xd20] ss:$16 sps:$4 sm:$0xff]  }
 0x49b   : > { %5309 = vmatpush1.bf16.msra.mxu1 %v11746_v7  ;;  %5350 = vmatpush1.bf16.msra.mxu0 %v11749_v33  ;;  %v11814_v7 = vld [vmem:[#allocation7 + $0xd24] ss:$16 sps:$4 sm:$0xff]   ;;  %v11817_v33 = vld [vmem:[#allocation7 + $0xd2c] ss:$16 sps:$4 sm:$0xff]   ;;  %v11815_v14 = vld [vmem:[#allocation7 + $0xd28] ss:$16 sps:$4 sm:$0xff]  }
 0x49c   : > { %5310 = vmatprep.subr.bf16.mxu1 %v11754_v11  ;;  %5351 = vmatprep.subr.bf16.mxu0 %v11757_v57  ;;  %v11820_v11 = vld [vmem:[#allocation7 + $0xd44] ss:$16 sps:$4 sm:$0xff]   ;;  %v11823_v57 = vld [vmem:[#allocation7 + $0xd4c] ss:$16 sps:$4 sm:$0xff]  }
 0x49f   : > { %5311 = vmatpush1.bf16.msra.mxu1 %v11752_v10  ;;  %5352 = vmatpush1.bf16.msra.mxu0 %v11755_v12  ;;  %v11818_v10 = vld [vmem:[#allocation7 + $0xd40] ss:$16 sps:$4 sm:$0xff]   ;;  %v11821_v12 = vld [vmem:[#allocation7 + $0xd48] ss:$16 sps:$4 sm:$0xff]  }
 0x4a0   : > { %5577 = vmatprep.subr.bf16.mxu1 %v11760_v40  ;;  %5618 = vmatprep.subr.bf16.mxu0 %v11763_v16  ;;  %v11826_v40 = vld [vmem:[#allocation7 + $0xd64] ss:$16 sps:$4 sm:$0xff]   ;;  %v11829_v16 = vld [vmem:[#allocation7 + $0xd6c] ss:$16 sps:$4 sm:$0xff]  }
 0x4a2   : > { %5329 = vmatmul.mubr.bf16.vlgmr.msra.gmra.mrb[104].mxu1 %v5134_v18  ;;  %5370 = vmatmul.mubr.bf16.vlgmr.msra.gmra.mrb[108].mxu0 %v5134_v18  ;;  %v11832_v18 = vld [vmem:[#allocation7 + $0xd84] ss:$16 sps:$4 sm:$0xff]  }
 0x4a3   : > { %5578 = vmatpush1.bf16.msra.mxu1 %v11758_v28  ;;  %5619 = vmatpush1.bf16.msra.mxu0 %v11761_v17  ;;  %v11824_v28 = vld [vmem:[#allocation7 + $0xd60] ss:$16 sps:$4 sm:$0xff]   ;;  %v11827_v17 = vld [vmem:[#allocation7 + $0xd68] ss:$16 sps:$4 sm:$0xff]  }
 0x4a4   : > { %5579 = vmatprep.subr.bf16.mxu1 %v11766_v54  ;;  %5620 = vmatprep.subr.bf16.mxu0 %v11769_v19  ;;  %v11835_v54 = vld [vmem:[#allocation7 + $0xd8c] ss:$16 sps:$4 sm:$0xff]   ;;  %v11830_v19 = vld [vmem:[#allocation7 + $0xd80] ss:$16 sps:$4 sm:$0xff]  }
 0x4a5   : > { %5609 = vmatprep.mubr.bf16.mxu1 %v12709_v0  ;;  %5650 = vmatprep.mubr.bf16.mxu0 %v12709_v0 }
 0x4a7   : > { %5580 = vmatpush1.bf16.msra.mxu1 %v11764_v20  ;;  %5621 = vmatpush1.bf16.msra.mxu0 %v11767_v21  ;;  %v11833_v20 = vld [vmem:[#allocation7 + $0xd88] ss:$16 sps:$4 sm:$0xff]   ;;  %v11838_v21 = vld [vmem:[#allocation7 + $0xda4] ss:$16 sps:$4 sm:$0xff]  }
 0x4a8   : > { %5581 = vmatprep.subr.bf16.mxu1 %v11772_v23  ;;  %5622 = vmatprep.subr.bf16.mxu0 %v11775_v24  ;;  %v11841_v23 = vld [vmem:[#allocation7 + $0xdac] ss:$16 sps:$4 sm:$0xff]   ;;  %v11836_v24 = vld [vmem:[#allocation7 + $0xda0] ss:$16 sps:$4 sm:$0xff]  }
 0x4ab   : > { %5582 = vmatpush1.bf16.msra.mxu1 %v11770_v26  ;;  %5623 = vmatpush1.bf16.msra.mxu0 %v11773_v15  ;;  %v11839_v26 = vld [vmem:[#allocation7 + $0xda8] ss:$16 sps:$4 sm:$0xff]   ;;  %v11844_v15 = vld [vmem:[#allocation7 + $0xdc4] ss:$16 sps:$4 sm:$0xff]  }
 0x4ac   : > { %5583 = vmatprep.subr.bf16.mxu1 %v11778_v27  ;;  %5624 = vmatprep.subr.bf16.mxu0 %v11781_v29  ;;  %v11847_v27 = vld [vmem:[#allocation7 + $0xdcc] ss:$16 sps:$4 sm:$0xff]  }
 0x4af   : > { %5584 = vmatpush1.bf16.msra.mxu1 %v11776_v37  ;;  %5625 = vmatpush1.bf16.msra.mxu0 %v11779_v32 }
 0x4b0   : > { %5585 = vmatprep.subr.bf16.mxu1 %v11784_v39  ;;  %5626 = vmatprep.subr.bf16.mxu0 %v11787_v22 }
 0x4b3   : > { %5586 = vmatpush1.bf16.msra.mxu1 %v11782_v34  ;;  %5627 = vmatpush1.bf16.msra.mxu0 %v11785_v30 }
 0x4b4   : > { %5587 = vmatprep.subr.bf16.mxu1 %v11790_v8  ;;  %5628 = vmatprep.subr.bf16.mxu0 %v11793_v25 }
 0x4b5   : > { %v3644_v44 = vpop.f32.mrb[80].mxu1  ;;  %v3685_v38 = vpop.f32.mrb[84].mxu0 }
 0x4b6   : > { %v13419_v46 = vadd.f32 %v3644_v44, %v13404_v63  ;;  %v13422_v43 = vadd.f32 %v3685_v38, %v13407_v51  ;;  %v3646_v48 = vpop.f32.mrb[81].mxu1  ;;  %v3687_v49 = vpop.f32.mrb[85].mxu0  ;;  %v11805_v63 = vld [vmem:[#allocation7 + $0xcec] ss:$16 sps:$4 sm:$0xff]   ;;  %v11800_v51 = vld [vmem:[#allocation7 + $0xce0] ss:$16 sps:$4 sm:$0xff]  }
 0x4b7   : > { %v13425_v13 = vadd.f32 %v3646_v48, %v13410_v3  ;;  %v13428_v50 = vadd.f32 %v3687_v49, %v13413_v5  ;;  %v3648_v52 = vpop.f32.mrb[82].mxu1  ;;  %v3689_v56 = vpop.f32.mrb[86].mxu0  ;;  %5588 = vmatpush1.bf16.msra.mxu1 %v11788_v31  ;;  %5629 = vmatpush1.bf16.msra.mxu0 %v11791_v36  ;;  %v11811_v3 = vld [vmem:[#allocation7 + $0xd0c] ss:$16 sps:$4 sm:$0xff]   ;;  %v11806_v5 = vld [vmem:[#allocation7 + $0xd00] ss:$16 sps:$4 sm:$0xff]  }
 0x4b8   : > { %v3649_v58 = vpop.f32.mrb[83].mxu1  ;;  %v3690_v60 = vpop.f32.mrb[87].mxu0  ;;  %5589 = vmatprep.subr.bf16.mxu1 %v11796_v41  ;;  %5630 = vmatprep.subr.bf16.mxu0 %v11799_v42  ;;  %v11842_v36 = vld [vmem:[#allocation7 + $0xdc0] ss:$16 sps:$4 sm:$0xff]   ;;  %v11845_v41 = vld [vmem:[#allocation7 + $0xdc8] ss:$16 sps:$4 sm:$0xff]  }
 0x4b9   : > { %v11850_v38 = vld [vmem:[#allocation7 + $0xde4] ss:$16 sps:$4 sm:$0xff]   ;;  %v11851_v48 = vld [vmem:[#allocation7 + $0xde8] ss:$16 sps:$4 sm:$0xff]   ;;  %v5696_v56 = vrot.slane %v13320_v59, 6 }
 0x4ba   : > { %v11856_v49 = vld [vmem:[#allocation7 + $0xe04] ss:$16 sps:$4 sm:$0xff]   ;;  %v11857_v52 = vld [vmem:[#allocation7 + $0xe08] ss:$16 sps:$4 sm:$0xff]   ;;  %v11860_v58 = vld [vmem:[#allocation7 + $0xe20] ss:$16 sps:$4 sm:$0xff]  }
 0x4bb   : > { %5590 = vmatpush1.bf16.msra.mxu1 %v11794_v45  ;;  %5631 = vmatpush1.bf16.msra.mxu0 %v11797_v55  ;;  %v11862_v45 = vld [vmem:[#allocation7 + $0xe24] ss:$16 sps:$4 sm:$0xff]   ;;  %v11865_v55 = vld [vmem:[#allocation7 + $0xe2c] ss:$16 sps:$4 sm:$0xff]   ;;  %v11863_v60 = vld [vmem:[#allocation7 + $0xe28] ss:$16 sps:$4 sm:$0xff]  }
 0x4bc   : > { %5591 = vmatprep.subr.bf16.mxu1 %v11802_v62  ;;  %5632 = vmatprep.subr.bf16.mxu0 %v11805_v63  ;;  %v11868_v62 = vld [vmem:[#allocation7 + $0xe44] ss:$16 sps:$4 sm:$0xff]   ;;  %v11871_v63 = vld [vmem:[#allocation7 + $0xe4c] ss:$16 sps:$4 sm:$0xff]  }
 0x4bf   : > { %5592 = vmatpush1.bf16.msra.mxu1 %v11800_v51  ;;  %5633 = vmatpush1.bf16.msra.mxu0 %v11803_v1  ;;  %v11866_v51 = vld [vmem:[#allocation7 + $0xe40] ss:$16 sps:$4 sm:$0xff]   ;;  %v11869_v1 = vld [vmem:[#allocation7 + $0xe48] ss:$16 sps:$4 sm:$0xff]  }
 0x4c0   : > { %5858 = vmatprep.subr.bf16.mxu1 %v11808_v53  ;;  %5899 = vmatprep.subr.bf16.mxu0 %v11811_v3  ;;  %v11874_v53 = vld [vmem:[#allocation7 + $0xe64] ss:$16 sps:$4 sm:$0xff]   ;;  %v11877_v3 = vld [vmem:[#allocation7 + $0xe6c] ss:$16 sps:$4 sm:$0xff]  }
 0x4c2   : > { %5610 = vmatmul.mubr.bf16.vlgmr.msra.gmra.mrb[108].mxu1 %v5415_v6  ;;  %5651 = vmatmul.mubr.bf16.vlgmr.msra.gmra.mrb[112].mxu0 %v5415_v6  ;;  %v11880_v6 = vld [vmem:[#allocation7 + $0xe84] ss:$16 sps:$4 sm:$0xff]  }
 0x4c3   : > { %5859 = vmatpush1.bf16.msra.mxu1 %v11806_v5  ;;  %5900 = vmatpush1.bf16.msra.mxu0 %v11809_v4  ;;  %v11872_v5 = vld [vmem:[#allocation7 + $0xe60] ss:$16 sps:$4 sm:$0xff]   ;;  %v11875_v4 = vld [vmem:[#allocation7 + $0xe68] ss:$16 sps:$4 sm:$0xff]  }
 0x4c4   : > { %5860 = vmatprep.subr.bf16.mxu1 %v11814_v7  ;;  %5901 = vmatprep.subr.bf16.mxu0 %v11817_v33  ;;  %v11883_v7 = vld [vmem:[#allocation7 + $0xe8c] ss:$16 sps:$4 sm:$0xff]   ;;  %v11878_v33 = vld [vmem:[#allocation7 + $0xe80] ss:$16 sps:$4 sm:$0xff]  }
 0x4c5   : > { %5890 = vmatprep.mubr.bf16.mxu1 %v12709_v0  ;;  %5931 = vmatprep.mubr.bf16.mxu0 %v12709_v0 }
 0x4c7   : > { %5861 = vmatpush1.bf16.msra.mxu1 %v11812_v9  ;;  %5902 = vmatpush1.bf16.msra.mxu0 %v11815_v14  ;;  %v11881_v9 = vld [vmem:[#allocation7 + $0xe88] ss:$16 sps:$4 sm:$0xff]   ;;  %v11886_v14 = vld [vmem:[#allocation7 + $0xea4] ss:$16 sps:$4 sm:$0xff]  }
 0x4c8   : > { %5862 = vmatprep.subr.bf16.mxu1 %v11820_v11  ;;  %5903 = vmatprep.subr.bf16.mxu0 %v11823_v57  ;;  %v11889_v11 = vld [vmem:[#allocation7 + $0xeac] ss:$16 sps:$4 sm:$0xff]   ;;  %v11884_v57 = vld [vmem:[#allocation7 + $0xea0] ss:$16 sps:$4 sm:$0xff]  }
 0x4cb   : > { %5863 = vmatpush1.bf16.msra.mxu1 %v11818_v10  ;;  %5904 = vmatpush1.bf16.msra.mxu0 %v11821_v12  ;;  %v11887_v10 = vld [vmem:[#allocation7 + $0xea8] ss:$16 sps:$4 sm:$0xff]   ;;  %v11892_v12 = vld [vmem:[#allocation7 + $0xec4] ss:$16 sps:$4 sm:$0xff]  }
 0x4cc   : > { %5864 = vmatprep.subr.bf16.mxu1 %v11826_v40  ;;  %5905 = vmatprep.subr.bf16.mxu0 %v11829_v16  ;;  %v11895_v40 = vld [vmem:[#allocation7 + $0xecc] ss:$16 sps:$4 sm:$0xff]  }
 0x4cf   : > { %5865 = vmatpush1.bf16.msra.mxu1 %v11824_v28  ;;  %5906 = vmatpush1.bf16.msra.mxu0 %v11827_v17 }
 0x4d0   : > { %5866 = vmatprep.subr.bf16.mxu1 %v11832_v18  ;;  %5907 = vmatprep.subr.bf16.mxu0 %v11835_v54 }
 0x4d3   : > { %5867 = vmatpush1.bf16.msra.mxu1 %v11830_v19  ;;  %5908 = vmatpush1.bf16.msra.mxu0 %v11833_v20 }
 0x4d4   : > { %5868 = vmatprep.subr.bf16.mxu1 %v11838_v21  ;;  %5909 = vmatprep.subr.bf16.mxu0 %v11841_v23 }
 0x4d5   : > { %v3925_v29 = vpop.f32.mrb[84].mxu1  ;;  %v3966_v37 = vpop.f32.mrb[88].mxu0 }
 0x4d6   : > { %v13434_v32 = vadd.f32 %v3925_v29, %v13419_v46  ;;  %v13437_v39 = vadd.f32 %v3966_v37, %v13422_v43  ;;  %v3927_v22 = vpop.f32.mrb[85].mxu1  ;;  %v3968_v34 = vpop.f32.mrb[89].mxu0  ;;  %v11853_v46 = vld [vmem:[#allocation7 + $0xdec] ss:$16 sps:$4 sm:$0xff]   ;;  %v11848_v43 = vld [vmem:[#allocation7 + $0xde0] ss:$16 sps:$4 sm:$0xff]  }
 0x4d7   : > { %v13440_v30 = vadd.f32 %v3927_v22, %v13425_v13  ;;  %v13443_v8 = vadd.f32 %v3968_v34, %v13428_v50  ;;  %v3929_v25 = vpop.f32.mrb[86].mxu1  ;;  %v3970_v31 = vpop.f32.mrb[90].mxu0  ;;  %5869 = vmatpush1.bf16.msra.mxu1 %v11836_v24  ;;  %5910 = vmatpush1.bf16.msra.mxu0 %v11839_v26  ;;  %v11859_v13 = vld [vmem:[#allocation7 + $0xe0c] ss:$16 sps:$4 sm:$0xff]   ;;  %v11854_v50 = vld [vmem:[#allocation7 + $0xe00] ss:$16 sps:$4 sm:$0xff]  }
 0x4d8   : > { %v3930_v42 = vpop.f32.mrb[87].mxu1  ;;  %v3971_v44 = vpop.f32.mrb[91].mxu0  ;;  %5870 = vmatprep.subr.bf16.mxu1 %v11844_v15  ;;  %5911 = vmatprep.subr.bf16.mxu0 %v11847_v27  ;;  %v11890_v26 = vld [vmem:[#allocation7 + $0xec0] ss:$16 sps:$4 sm:$0xff]   ;;  %v11893_v15 = vld [vmem:[#allocation7 + $0xec8] ss:$16 sps:$4 sm:$0xff]  }
 0x4d9   : > { %v11898_v37 = vld [vmem:[#allocation7 + $0xee4] ss:$16 sps:$4 sm:$0xff]   ;;  %v11899_v22 = vld [vmem:[#allocation7 + $0xee8] ss:$16 sps:$4 sm:$0xff]   ;;  %v5977_v31 = vrot.slane %v13317_v2, 7 }
 0x4da   : > { %v11904_v34 = vld [vmem:[#allocation7 + $0xf04] ss:$16 sps:$4 sm:$0xff]   ;;  %v11905_v25 = vld [vmem:[#allocation7 + $0xf08] ss:$16 sps:$4 sm:$0xff]   ;;  %v11908_v42 = vld [vmem:[#allocation7 + $0xf20] ss:$16 sps:$4 sm:$0xff]  }
 0x4db   : > { %5871 = vmatpush1.bf16.msra.mxu1 %v11842_v36  ;;  %5912 = vmatpush1.bf16.msra.mxu0 %v11845_v41  ;;  %v11910_v36 = vld [vmem:[#allocation7 + $0xf24] ss:$16 sps:$4 sm:$0xff]   ;;  %v11913_v41 = vld [vmem:[#allocation7 + $0xf2c] ss:$16 sps:$4 sm:$0xff]   ;;  %v11911_v44 = vld [vmem:[#allocation7 + $0xf28] ss:$16 sps:$4 sm:$0xff]  }
 0x4dc   : > { %5872 = vmatprep.subr.bf16.mxu1 %v11850_v38  ;;  %5913 = vmatprep.subr.bf16.mxu0 %v11853_v46  ;;  %v11916_v38 = vld [vmem:[#allocation7 + $0xf44] ss:$16 sps:$4 sm:$0xff]   ;;  %v11919_v46 = vld [vmem:[#allocation7 + $0xf4c] ss:$16 sps:$4 sm:$0xff]   ;;  %v11914_v2 = vld [vmem:[#allocation7 + $0xf40] ss:$16 sps:$4 sm:$0xff]  }
 0x4df   : > { %5873 = vmatpush1.bf16.msra.mxu1 %v11848_v43  ;;  %5914 = vmatpush1.bf16.msra.mxu0 %v11851_v48  ;;  %v11917_v43 = vld [vmem:[#allocation7 + $0xf48] ss:$16 sps:$4 sm:$0xff]   ;;  %v11922_v48 = vld [vmem:[#allocation7 + $0xf64] ss:$16 sps:$4 sm:$0xff]  }
 0x4e0   : > { %6139 = vmatprep.subr.bf16.mxu1 %v11856_v49  ;;  %6180 = vmatprep.subr.bf16.mxu0 %v11859_v13  ;;  %v11925_v49 = vld [vmem:[#allocation7 + $0xf6c] ss:$16 sps:$4 sm:$0xff]   ;;  %v11920_v13 = vld [vmem:[#allocation7 + $0xf60] ss:$16 sps:$4 sm:$0xff]  }
 0x4e2   : > { %5891 = vmatmul.mubr.bf16.vlgmr.msra.gmra.mrb[112].mxu1 %v5696_v56  ;;  %5932 = vmatmul.mubr.bf16.vlgmr.msra.gmra.mrb[116].mxu0 %v5696_v56  ;;  %v11931_v56 = vld [vmem:[#allocation7 + $0xf8c] ss:$16 sps:$4 sm:$0xff]  }
 0x4e3   : > { %6140 = vmatpush1.bf16.msra.mxu1 %v11854_v50  ;;  %6181 = vmatpush1.bf16.msra.mxu0 %v11857_v52  ;;  %v11923_v50 = vld [vmem:[#allocation7 + $0xf68] ss:$16 sps:$4 sm:$0xff]   ;;  %v11928_v52 = vld [vmem:[#allocation7 + $0xf84] ss:$16 sps:$4 sm:$0xff]  }
 0x4e4   : > { %6141 = vmatprep.subr.bf16.mxu1 %v11862_v45  ;;  %6182 = vmatprep.subr.bf16.mxu0 %v11865_v55  ;;  %v11926_v45 = vld [vmem:[#allocation7 + $0xf80] ss:$16 sps:$4 sm:$0xff]   ;;  %v11929_v55 = vld [vmem:[#allocation7 + $0xf88] ss:$16 sps:$4 sm:$0xff]  }
 0x4e5   : > { %6171 = vmatprep.mubr.bf16.mxu1 %v12709_v0  ;;  %6212 = vmatprep.mubr.bf16.mxu0 %v12709_v0 }
 0x4e7   : > { %6142 = vmatpush1.bf16.msra.mxu1 %v11860_v58  ;;  %6183 = vmatpush1.bf16.msra.mxu0 %v11863_v60  ;;  %v11934_v58 = vld [vmem:[#allocation7 + $0xfa4] ss:$16 sps:$4 sm:$0xff]   ;;  %v11937_v60 = vld [vmem:[#allocation7 + $0xfac] ss:$16 sps:$4 sm:$0xff]  }
 0x4e8   : > { %6143 = vmatprep.subr.bf16.mxu1 %v11868_v62  ;;  %6184 = vmatprep.subr.bf16.mxu0 %v11871_v63  ;;  %v11932_v62 = vld [vmem:[#allocation7 + $0xfa0] ss:$16 sps:$4 sm:$0xff]   ;;  %v11935_v63 = vld [vmem:[#allocation7 + $0xfa8] ss:$16 sps:$4 sm:$0xff]  }
 0x4eb   : > { %6144 = vmatpush1.bf16.msra.mxu1 %v11866_v51  ;;  %6185 = vmatpush1.bf16.msra.mxu0 %v11869_v1  ;;  %v11940_v51 = vld [vmem:[#allocation7 + $0xfc4] ss:$16 sps:$4 sm:$0xff]   ;;  %v11943_v1 = vld [vmem:[#allocation7 + $0xfcc] ss:$16 sps:$4 sm:$0xff]  }
 0x4ec   : > { %6145 = vmatprep.subr.bf16.mxu1 %v11874_v53  ;;  %6186 = vmatprep.subr.bf16.mxu0 %v11877_v3 }
 0x4ef   : > { %6146 = vmatpush1.bf16.msra.mxu1 %v11872_v5  ;;  %6187 = vmatpush1.bf16.msra.mxu0 %v11875_v4 }
 0x4f0   : > { %6147 = vmatprep.subr.bf16.mxu1 %v11880_v6  ;;  %6188 = vmatprep.subr.bf16.mxu0 %v11883_v7 }
 0x4f3   : > { %6148 = vmatpush1.bf16.msra.mxu1 %v11878_v33  ;;  %6189 = vmatpush1.bf16.msra.mxu0 %v11881_v9 }
 0x4f4   : > { %6149 = vmatprep.subr.bf16.mxu1 %v11886_v14  ;;  %6190 = vmatprep.subr.bf16.mxu0 %v11889_v11 }
 0x4f5   : > { %v4206_v16 = vpop.f32.mrb[88].mxu1  ;;  %v4247_v28 = vpop.f32.mrb[92].mxu0 }
 0x4f6   : > { %v13449_v17 = vadd.f32 %v4206_v16, %v13434_v32  ;;  %v13452_v18 = vadd.f32 %v4247_v28, %v13437_v39  ;;  %v4208_v54 = vpop.f32.mrb[89].mxu1  ;;  %v4249_v19 = vpop.f32.mrb[93].mxu0  ;;  %v11901_v32 = vld [vmem:[#allocation7 + $0xeec] ss:$16 sps:$4 sm:$0xff]   ;;  %v11896_v39 = vld [vmem:[#allocation7 + $0xee0] ss:$16 sps:$4 sm:$0xff]  }
 0x4f7   : > { %v13455_v20 = vadd.f32 %v4208_v54, %v13440_v30  ;;  %v13458_v21 = vadd.f32 %v4249_v19, %v13443_v8  ;;  %v4210_v23 = vpop.f32.mrb[90].mxu1  ;;  %v4251_v24 = vpop.f32.mrb[94].mxu0  ;;  %6150 = vmatpush1.bf16.msra.mxu1 %v11884_v57  ;;  %6191 = vmatpush1.bf16.msra.mxu0 %v11887_v10  ;;  %v11907_v30 = vld [vmem:[#allocation7 + $0xf0c] ss:$16 sps:$4 sm:$0xff]   ;;  %v11902_v8 = vld [vmem:[#allocation7 + $0xf00] ss:$16 sps:$4 sm:$0xff]  }
 0x4f8   : > { %v4211_v27 = vpop.f32.mrb[91].mxu1  ;;  %v4252_v29 = vpop.f32.mrb[95].mxu0  ;;  %6151 = vmatprep.subr.bf16.mxu1 %v11892_v12  ;;  %6192 = vmatprep.subr.bf16.mxu0 %v11895_v40  ;;  %v11938_v57 = vld [vmem:[#allocation7 + $0xfc0] ss:$16 sps:$4 sm:$0xff]   ;;  %v11941_v10 = vld [vmem:[#allocation7 + $0xfc8] ss:$16 sps:$4 sm:$0xff]  }
 0x4f9   : > { %v11946_v16 = vld [vmem:[#allocation7 + $0xfe4] ss:$16 sps:$4 sm:$0xff]   ;;  %v11949_v28 = vld [vmem:[#allocation7 + $0xfec] ss:$16 sps:$4 sm:$0xff]   ;;  %v6258_v23 = vrot.slane %v13320_v59, 7 }
 0x4fa   : > { %v11952_v54 = vld [vmem:[#allocation7 + $0x1004] ss:$16 sps:$4 sm:$0xff]   ;;  %v11955_v19 = vld [vmem:[#allocation7 + $0x100c] ss:$16 sps:$4 sm:$0xff]   ;;  %v11959_v27 = vld [vmem:[#allocation7 + $0x1028] ss:$16 sps:$4 sm:$0xff]  }
 0x4fb   : > { %6152 = vmatpush1.bf16.msra.mxu1 %v11890_v26  ;;  %6193 = vmatpush1.bf16.msra.mxu0 %v11893_v15  ;;  %v11958_v24 = vld [vmem:[#allocation7 + $0x1024] ss:$16 sps:$4 sm:$0xff]   ;;  %v11961_v26 = vld [vmem:[#allocation7 + $0x102c] ss:$16 sps:$4 sm:$0xff]   ;;  %v11956_v15 = vld [vmem:[#allocation7 + $0x1020] ss:$16 sps:$4 sm:$0xff]  }
 0x4fc   : > { %6153 = vmatprep.subr.bf16.mxu1 %v11898_v37  ;;  %6194 = vmatprep.subr.bf16.mxu0 %v11901_v32  ;;  %v11964_v29 = vld [vmem:[#allocation7 + $0x1044] ss:$16 sps:$4 sm:$0xff]   ;;  %v11967_v37 = vld [vmem:[#allocation7 + $0x104c] ss:$16 sps:$4 sm:$0xff]   ;;  %v11962_v59 = vld [vmem:[#allocation7 + $0x1040] ss:$16 sps:$4 sm:$0xff]  }
 0x4fd   : > { %v11965_v32 = vld [vmem:[#allocation7 + $0x1048] ss:$16 sps:$4 sm:$0xff]  }
 0x4ff   : > { %6154 = vmatpush1.bf16.msra.mxu1 %v11896_v39  ;;  %6195 = vmatpush1.bf16.msra.mxu0 %v11899_v22  ;;  %v11970_v39 = vld [vmem:[#allocation7 + $0x1064] ss:$16 sps:$4 sm:$0xff]   ;;  %v11973_v22 = vld [vmem:[#allocation7 + $0x106c] ss:$16 sps:$4 sm:$0xff]  }
 0x500   : > { %6420 = vmatprep.subr.bf16.mxu1 %v11904_v34  ;;  %6461 = vmatprep.subr.bf16.mxu0 %v11907_v30  ;;  %v11968_v34 = vld [vmem:[#allocation7 + $0x1060] ss:$16 sps:$4 sm:$0xff]   ;;  %v11971_v30 = vld [vmem:[#allocation7 + $0x1068] ss:$16 sps:$4 sm:$0xff]  }
 0x502   : > { %6172 = vmatmul.mubr.bf16.vlgmr.msra.gmra.mrb[116].mxu1 %v5977_v31  ;;  %6213 = vmatmul.mubr.bf16.vlgmr.msra.gmra.mrb[120].mxu0 %v5977_v31  ;;  %v11974_v31 = vld [vmem:[#allocation7 + $0x1080] ss:$16 sps:$4 sm:$0xff]  }
 0x503   : > { %6421 = vmatpush1.bf16.msra.mxu1 %v11902_v8  ;;  %6462 = vmatpush1.bf16.msra.mxu0 %v11905_v25  ;;  %v11976_v8 = vld [vmem:[#allocation7 + $0x1084] ss:$16 sps:$4 sm:$0xff]   ;;  %v11979_v25 = vld [vmem:[#allocation7 + $0x108c] ss:$16 sps:$4 sm:$0xff]  }
 0x504   : > { %6422 = vmatprep.subr.bf16.mxu1 %v11910_v36  ;;  %6463 = vmatprep.subr.bf16.mxu0 %v11913_v41  ;;  %v11977_v36 = vld [vmem:[#allocation7 + $0x1088] ss:$16 sps:$4 sm:$0xff]   ;;  %v11982_v41 = vld [vmem:[#allocation7 + $0x10a4] ss:$16 sps:$4 sm:$0xff]  }
 0x505   : > { %6452 = vmatprep.mubr.bf16.mxu1 %v12709_v0  ;;  %6493 = vmatprep.mubr.bf16.mxu0 %v12709_v0 }
 0x507   : > { %6423 = vmatpush1.bf16.msra.mxu1 %v11908_v42  ;;  %6464 = vmatpush1.bf16.msra.mxu0 %v11911_v44  ;;  %v11985_v42 = vld [vmem:[#allocation7 + $0x10ac] ss:$16 sps:$4 sm:$0xff]   ;;  %v11980_v44 = vld [vmem:[#allocation7 + $0x10a0] ss:$16 sps:$4 sm:$0xff]  }
 0x508   : > { %6424 = vmatprep.subr.bf16.mxu1 %v11916_v38  ;;  %6465 = vmatprep.subr.bf16.mxu0 %v11919_v46  ;;  %v11983_v38 = vld [vmem:[#allocation7 + $0x10a8] ss:$16 sps:$4 sm:$0xff]   ;;  %v11988_v46 = vld [vmem:[#allocation7 + $0x10c4] ss:$16 sps:$4 sm:$0xff]  }
 0x50b   : > { %6425 = vmatpush1.bf16.msra.mxu1 %v11914_v2  ;;  %6466 = vmatpush1.bf16.msra.mxu0 %v11917_v43  ;;  %v11991_v2 = vld [vmem:[#allocation7 + $0x10cc] ss:$16 sps:$4 sm:$0xff]  }
 0x50c   : > { %6426 = vmatprep.subr.bf16.mxu1 %v11922_v48  ;;  %6467 = vmatprep.subr.bf16.mxu0 %v11925_v49 }
 0x50f   : > { %6427 = vmatpush1.bf16.msra.mxu1 %v11920_v13  ;;  %6468 = vmatpush1.bf16.msra.mxu0 %v11923_v50 }
 0x510   : > { %6428 = vmatprep.subr.bf16.mxu1 %v11928_v52  ;;  %6469 = vmatprep.subr.bf16.mxu0 %v11931_v56 }
 0x513   : > { %6429 = vmatpush1.bf16.msra.mxu1 %v11926_v45  ;;  %6470 = vmatpush1.bf16.msra.mxu0 %v11929_v55 }
 0x514   : > { %6430 = vmatprep.subr.bf16.mxu1 %v11934_v58  ;;  %6471 = vmatprep.subr.bf16.mxu0 %v11937_v60  ;;  %v11986_v60 = vld [vmem:[#allocation7 + $0x10c0] ss:$16 sps:$4 sm:$0xff]  }
 0x515   : > { %v4487_v53 = vpop.f32.mrb[92].mxu1  ;;  %v4528_v3 = vpop.f32.mrb[96].mxu0 }
 0x516   : > { %v13464_v5 = vadd.f32 %v4487_v53, %v13449_v17  ;;  %v13467_v4 = vadd.f32 %v4528_v3, %v13452_v18  ;;  %v4489_v6 = vpop.f32.mrb[93].mxu1  ;;  %v4530_v7 = vpop.f32.mrb[97].mxu0  ;;  %v11944_v17 = vld [vmem:[#allocation7 + $0xfe0] ss:$16 sps:$4 sm:$0xff]   ;;  %v11947_v18 = vld [vmem:[#allocation7 + $0xfe8] ss:$16 sps:$4 sm:$0xff]  }
 0x517   : > { %v13470_v33 = vadd.f32 %v4489_v6, %v13455_v20  ;;  %v13473_v9 = vadd.f32 %v4530_v7, %v13458_v21  ;;  %v4491_v14 = vpop.f32.mrb[94].mxu1  ;;  %v4532_v11 = vpop.f32.mrb[98].mxu0  ;;  %6431 = vmatpush1.bf16.msra.mxu1 %v11932_v62  ;;  %6472 = vmatpush1.bf16.msra.mxu0 %v11935_v63  ;;  %v11950_v20 = vld [vmem:[#allocation7 + $0x1000] ss:$16 sps:$4 sm:$0xff]   ;;  %v11953_v21 = vld [vmem:[#allocation7 + $0x1008] ss:$16 sps:$4 sm:$0xff]  }
 0x518   : > { %v4492_v12 = vpop.f32.mrb[95].mxu1  ;;  %v4533_v40 = vpop.f32.mrb[99].mxu0  ;;  %6432 = vmatprep.subr.bf16.mxu1 %v11940_v51  ;;  %6473 = vmatprep.subr.bf16.mxu0 %v11943_v1  ;;  %v11989_v62 = vld [vmem:[#allocation7 + $0x10c8] ss:$16 sps:$4 sm:$0xff]   ;;  %v11994_v1 = vld [vmem:[#allocation7 + $0x10e4] ss:$16 sps:$4 sm:$0xff]  }
 0x519   : > { %v11997_v53 = vld [vmem:[#allocation7 + $0x10ec] ss:$16 sps:$4 sm:$0xff]   ;;  %v11992_v3 = vld [vmem:[#allocation7 + $0x10e0] ss:$16 sps:$4 sm:$0xff]  }
 0x51a   : > { %v12003_v6 = vld [vmem:[#allocation7 + $0x110c] ss:$16 sps:$4 sm:$0xff]   ;;  %v11998_v7 = vld [vmem:[#allocation7 + $0x1100] ss:$16 sps:$4 sm:$0xff]  }
 0x51b   : > { %6433 = vmatpush1.bf16.msra.mxu1 %v11938_v57  ;;  %6474 = vmatpush1.bf16.msra.mxu0 %v11941_v10  ;;  %v12009_v14 = vld [vmem:[#allocation7 + $0x112c] ss:$16 sps:$4 sm:$0xff]   ;;  %v12004_v11 = vld [vmem:[#allocation7 + $0x1120] ss:$16 sps:$4 sm:$0xff]   ;;  %v12007_v57 = vld [vmem:[#allocation7 + $0x1128] ss:$16 sps:$4 sm:$0xff]  }
 0x51c   : > { %6434 = vmatprep.subr.bf16.mxu1 %v11946_v16  ;;  %6475 = vmatprep.subr.bf16.mxu0 %v11949_v28  ;;  %v12012_v10 = vld [vmem:[#allocation7 + $0x1144] ss:$16 sps:$4 sm:$0xff]   ;;  %v12015_v12 = vld [vmem:[#allocation7 + $0x114c] ss:$16 sps:$4 sm:$0xff]   ;;  %v12010_v40 = vld [vmem:[#allocation7 + $0x1140] ss:$16 sps:$4 sm:$0xff]  }
 0x51d   : > { %v12013_v16 = vld [vmem:[#allocation7 + $0x1148] ss:$16 sps:$4 sm:$0xff]   ;;  %v12018_v28 = vld [vmem:[#allocation7 + $0x1164] ss:$16 sps:$4 sm:$0xff]  }
 0x51f   : > { %6435 = vmatpush1.bf16.msra.mxu1 %v11944_v17  ;;  %6476 = vmatpush1.bf16.msra.mxu0 %v11947_v18  ;;  %v12021_v17 = vld [vmem:[#allocation7 + $0x116c] ss:$16 sps:$4 sm:$0xff]   ;;  %v12016_v18 = vld [vmem:[#allocation7 + $0x1160] ss:$16 sps:$4 sm:$0xff]  }
 0x520   : > { %6699 = vmatprep.subr.bf16.mxu1 %v11952_v54  ;;  %6740 = vmatprep.subr.bf16.mxu0 %v11955_v19  ;;  %v12019_v54 = vld [vmem:[#allocation7 + $0x1168] ss:$16 sps:$4 sm:$0xff]   ;;  %v12024_v19 = vld [vmem:[#allocation7 + $0x1184] ss:$16 sps:$4 sm:$0xff]  }
 0x522   : > { %6453 = vmatmul.mubr.bf16.vlgmr.msra.gmra.mrb[120].mxu1 %v6258_v23  ;;  %6494 = vmatmul.mubr.bf16.vlgmr.msra.gmra.mrb[124].mxu0 %v6258_v23  ;;  %v12025_v23 = vld [vmem:[#allocation7 + $0x1188] ss:$16 sps:$4 sm:$0xff]  }
 0x523   : > { %6700 = vmatpush1.bf16.msra.mxu1 %v11950_v20  ;;  %6741 = vmatpush1.bf16.msra.mxu0 %v11953_v21  ;;  %v12027_v20 = vld [vmem:[#allocation7 + $0x118c] ss:$16 sps:$4 sm:$0xff]   ;;  %v12022_v21 = vld [vmem:[#allocation7 + $0x1180] ss:$16 sps:$4 sm:$0xff]  }
 0x524   : > { %6701 = vmatprep.subr.bf16.mxu1 %v11958_v24  ;;  %6742 = vmatprep.subr.bf16.mxu0 %v11961_v26  ;;  %v12030_v24 = vld [vmem:[#allocation7 + $0x11a4] ss:$16 sps:$4 sm:$0xff]   ;;  %v12033_v26 = vld [vmem:[#allocation7 + $0x11ac] ss:$16 sps:$4 sm:$0xff]  }
 0x525   : > { %6731 = vmatprep.mubr.bf16.mxu1 %v12709_v0  ;;  %6772 = vmatprep.mubr.bf16.mxu0 %v12709_v0 }
 0x527   : > { %6702 = vmatpush1.bf16.msra.mxu1 %v11956_v15  ;;  %6743 = vmatpush1.bf16.msra.mxu0 %v11959_v27  ;;  %v12028_v15 = vld [vmem:[#allocation7 + $0x11a0] ss:$16 sps:$4 sm:$0xff]   ;;  %v12031_v27 = vld [vmem:[#allocation7 + $0x11a8] ss:$16 sps:$4 sm:$0xff]  }
 0x528   : > { %6703 = vmatprep.subr.bf16.mxu1 %v11964_v29  ;;  %6744 = vmatprep.subr.bf16.mxu0 %v11967_v37  ;;  %v12036_v29 = vld [vmem:[#allocation7 + $0x11c4] ss:$16 sps:$4 sm:$0xff]   ;;  %v12039_v37 = vld [vmem:[#allocation7 + $0x11cc] ss:$16 sps:$4 sm:$0xff]  }
 0x52b   : > { %6704 = vmatpush1.bf16.msra.mxu1 %v11962_v59  ;;  %6745 = vmatpush1.bf16.msra.mxu0 %v11965_v32 }
 0x52c   : > { %6705 = vmatprep.subr.bf16.mxu1 %v11970_v39  ;;  %6746 = vmatprep.subr.bf16.mxu0 %v11973_v22 }
 0x52f   : > { %6706 = vmatpush1.bf16.msra.mxu1 %v11968_v34  ;;  %6747 = vmatpush1.bf16.msra.mxu0 %v11971_v30 }
 0x530   : > { %6707 = vmatprep.subr.bf16.mxu1 %v11976_v8  ;;  %6748 = vmatprep.subr.bf16.mxu0 %v11979_v25 }
 0x533   : > { %6708 = vmatpush1.bf16.msra.mxu1 %v11974_v31  ;;  %6749 = vmatpush1.bf16.msra.mxu0 %v11977_v36 }
 0x534   : > { %6709 = vmatprep.subr.bf16.mxu1 %v11982_v41  ;;  %6750 = vmatprep.subr.bf16.mxu0 %v11985_v42  ;;  %v12034_v41 = vld [vmem:[#allocation7 + $0x11c0] ss:$16 sps:$4 sm:$0xff]   ;;  %v12037_v42 = vld [vmem:[#allocation7 + $0x11c8] ss:$16 sps:$4 sm:$0xff]  }
 0x535   : > { %v4768_v43 = vpop.f32.mrb[96].mxu1  ;;  %v4809_v48 = vpop.f32.mrb[100].mxu0 }
 0x536   : > { %v13479_v49 = vadd.f32 %v4768_v43, %v13464_v5  ;;  %v13482_v13 = vadd.f32 %v4809_v48, %v13467_v4  ;;  %v4770_v50 = vpop.f32.mrb[97].mxu1  ;;  %v4811_v52 = vpop.f32.mrb[101].mxu0  ;;  %v11995_v5 = vld [vmem:[#allocation7 + $0x10e8] ss:$16 sps:$4 sm:$0xff]   ;;  %v12000_v4 = vld [vmem:[#allocation7 + $0x1104] ss:$16 sps:$4 sm:$0xff]  }
 0x537   : > { %v13485_v56 = vadd.f32 %v4770_v50, %v13470_v33  ;;  %v13488_v45 = vadd.f32 %v4811_v52, %v13473_v9  ;;  %v4772_v55 = vpop.f32.mrb[98].mxu1  ;;  %v4813_v58 = vpop.f32.mrb[102].mxu0  ;;  %6710 = vmatpush1.bf16.msra.mxu1 %v11980_v44  ;;  %6751 = vmatpush1.bf16.msra.mxu0 %v11983_v38  ;;  %v12001_v33 = vld [vmem:[#allocation7 + $0x1108] ss:$16 sps:$4 sm:$0xff]   ;;  %v12006_v9 = vld [vmem:[#allocation7 + $0x1124] ss:$16 sps:$4 sm:$0xff]  }
 0x538   : > { %v4773_v63 = vpop.f32.mrb[99].mxu1  ;;  %v4814_v51 = vpop.f32.mrb[103].mxu0  ;;  %6711 = vmatprep.subr.bf16.mxu1 %v11988_v46  ;;  %6752 = vmatprep.subr.bf16.mxu0 %v11991_v2  ;;  %v12042_v46 = vld [vmem:[#allocation7 + $0x11e4] ss:$16 sps:$4 sm:$0xff]   ;;  %v12045_v2 = vld [vmem:[#allocation7 + $0x11ec] ss:$16 sps:$4 sm:$0xff]  }
 0x539   : > { %v12040_v43 = vld [vmem:[#allocation7 + $0x11e0] ss:$16 sps:$4 sm:$0xff]   ;;  %v12043_v48 = vld [vmem:[#allocation7 + $0x11e8] ss:$16 sps:$4 sm:$0xff]   ;;  %v12057_v55 = vld [vmem:[#allocation7 + $0x122c] ss:$16 sps:$4 sm:$0xff]  }
 0x53a   : > { %v12046_v50 = vld [vmem:[#allocation7 + $0x1200] ss:$16 sps:$4 sm:$0xff]   ;;  %v12049_v52 = vld [vmem:[#allocation7 + $0x1208] ss:$16 sps:$4 sm:$0xff]   ;;  %v12063_v63 = vld [vmem:[#allocation7 + $0x124c] ss:$16 sps:$4 sm:$0xff]  }
 0x53b   : > { %6712 = vmatpush1.bf16.msra.mxu1 %v11986_v60  ;;  %6753 = vmatpush1.bf16.msra.mxu0 %v11989_v62  ;;  %v12052_v58 = vld [vmem:[#allocation7 + $0x1220] ss:$16 sps:$4 sm:$0xff]   ;;  %v12055_v60 = vld [vmem:[#allocation7 + $0x1228] ss:$16 sps:$4 sm:$0xff]   ;;  %v12060_v62 = vld [vmem:[#allocation7 + $0x1244] ss:$16 sps:$4 sm:$0xff]  }
 0x53c   : > { %6713 = vmatprep.subr.bf16.mxu1 %v11994_v1  ;;  %6754 = vmatprep.subr.bf16.mxu0 %v11997_v53  ;;  %v12058_v51 = vld [vmem:[#allocation7 + $0x1240] ss:$16 sps:$4 sm:$0xff]   ;;  %v12061_v1 = vld [vmem:[#allocation7 + $0x1248] ss:$16 sps:$4 sm:$0xff]   ;;  %v12066_v53 = vld [vmem:[#allocation7 + $0x1264] ss:$16 sps:$4 sm:$0xff]  }
 0x53f   : > { %6714 = vmatpush1.bf16.msra.mxu1 %v11992_v3  ;;  %6755 = vmatpush1.bf16.msra.mxu0 %v11995_v5  ;;  %v12069_v3 = vld [vmem:[#allocation7 + $0x126c] ss:$16 sps:$4 sm:$0xff]   ;;  %v12064_v5 = vld [vmem:[#allocation7 + $0x1260] ss:$16 sps:$4 sm:$0xff]  }
 0x540   : > { %6982 = vmatprep.subr.bf16.mxu1 %v12000_v4  ;;  %7023 = vmatprep.subr.bf16.mxu0 %v12003_v6  ;;  %v12067_v4 = vld [vmem:[#allocation7 + $0x1268] ss:$16 sps:$4 sm:$0xff]   ;;  %v12072_v6 = vld [vmem:[#allocation7 + $0x1284] ss:$16 sps:$4 sm:$0xff]  }
 0x542   : > { %6732 = vmatmul.mubr.bf16.vlgmr.msra.gmra.mrb[124].mxu1 %v13333_v35  ;;  %6773 = vmatmul.mubr.bf16.vlgmr.msra.gmra.mrb[128].mxu0 %v13333_v35 }
 0x543   : > { %6983 = vmatpush1.bf16.msra.mxu1 %v11998_v7  ;;  %7024 = vmatpush1.bf16.msra.mxu0 %v12001_v33  ;;  %v12075_v7 = vld [vmem:[#allocation7 + $0x128c] ss:$16 sps:$4 sm:$0xff]   ;;  %v12070_v33 = vld [vmem:[#allocation7 + $0x1280] ss:$16 sps:$4 sm:$0xff]  }
 0x544   : > { %6984 = vmatprep.subr.bf16.mxu1 %v12006_v9  ;;  %7025 = vmatprep.subr.bf16.mxu0 %v12009_v14  ;;  %v12073_v9 = vld [vmem:[#allocation7 + $0x1288] ss:$16 sps:$4 sm:$0xff]   ;;  %v12078_v14 = vld [vmem:[#allocation7 + $0x12a4] ss:$16 sps:$4 sm:$0xff]  }
 0x545   : > { %7014 = vmatprep.mubr.bf16.mxu1 %v12709_v0  ;;  %7055 = vmatprep.mubr.bf16.mxu0 %v12709_v0 }
 0x547   : > { %6985 = vmatpush1.bf16.msra.mxu1 %v12004_v11  ;;  %7026 = vmatpush1.bf16.msra.mxu0 %v12007_v57  ;;  %v12081_v11 = vld [vmem:[#allocation7 + $0x12ac] ss:$16 sps:$4 sm:$0xff]   ;;  %v12076_v57 = vld [vmem:[#allocation7 + $0x12a0] ss:$16 sps:$4 sm:$0xff]  }
 0x548   : > { %6986 = vmatprep.subr.bf16.mxu1 %v12012_v10  ;;  %7027 = vmatprep.subr.bf16.mxu0 %v12015_v12  ;;  %v12079_v10 = vld [vmem:[#allocation7 + $0x12a8] ss:$16 sps:$4 sm:$0xff]   ;;  %v12084_v12 = vld [vmem:[#allocation7 + $0x12c4] ss:$16 sps:$4 sm:$0xff]  }
 0x54b   : > { %6987 = vmatpush1.bf16.msra.mxu1 %v12010_v40  ;;  %7028 = vmatpush1.bf16.msra.mxu0 %v12013_v16  ;;  %v12087_v40 = vld [vmem:[#allocation7 + $0x12cc] ss:$16 sps:$4 sm:$0xff]  }
 0x54c   : > { %6988 = vmatprep.subr.bf16.mxu1 %v12018_v28  ;;  %7029 = vmatprep.subr.bf16.mxu0 %v12021_v17 }
 0x54f   : > { %6989 = vmatpush1.bf16.msra.mxu1 %v12016_v18  ;;  %7030 = vmatpush1.bf16.msra.mxu0 %v12019_v54 }
 0x550   : > { %6990 = vmatprep.subr.bf16.mxu1 %v12024_v19  ;;  %7031 = vmatprep.subr.bf16.mxu0 %v12027_v20 }
 0x553   : > { %6991 = vmatpush1.bf16.msra.mxu1 %v12022_v21  ;;  %7032 = vmatpush1.bf16.msra.mxu0 %v12025_v23 }
 0x554   : > { %6992 = vmatprep.subr.bf16.mxu1 %v12030_v24  ;;  %7033 = vmatprep.subr.bf16.mxu0 %v12033_v26  ;;  %v12082_v26 = vld [vmem:[#allocation7 + $0x12c0] ss:$16 sps:$4 sm:$0xff]  }
 0x555   : > { %v5049_v59 = vpop.f32.mrb[100].mxu1  ;;  %v5090_v32 = vpop.f32.mrb[104].mxu0 }
 0x556   : > { %v13495_v39 = vadd.f32 %v5049_v59, %v13479_v49  ;;  %v13498_v22 = vadd.f32 %v5090_v32, %v13482_v13  ;;  %v5051_v34 = vpop.f32.mrb[101].mxu1  ;;  %v5092_v30 = vpop.f32.mrb[105].mxu0  ;;  %v12048_v49 = vld [vmem:[#allocation7 + $0x1204] ss:$16 sps:$4 sm:$0xff]   ;;  %v12051_v13 = vld [vmem:[#allocation7 + $0x120c] ss:$16 sps:$4 sm:$0xff]  }
 0x557   : > { %v13501_v8 = vadd.f32 %v5051_v34, %v13485_v56  ;;  %v13504_v25 = vadd.f32 %v5092_v30, %v13488_v45  ;;  %v5053_v31 = vpop.f32.mrb[102].mxu1  ;;  %v5094_v36 = vpop.f32.mrb[106].mxu0  ;;  %6993 = vmatpush1.bf16.msra.mxu1 %v12028_v15  ;;  %7034 = vmatpush1.bf16.msra.mxu0 %v12031_v27  ;;  %v13507_v56 = vshrl.u32 %v13333_v35, 16  ;;  %v12054_v45 = vld [vmem:[#allocation7 + $0x1224] ss:$16 sps:$4 sm:$0xff]  }
 0x558   : > { %v5054_v44 = vpop.f32.mrb[103].mxu1  ;;  %v5095_v38 = vpop.f32.mrb[107].mxu0  ;;  %6994 = vmatprep.subr.bf16.mxu1 %v12036_v29  ;;  %7035 = vmatprep.subr.bf16.mxu0 %v12039_v37  ;;  %v12085_v15 = vld [vmem:[#allocation7 + $0x12c8] ss:$16 sps:$4 sm:$0xff]   ;;  %v12090_v37 = vld [vmem:[#allocation7 + $0x12e4] ss:$16 sps:$4 sm:$0xff]  }
 0x559   : > { %v12093_v59 = vld [vmem:[#allocation7 + $0x12ec] ss:$16 sps:$4 sm:$0xff]   ;;  %v12088_v32 = vld [vmem:[#allocation7 + $0x12e0] ss:$16 sps:$4 sm:$0xff]   ;;  %v12102_v31 = vld [vmem:[#allocation7 + $0x1324] ss:$16 sps:$4 sm:$0xff]  }
 0x55a   : > { %v12099_v34 = vld [vmem:[#allocation7 + $0x130c] ss:$16 sps:$4 sm:$0xff]   ;;  %v12094_v30 = vld [vmem:[#allocation7 + $0x1300] ss:$16 sps:$4 sm:$0xff]   ;;  %v12108_v44 = vld [vmem:[#allocation7 + $0x1344] ss:$16 sps:$4 sm:$0xff]  }
 0x55b   : > { %6995 = vmatpush1.bf16.msra.mxu1 %v12034_v41  ;;  %7036 = vmatpush1.bf16.msra.mxu0 %v12037_v42  ;;  %v12105_v36 = vld [vmem:[#allocation7 + $0x132c] ss:$16 sps:$4 sm:$0xff]   ;;  %v12100_v41 = vld [vmem:[#allocation7 + $0x1320] ss:$16 sps:$4 sm:$0xff]   ;;  %v12103_v42 = vld [vmem:[#allocation7 + $0x1328] ss:$16 sps:$4 sm:$0xff]  }
 0x55c   : > { %6996 = vmatprep.subr.bf16.mxu1 %v12042_v46  ;;  %7037 = vmatprep.subr.bf16.mxu0 %v12045_v2  ;;  %v12111_v38 = vld [vmem:[#allocation7 + $0x134c] ss:$16 sps:$4 sm:$0xff]   ;;  %v12106_v46 = vld [vmem:[#allocation7 + $0x1340] ss:$16 sps:$4 sm:$0xff]   ;;  %v12109_v2 = vld [vmem:[#allocation7 + $0x1348] ss:$16 sps:$4 sm:$0xff]  }
 0x55f   : > { %6997 = vmatpush1.bf16.msra.mxu1 %v12040_v43  ;;  %7038 = vmatpush1.bf16.msra.mxu0 %v12043_v48  ;;  %v12114_v43 = vld [vmem:[#allocation7 + $0x1364] ss:$16 sps:$4 sm:$0xff]   ;;  %v12117_v48 = vld [vmem:[#allocation7 + $0x136c] ss:$16 sps:$4 sm:$0xff]  }
 0x560   : > { %7264 = vmatprep.subr.bf16.mxu1 %v12048_v49  ;;  %7305 = vmatprep.subr.bf16.mxu0 %v12051_v13  ;;  %v12112_v49 = vld [vmem:[#allocation7 + $0x1360] ss:$16 sps:$4 sm:$0xff]   ;;  %v12115_v13 = vld [vmem:[#allocation7 + $0x1368] ss:$16 sps:$4 sm:$0xff]  }
 0x562   : > { %7015 = vmatmul.mubr.bf16.vlgmr.msra.gmra.mrb[128].mxu1 %v13507_v56  ;;  %7056 = vmatmul.mubr.bf16.vlgmr.msra.gmra.mrb[132].mxu0 %v13507_v56 }
 0x563   : > { %7265 = vmatpush1.bf16.msra.mxu1 %v12046_v50  ;;  %7306 = vmatpush1.bf16.msra.mxu0 %v12049_v52  ;;  %v12120_v50 = vld [vmem:[#allocation7 + $0x1384] ss:$16 sps:$4 sm:$0xff]   ;;  %v12123_v52 = vld [vmem:[#allocation7 + $0x138c] ss:$16 sps:$4 sm:$0xff]  }
 0x564   : > { %7266 = vmatprep.subr.bf16.mxu1 %v12054_v45  ;;  %7307 = vmatprep.subr.bf16.mxu0 %v12057_v55  ;;  %v12118_v45 = vld [vmem:[#allocation7 + $0x1380] ss:$16 sps:$4 sm:$0xff]   ;;  %v12121_v55 = vld [vmem:[#allocation7 + $0x1388] ss:$16 sps:$4 sm:$0xff]  }
 0x565   : > { %7296 = vmatprep.mubr.bf16.mxu1 %v12709_v0  ;;  %7337 = vmatprep.mubr.bf16.mxu0 %v12709_v0 }
 0x567   : > { %7267 = vmatpush1.bf16.msra.mxu1 %v12052_v58  ;;  %7308 = vmatpush1.bf16.msra.mxu0 %v12055_v60  ;;  %v12126_v58 = vld [vmem:[#allocation7 + $0x13a4] ss:$16 sps:$4 sm:$0xff]   ;;  %v12129_v60 = vld [vmem:[#allocation7 + $0x13ac] ss:$16 sps:$4 sm:$0xff]  }
 0x568   : > { %7268 = vmatprep.subr.bf16.mxu1 %v12060_v62  ;;  %7309 = vmatprep.subr.bf16.mxu0 %v12063_v63  ;;  %v12124_v62 = vld [vmem:[#allocation7 + $0x13a0] ss:$16 sps:$4 sm:$0xff]   ;;  %v12127_v63 = vld [vmem:[#allocation7 + $0x13a8] ss:$16 sps:$4 sm:$0xff]  }
 0x56b   : > { %7269 = vmatpush1.bf16.msra.mxu1 %v12058_v51  ;;  %7310 = vmatpush1.bf16.msra.mxu0 %v12061_v1  ;;  %v12132_v51 = vld [vmem:[#allocation7 + $0x13c4] ss:$16 sps:$4 sm:$0xff]   ;;  %v12135_v1 = vld [vmem:[#allocation7 + $0x13cc] ss:$16 sps:$4 sm:$0xff]  }
 0x56c   : > { %7270 = vmatprep.subr.bf16.mxu1 %v12066_v53  ;;  %7311 = vmatprep.subr.bf16.mxu0 %v12069_v3 }
 0x56f   : > { %7271 = vmatpush1.bf16.msra.mxu1 %v12064_v5  ;;  %7312 = vmatpush1.bf16.msra.mxu0 %v12067_v4 }
 0x570   : > { %7272 = vmatprep.subr.bf16.mxu1 %v12072_v6  ;;  %7313 = vmatprep.subr.bf16.mxu0 %v12075_v7 }
 0x573   : > { %7273 = vmatpush1.bf16.msra.mxu1 %v12070_v33  ;;  %7314 = vmatpush1.bf16.msra.mxu0 %v12073_v9 }
 0x574   : > { %7274 = vmatprep.subr.bf16.mxu1 %v12078_v14  ;;  %7315 = vmatprep.subr.bf16.mxu0 %v12081_v11 }
 0x575   : > { %v5330_v16 = vpop.f32.mrb[104].mxu1  ;;  %v5371_v28 = vpop.f32.mrb[108].mxu0 }
 0x576   : > { %v13514_v17 = vadd.f32 %v5330_v16, %v13495_v39  ;;  %v13517_v18 = vadd.f32 %v5371_v28, %v13498_v22  ;;  %v5332_v54 = vpop.f32.mrb[105].mxu1  ;;  %v5373_v19 = vpop.f32.mrb[109].mxu0  ;;  %v12091_v39 = vld [vmem:[#allocation7 + $0x12e8] ss:$16 sps:$4 sm:$0xff]   ;;  %v12096_v22 = vld [vmem:[#allocation7 + $0x1304] ss:$16 sps:$4 sm:$0xff]  }
 0x577   : > { %v13520_v20 = vadd.f32 %v5332_v54, %v13501_v8  ;;  %v13523_v21 = vadd.f32 %v5373_v19, %v13504_v25  ;;  %v5334_v23 = vpop.f32.mrb[106].mxu1  ;;  %v5375_v24 = vpop.f32.mrb[110].mxu0  ;;  %7275 = vmatpush1.bf16.msra.mxu1 %v12076_v57  ;;  %7316 = vmatpush1.bf16.msra.mxu0 %v12079_v10  ;;  %v12097_v8 = vld [vmem:[#allocation7 + $0x1308] ss:$16 sps:$4 sm:$0xff]   ;;  %v7102_v25 = vrot.slane %v13333_v35, 1 }
 0x578   : > { %v5335_v27 = vpop.f32.mrb[107].mxu1  ;;  %v5376_v29 = vpop.f32.mrb[111].mxu0  ;;  %7276 = vmatprep.subr.bf16.mxu1 %v12084_v12  ;;  %7317 = vmatprep.subr.bf16.mxu0 %v12087_v40  ;;  %v12130_v57 = vld [vmem:[#allocation7 + $0x13c0] ss:$16 sps:$4 sm:$0xff]   ;;  %v12133_v10 = vld [vmem:[#allocation7 + $0x13c8] ss:$16 sps:$4 sm:$0xff]  }
 0x579   : > { %v12138_v16 = vld [vmem:[#allocation7 + $0x13e4] ss:$16 sps:$4 sm:$0xff]   ;;  %v12141_v28 = vld [vmem:[#allocation7 + $0x13ec] ss:$16 sps:$4 sm:$0xff]   ;;  %v7383_v23 = vrot.slane %v13507_v56, 1 }
 0x57a   : > { %v12144_v54 = vld [vmem:[#allocation7 + $0x1404] ss:$16 sps:$4 sm:$0xff]   ;;  %v12147_v19 = vld [vmem:[#allocation7 + $0x140c] ss:$16 sps:$4 sm:$0xff]   ;;  %v12151_v27 = vld [vmem:[#allocation7 + $0x1428] ss:$16 sps:$4 sm:$0xff]  }
 0x57b   : > { %7277 = vmatpush1.bf16.msra.mxu1 %v12082_v26  ;;  %7318 = vmatpush1.bf16.msra.mxu0 %v12085_v15  ;;  %v12150_v24 = vld [vmem:[#allocation7 + $0x1424] ss:$16 sps:$4 sm:$0xff]   ;;  %v12153_v26 = vld [vmem:[#allocation7 + $0x142c] ss:$16 sps:$4 sm:$0xff]   ;;  %v12148_v15 = vld [vmem:[#allocation7 + $0x1420] ss:$16 sps:$4 sm:$0xff]  }
 0x57c   : > { %7278 = vmatprep.subr.bf16.mxu1 %v12090_v37  ;;  %7319 = vmatprep.subr.bf16.mxu0 %v12093_v59  ;;  %v12156_v29 = vld [vmem:[#allocation7 + $0x1444] ss:$16 sps:$4 sm:$0xff]   ;;  %v12159_v37 = vld [vmem:[#allocation7 + $0x144c] ss:$16 sps:$4 sm:$0xff]   ;;  %v12154_v59 = vld [vmem:[#allocation7 + $0x1440] ss:$16 sps:$4 sm:$0xff]  }
 0x57f   : > { %7279 = vmatpush1.bf16.msra.mxu1 %v12088_v32  ;;  %7320 = vmatpush1.bf16.msra.mxu0 %v12091_v39  ;;  %v12157_v32 = vld [vmem:[#allocation7 + $0x1448] ss:$16 sps:$4 sm:$0xff]   ;;  %v12162_v39 = vld [vmem:[#allocation7 + $0x1464] ss:$16 sps:$4 sm:$0xff]  }
 0x580   : > { %7545 = vmatprep.subr.bf16.mxu1 %v12096_v22  ;;  %7586 = vmatprep.subr.bf16.mxu0 %v12099_v34  ;;  %v12165_v22 = vld [vmem:[#allocation7 + $0x146c] ss:$16 sps:$4 sm:$0xff]   ;;  %v12160_v34 = vld [vmem:[#allocation7 + $0x1460] ss:$16 sps:$4 sm:$0xff]  }
 0x582   : > { %7297 = vmatmul.mubr.bf16.vlgmr.msra.gmra.mrb[132].mxu1 %v7102_v25  ;;  %7338 = vmatmul.mubr.bf16.vlgmr.msra.gmra.mrb[136].mxu0 %v7102_v25  ;;  %v12171_v25 = vld [vmem:[#allocation7 + $0x148c] ss:$16 sps:$4 sm:$0xff]  }
 0x583   : > { %7546 = vmatpush1.bf16.msra.mxu1 %v12094_v30  ;;  %7587 = vmatpush1.bf16.msra.mxu0 %v12097_v8  ;;  %v12163_v30 = vld [vmem:[#allocation7 + $0x1468] ss:$16 sps:$4 sm:$0xff]   ;;  %v12168_v8 = vld [vmem:[#allocation7 + $0x1484] ss:$16 sps:$4 sm:$0xff]  }
 0x584   : > { %7547 = vmatprep.subr.bf16.mxu1 %v12102_v31  ;;  %7588 = vmatprep.subr.bf16.mxu0 %v12105_v36  ;;  %v12166_v31 = vld [vmem:[#allocation7 + $0x1480] ss:$16 sps:$4 sm:$0xff]   ;;  %v12169_v36 = vld [vmem:[#allocation7 + $0x1488] ss:$16 sps:$4 sm:$0xff]  }
 0x585   : > { %7577 = vmatprep.mubr.bf16.mxu1 %v12709_v0  ;;  %7618 = vmatprep.mubr.bf16.mxu0 %v12709_v0 }
 0x587   : > { %7548 = vmatpush1.bf16.msra.mxu1 %v12100_v41  ;;  %7589 = vmatpush1.bf16.msra.mxu0 %v12103_v42  ;;  %v12174_v41 = vld [vmem:[#allocation7 + $0x14a4] ss:$16 sps:$4 sm:$0xff]   ;;  %v12177_v42 = vld [vmem:[#allocation7 + $0x14ac] ss:$16 sps:$4 sm:$0xff]  }
 0x588   : > { %7549 = vmatprep.subr.bf16.mxu1 %v12108_v44  ;;  %7590 = vmatprep.subr.bf16.mxu0 %v12111_v38  ;;  %v12172_v44 = vld [vmem:[#allocation7 + $0x14a0] ss:$16 sps:$4 sm:$0xff]   ;;  %v12175_v38 = vld [vmem:[#allocation7 + $0x14a8] ss:$16 sps:$4 sm:$0xff]  }
 0x58b   : > { %7550 = vmatpush1.bf16.msra.mxu1 %v12106_v46  ;;  %7591 = vmatpush1.bf16.msra.mxu0 %v12109_v2  ;;  %v12180_v46 = vld [vmem:[#allocation7 + $0x14c4] ss:$16 sps:$4 sm:$0xff]   ;;  %v12183_v2 = vld [vmem:[#allocation7 + $0x14cc] ss:$16 sps:$4 sm:$0xff]  }
 0x58c   : > { %7551 = vmatprep.subr.bf16.mxu1 %v12114_v43  ;;  %7592 = vmatprep.subr.bf16.mxu0 %v12117_v48 }
 0x58f   : > { %7552 = vmatpush1.bf16.msra.mxu1 %v12112_v49  ;;  %7593 = vmatpush1.bf16.msra.mxu0 %v12115_v13 }
 0x590   : > { %7553 = vmatprep.subr.bf16.mxu1 %v12120_v50  ;;  %7594 = vmatprep.subr.bf16.mxu0 %v12123_v52 }
 0x593   : > { %7554 = vmatpush1.bf16.msra.mxu1 %v12118_v45  ;;  %7595 = vmatpush1.bf16.msra.mxu0 %v12121_v55 }
 0x594   : > { %7555 = vmatprep.subr.bf16.mxu1 %v12126_v58  ;;  %7596 = vmatprep.subr.bf16.mxu0 %v12129_v60 }
 0x595   : > { %v5611_v53 = vpop.f32.mrb[108].mxu1  ;;  %v5652_v3 = vpop.f32.mrb[112].mxu0 }
 0x596   : > { %v13529_v5 = vadd.f32 %v5611_v53, %v13514_v17  ;;  %v13532_v4 = vadd.f32 %v5652_v3, %v13517_v18  ;;  %v5613_v6 = vpop.f32.mrb[109].mxu1  ;;  %v5654_v7 = vpop.f32.mrb[113].mxu0  ;;  %v12136_v17 = vld [vmem:[#allocation7 + $0x13e0] ss:$16 sps:$4 sm:$0xff]   ;;  %v12139_v18 = vld [vmem:[#allocation7 + $0x13e8] ss:$16 sps:$4 sm:$0xff]  }
 0x597   : > { %v13535_v33 = vadd.f32 %v5613_v6, %v13520_v20  ;;  %v13538_v9 = vadd.f32 %v5654_v7, %v13523_v21  ;;  %v5615_v14 = vpop.f32.mrb[110].mxu1  ;;  %v5656_v11 = vpop.f32.mrb[114].mxu0  ;;  %7556 = vmatpush1.bf16.msra.mxu1 %v12124_v62  ;;  %7597 = vmatpush1.bf16.msra.mxu0 %v12127_v63  ;;  %v12142_v20 = vld [vmem:[#allocation7 + $0x1400] ss:$16 sps:$4 sm:$0xff]   ;;  %v12145_v21 = vld [vmem:[#allocation7 + $0x1408] ss:$16 sps:$4 sm:$0xff]  }
 0x598   : > { %v5616_v12 = vpop.f32.mrb[111].mxu1  ;;  %v5657_v40 = vpop.f32.mrb[115].mxu0  ;;  %7557 = vmatprep.subr.bf16.mxu1 %v12132_v51  ;;  %7598 = vmatprep.subr.bf16.mxu0 %v12135_v1  ;;  %v12178_v62 = vld [vmem:[#allocation7 + $0x14c0] ss:$16 sps:$4 sm:$0xff]   ;;  %v12181_v63 = vld [vmem:[#allocation7 + $0x14c8] ss:$16 sps:$4 sm:$0xff]  }
 0x599   : > { %v12186_v53 = vld [vmem:[#allocation7 + $0x14e4] ss:$16 sps:$4 sm:$0xff]   ;;  %v12189_v3 = vld [vmem:[#allocation7 + $0x14ec] ss:$16 sps:$4 sm:$0xff]   ;;  %v7664_v14 = vrot.slane %v13333_v35, 2 }
 0x59a   : > { %v12192_v6 = vld [vmem:[#allocation7 + $0x1504] ss:$16 sps:$4 sm:$0xff]   ;;  %v12195_v7 = vld [vmem:[#allocation7 + $0x150c] ss:$16 sps:$4 sm:$0xff]   ;;  %v12199_v12 = vld [vmem:[#allocation7 + $0x1528] ss:$16 sps:$4 sm:$0xff]  }
 0x59b   : > { %7558 = vmatpush1.bf16.msra.mxu1 %v12130_v57  ;;  %7599 = vmatpush1.bf16.msra.mxu0 %v12133_v10  ;;  %v12198_v11 = vld [vmem:[#allocation7 + $0x1524] ss:$16 sps:$4 sm:$0xff]   ;;  %v12201_v57 = vld [vmem:[#allocation7 + $0x152c] ss:$16 sps:$4 sm:$0xff]   ;;  %v12196_v10 = vld [vmem:[#allocation7 + $0x1520] ss:$16 sps:$4 sm:$0xff]  }
 0x59c   : > { %7559 = vmatprep.subr.bf16.mxu1 %v12138_v16  ;;  %7600 = vmatprep.subr.bf16.mxu0 %v12141_v28  ;;  %v12204_v40 = vld [vmem:[#allocation7 + $0x1544] ss:$16 sps:$4 sm:$0xff]   ;;  %v12207_v16 = vld [vmem:[#allocation7 + $0x154c] ss:$16 sps:$4 sm:$0xff]   ;;  %v12202_v28 = vld [vmem:[#allocation7 + $0x1540] ss:$16 sps:$4 sm:$0xff]  }
 0x59f   : > { %7560 = vmatpush1.bf16.msra.mxu1 %v12136_v17  ;;  %7601 = vmatpush1.bf16.msra.mxu0 %v12139_v18  ;;  %v12205_v17 = vld [vmem:[#allocation7 + $0x1548] ss:$16 sps:$4 sm:$0xff]   ;;  %v12210_v18 = vld [vmem:[#allocation7 + $0x1564] ss:$16 sps:$4 sm:$0xff]  }
 0x5a0   : > { %7826 = vmatprep.subr.bf16.mxu1 %v12144_v54  ;;  %7867 = vmatprep.subr.bf16.mxu0 %v12147_v19  ;;  %v12213_v54 = vld [vmem:[#allocation7 + $0x156c] ss:$16 sps:$4 sm:$0xff]   ;;  %v12208_v19 = vld [vmem:[#allocation7 + $0x1560] ss:$16 sps:$4 sm:$0xff]  }
 0x5a2   : > { %7578 = vmatmul.mubr.bf16.vlgmr.msra.gmra.mrb[136].mxu1 %v7383_v23  ;;  %7619 = vmatmul.mubr.bf16.vlgmr.msra.gmra.mrb[140].mxu0 %v7383_v23  ;;  %v12219_v23 = vld [vmem:[#allocation7 + $0x158c] ss:$16 sps:$4 sm:$0xff]  }
 0x5a3   : > { %7827 = vmatpush1.bf16.msra.mxu1 %v12142_v20  ;;  %7868 = vmatpush1.bf16.msra.mxu0 %v12145_v21  ;;  %v12211_v20 = vld [vmem:[#allocation7 + $0x1568] ss:$16 sps:$4 sm:$0xff]   ;;  %v12216_v21 = vld [vmem:[#allocation7 + $0x1584] ss:$16 sps:$4 sm:$0xff]  }
 0x5a4   : > { %7828 = vmatprep.subr.bf16.mxu1 %v12150_v24  ;;  %7869 = vmatprep.subr.bf16.mxu0 %v12153_v26  ;;  %v12214_v24 = vld [vmem:[#allocation7 + $0x1580] ss:$16 sps:$4 sm:$0xff]   ;;  %v12217_v26 = vld [vmem:[#allocation7 + $0x1588] ss:$16 sps:$4 sm:$0xff]  }
 0x5a5   : > { %7858 = vmatprep.mubr.bf16.mxu1 %v12709_v0  ;;  %7899 = vmatprep.mubr.bf16.mxu0 %v12709_v0 }
 0x5a7   : > { %7829 = vmatpush1.bf16.msra.mxu1 %v12148_v15  ;;  %7870 = vmatpush1.bf16.msra.mxu0 %v12151_v27  ;;  %v12222_v15 = vld [vmem:[#allocation7 + $0x15a4] ss:$16 sps:$4 sm:$0xff]   ;;  %v12225_v27 = vld [vmem:[#allocation7 + $0x15ac] ss:$16 sps:$4 sm:$0xff]  }
 0x5a8   : > { %7830 = vmatprep.subr.bf16.mxu1 %v12156_v29  ;;  %7871 = vmatprep.subr.bf16.mxu0 %v12159_v37  ;;  %v12220_v29 = vld [vmem:[#allocation7 + $0x15a0] ss:$16 sps:$4 sm:$0xff]   ;;  %v12223_v37 = vld [vmem:[#allocation7 + $0x15a8] ss:$16 sps:$4 sm:$0xff]  }
 0x5ab   : > { %7831 = vmatpush1.bf16.msra.mxu1 %v12154_v59  ;;  %7872 = vmatpush1.bf16.msra.mxu0 %v12157_v32  ;;  %v12228_v59 = vld [vmem:[#allocation7 + $0x15c4] ss:$16 sps:$4 sm:$0xff]   ;;  %v12231_v32 = vld [vmem:[#allocation7 + $0x15cc] ss:$16 sps:$4 sm:$0xff]  }
 0x5ac   : > { %7832 = vmatprep.subr.bf16.mxu1 %v12162_v39  ;;  %7873 = vmatprep.subr.bf16.mxu0 %v12165_v22 }
 0x5af   : > { %7833 = vmatpush1.bf16.msra.mxu1 %v12160_v34  ;;  %7874 = vmatpush1.bf16.msra.mxu0 %v12163_v30 }
 0x5b0   : > { %7834 = vmatprep.subr.bf16.mxu1 %v12168_v8  ;;  %7875 = vmatprep.subr.bf16.mxu0 %v12171_v25 }
 0x5b3   : > { %7835 = vmatpush1.bf16.msra.mxu1 %v12166_v31  ;;  %7876 = vmatpush1.bf16.msra.mxu0 %v12169_v36 }
 0x5b4   : > { %7836 = vmatprep.subr.bf16.mxu1 %v12174_v41  ;;  %7877 = vmatprep.subr.bf16.mxu0 %v12177_v42 }
 0x5b5   : > { %v5892_v43 = vpop.f32.mrb[112].mxu1  ;;  %v5933_v48 = vpop.f32.mrb[116].mxu0 }
 0x5b6   : > { %v13544_v49 = vadd.f32 %v5892_v43, %v13529_v5  ;;  %v13547_v13 = vadd.f32 %v5933_v48, %v13532_v4  ;;  %v5894_v50 = vpop.f32.mrb[113].mxu1  ;;  %v5935_v52 = vpop.f32.mrb[117].mxu0  ;;  %v12184_v5 = vld [vmem:[#allocation7 + $0x14e0] ss:$16 sps:$4 sm:$0xff]   ;;  %v12187_v4 = vld [vmem:[#allocation7 + $0x14e8] ss:$16 sps:$4 sm:$0xff]  }
 0x5b7   : > { %v13550_v45 = vadd.f32 %v5894_v50, %v13535_v33  ;;  %v13553_v55 = vadd.f32 %v5935_v52, %v13538_v9  ;;  %v5896_v58 = vpop.f32.mrb[114].mxu1  ;;  %v5937_v60 = vpop.f32.mrb[118].mxu0  ;;  %7837 = vmatpush1.bf16.msra.mxu1 %v12172_v44  ;;  %7878 = vmatpush1.bf16.msra.mxu0 %v12175_v38  ;;  %v12190_v33 = vld [vmem:[#allocation7 + $0x1500] ss:$16 sps:$4 sm:$0xff]   ;;  %v12193_v9 = vld [vmem:[#allocation7 + $0x1508] ss:$16 sps:$4 sm:$0xff]  }
 0x5b8   : > { %v5897_v51 = vpop.f32.mrb[115].mxu1  ;;  %v5938_v1 = vpop.f32.mrb[119].mxu0  ;;  %7838 = vmatprep.subr.bf16.mxu1 %v12180_v46  ;;  %7879 = vmatprep.subr.bf16.mxu0 %v12183_v2  ;;  %v12226_v44 = vld [vmem:[#allocation7 + $0x15c0] ss:$16 sps:$4 sm:$0xff]   ;;  %v12229_v38 = vld [vmem:[#allocation7 + $0x15c8] ss:$16 sps:$4 sm:$0xff]  }
 0x5b9   : > { %v12234_v43 = vld [vmem:[#allocation7 + $0x15e4] ss:$16 sps:$4 sm:$0xff]   ;;  %v12237_v48 = vld [vmem:[#allocation7 + $0x15ec] ss:$16 sps:$4 sm:$0xff]   ;;  %v7945_v58 = vrot.slane %v13507_v56, 2 }
 0x5ba   : > { %v12240_v50 = vld [vmem:[#allocation7 + $0x1604] ss:$16 sps:$4 sm:$0xff]   ;;  %v12243_v52 = vld [vmem:[#allocation7 + $0x160c] ss:$16 sps:$4 sm:$0xff]   ;;  %v12247_v51 = vld [vmem:[#allocation7 + $0x1628] ss:$16 sps:$4 sm:$0xff]  }
 0x5bb   : > { %7839 = vmatpush1.bf16.msra.mxu1 %v12178_v62  ;;  %7880 = vmatpush1.bf16.msra.mxu0 %v12181_v63  ;;  %v12246_v60 = vld [vmem:[#allocation7 + $0x1624] ss:$16 sps:$4 sm:$0xff]   ;;  %v12249_v62 = vld [vmem:[#allocation7 + $0x162c] ss:$16 sps:$4 sm:$0xff]   ;;  %v12244_v63 = vld [vmem:[#allocation7 + $0x1620] ss:$16 sps:$4 sm:$0xff]  }
 0x5bc   : > { %7840 = vmatprep.subr.bf16.mxu1 %v12186_v53  ;;  %7881 = vmatprep.subr.bf16.mxu0 %v12189_v3  ;;  %v12252_v1 = vld [vmem:[#allocation7 + $0x1644] ss:$16 sps:$4 sm:$0xff]   ;;  %v12255_v53 = vld [vmem:[#allocation7 + $0x164c] ss:$16 sps:$4 sm:$0xff]   ;;  %v12250_v3 = vld [vmem:[#allocation7 + $0x1640] ss:$16 sps:$4 sm:$0xff]  }
 0x5bf   : > { %7841 = vmatpush1.bf16.msra.mxu1 %v12184_v5  ;;  %7882 = vmatpush1.bf16.msra.mxu0 %v12187_v4  ;;  %v12253_v5 = vld [vmem:[#allocation7 + $0x1648] ss:$16 sps:$4 sm:$0xff]   ;;  %v12258_v4 = vld [vmem:[#allocation7 + $0x1664] ss:$16 sps:$4 sm:$0xff]  }
 0x5c0   : > { %8107 = vmatprep.subr.bf16.mxu1 %v12192_v6  ;;  %8148 = vmatprep.subr.bf16.mxu0 %v12195_v7  ;;  %v12261_v6 = vld [vmem:[#allocation7 + $0x166c] ss:$16 sps:$4 sm:$0xff]   ;;  %v12256_v7 = vld [vmem:[#allocation7 + $0x1660] ss:$16 sps:$4 sm:$0xff]  }
 0x5c2   : > { %7859 = vmatmul.mubr.bf16.vlgmr.msra.gmra.mrb[140].mxu1 %v7664_v14  ;;  %7900 = vmatmul.mubr.bf16.vlgmr.msra.gmra.mrb[144].mxu0 %v7664_v14  ;;  %v12267_v14 = vld [vmem:[#allocation7 + $0x168c] ss:$16 sps:$4 sm:$0xff]  }
 0x5c3   : > { %8108 = vmatpush1.bf16.msra.mxu1 %v12190_v33  ;;  %8149 = vmatpush1.bf16.msra.mxu0 %v12193_v9  ;;  %v12259_v33 = vld [vmem:[#allocation7 + $0x1668] ss:$16 sps:$4 sm:$0xff]   ;;  %v12264_v9 = vld [vmem:[#allocation7 + $0x1684] ss:$16 sps:$4 sm:$0xff]  }
 0x5c4   : > { %8109 = vmatprep.subr.bf16.mxu1 %v12198_v11  ;;  %8150 = vmatprep.subr.bf16.mxu0 %v12201_v57  ;;  %v12262_v11 = vld [vmem:[#allocation7 + $0x1680] ss:$16 sps:$4 sm:$0xff]   ;;  %v12265_v57 = vld [vmem:[#allocation7 + $0x1688] ss:$16 sps:$4 sm:$0xff]  }
 0x5c5   : > { %8139 = vmatprep.mubr.bf16.mxu1 %v12709_v0  ;;  %8180 = vmatprep.mubr.bf16.mxu0 %v12709_v0 }
 0x5c7   : > { %8110 = vmatpush1.bf16.msra.mxu1 %v12196_v10  ;;  %8151 = vmatpush1.bf16.msra.mxu0 %v12199_v12  ;;  %v12270_v10 = vld [vmem:[#allocation7 + $0x16a4] ss:$16 sps:$4 sm:$0xff]   ;;  %v12273_v12 = vld [vmem:[#allocation7 + $0x16ac] ss:$16 sps:$4 sm:$0xff]  }
 0x5c8   : > { %8111 = vmatprep.subr.bf16.mxu1 %v12204_v40  ;;  %8152 = vmatprep.subr.bf16.mxu0 %v12207_v16  ;;  %v12268_v40 = vld [vmem:[#allocation7 + $0x16a0] ss:$16 sps:$4 sm:$0xff]   ;;  %v12271_v16 = vld [vmem:[#allocation7 + $0x16a8] ss:$16 sps:$4 sm:$0xff]  }
 0x5cb   : > { %8112 = vmatpush1.bf16.msra.mxu1 %v12202_v28  ;;  %8153 = vmatpush1.bf16.msra.mxu0 %v12205_v17  ;;  %v12276_v28 = vld [vmem:[#allocation7 + $0x16c4] ss:$16 sps:$4 sm:$0xff]   ;;  %v12279_v17 = vld [vmem:[#allocation7 + $0x16cc] ss:$16 sps:$4 sm:$0xff]  }
 0x5cc   : > { %8113 = vmatprep.subr.bf16.mxu1 %v12210_v18  ;;  %8154 = vmatprep.subr.bf16.mxu0 %v12213_v54 }
 0x5cf   : > { %8114 = vmatpush1.bf16.msra.mxu1 %v12208_v19  ;;  %8155 = vmatpush1.bf16.msra.mxu0 %v12211_v20 }
 0x5d0   : > { %8115 = vmatprep.subr.bf16.mxu1 %v12216_v21  ;;  %8156 = vmatprep.subr.bf16.mxu0 %v12219_v23 }
 0x5d3   : > { %8116 = vmatpush1.bf16.msra.mxu1 %v12214_v24  ;;  %8157 = vmatpush1.bf16.msra.mxu0 %v12217_v26 }
 0x5d4   : > { %8117 = vmatprep.subr.bf16.mxu1 %v12222_v15  ;;  %8158 = vmatprep.subr.bf16.mxu0 %v12225_v27 }
 0x5d5   : > { %v6173_v39 = vpop.f32.mrb[116].mxu1  ;;  %v6214_v22 = vpop.f32.mrb[120].mxu0 }
 0x5d6   : > { %v13559_v34 = vadd.f32 %v6173_v39, %v13544_v49  ;;  %v13562_v30 = vadd.f32 %v6214_v22, %v13547_v13  ;;  %v6175_v8 = vpop.f32.mrb[117].mxu1  ;;  %v6216_v25 = vpop.f32.mrb[121].mxu0  ;;  %v12232_v49 = vld [vmem:[#allocation7 + $0x15e0] ss:$16 sps:$4 sm:$0xff]   ;;  %v12235_v13 = vld [vmem:[#allocation7 + $0x15e8] ss:$16 sps:$4 sm:$0xff]  }
 0x5d7   : > { %v13565_v31 = vadd.f32 %v6175_v8, %v13550_v45  ;;  %v13568_v36 = vadd.f32 %v6216_v25, %v13553_v55  ;;  %v6177_v41 = vpop.f32.mrb[118].mxu1  ;;  %v6218_v42 = vpop.f32.mrb[122].mxu0  ;;  %8118 = vmatpush1.bf16.msra.mxu1 %v12220_v29  ;;  %8159 = vmatpush1.bf16.msra.mxu0 %v12223_v37  ;;  %v12238_v45 = vld [vmem:[#allocation7 + $0x1600] ss:$16 sps:$4 sm:$0xff]   ;;  %v12241_v55 = vld [vmem:[#allocation7 + $0x1608] ss:$16 sps:$4 sm:$0xff]  }
 0x5d8   : > { %v6178_v46 = vpop.f32.mrb[119].mxu1  ;;  %v6219_v2 = vpop.f32.mrb[123].mxu0  ;;  %8119 = vmatprep.subr.bf16.mxu1 %v12228_v59  ;;  %8160 = vmatprep.subr.bf16.mxu0 %v12231_v32  ;;  %v12274_v29 = vld [vmem:[#allocation7 + $0x16c0] ss:$16 sps:$4 sm:$0xff]   ;;  %v12277_v37 = vld [vmem:[#allocation7 + $0x16c8] ss:$16 sps:$4 sm:$0xff]  }
 0x5d9   : > { %v12282_v39 = vld [vmem:[#allocation7 + $0x16e4] ss:$16 sps:$4 sm:$0xff]   ;;  %v12285_v22 = vld [vmem:[#allocation7 + $0x16ec] ss:$16 sps:$4 sm:$0xff]   ;;  %v8226_v41 = vrot.slane %v13333_v35, 3 }
 0x5da   : > { %v12288_v8 = vld [vmem:[#allocation7 + $0x1704] ss:$16 sps:$4 sm:$0xff]   ;;  %v12291_v25 = vld [vmem:[#allocation7 + $0x170c] ss:$16 sps:$4 sm:$0xff]   ;;  %v12295_v46 = vld [vmem:[#allocation7 + $0x1728] ss:$16 sps:$4 sm:$0xff]  }
 0x5db   : > { %8120 = vmatpush1.bf16.msra.mxu1 %v12226_v44  ;;  %8161 = vmatpush1.bf16.msra.mxu0 %v12229_v38  ;;  %v12294_v42 = vld [vmem:[#allocation7 + $0x1724] ss:$16 sps:$4 sm:$0xff]   ;;  %v12297_v44 = vld [vmem:[#allocation7 + $0x172c] ss:$16 sps:$4 sm:$0xff]   ;;  %v12292_v38 = vld [vmem:[#allocation7 + $0x1720] ss:$16 sps:$4 sm:$0xff]  }
 0x5dc   : > { %8121 = vmatprep.subr.bf16.mxu1 %v12234_v43  ;;  %8162 = vmatprep.subr.bf16.mxu0 %v12237_v48  ;;  %v12300_v2 = vld [vmem:[#allocation7 + $0x1744] ss:$16 sps:$4 sm:$0xff]   ;;  %v12303_v43 = vld [vmem:[#allocation7 + $0x174c] ss:$16 sps:$4 sm:$0xff]   ;;  %v12298_v48 = vld [vmem:[#allocation7 + $0x1740] ss:$16 sps:$4 sm:$0xff]  }
 0x5df   : > { %8122 = vmatpush1.bf16.msra.mxu1 %v12232_v49  ;;  %8163 = vmatpush1.bf16.msra.mxu0 %v12235_v13  ;;  %v12301_v49 = vld [vmem:[#allocation7 + $0x1748] ss:$16 sps:$4 sm:$0xff]   ;;  %v12306_v13 = vld [vmem:[#allocation7 + $0x1764] ss:$16 sps:$4 sm:$0xff]  }
 0x5e0   : > { %8388 = vmatprep.subr.bf16.mxu1 %v12240_v50  ;;  %8429 = vmatprep.subr.bf16.mxu0 %v12243_v52  ;;  %v12309_v50 = vld [vmem:[#allocation7 + $0x176c] ss:$16 sps:$4 sm:$0xff]   ;;  %v12304_v52 = vld [vmem:[#allocation7 + $0x1760] ss:$16 sps:$4 sm:$0xff]  }
 0x5e2   : > { %8140 = vmatmul.mubr.bf16.vlgmr.msra.gmra.mrb[144].mxu1 %v7945_v58  ;;  %8181 = vmatmul.mubr.bf16.vlgmr.msra.gmra.mrb[148].mxu0 %v7945_v58  ;;  %v12315_v58 = vld [vmem:[#allocation7 + $0x178c] ss:$16 sps:$4 sm:$0xff]  }
 0x5e3   : > { %8389 = vmatpush1.bf16.msra.mxu1 %v12238_v45  ;;  %8430 = vmatpush1.bf16.msra.mxu0 %v12241_v55  ;;  %v12307_v45 = vld [vmem:[#allocation7 + $0x1768] ss:$16 sps:$4 sm:$0xff]   ;;  %v12312_v55 = vld [vmem:[#allocation7 + $0x1784] ss:$16 sps:$4 sm:$0xff]  }
 0x5e4   : > { %8390 = vmatprep.subr.bf16.mxu1 %v12246_v60  ;;  %8431 = vmatprep.subr.bf16.mxu0 %v12249_v62  ;;  %v12310_v60 = vld [vmem:[#allocation7 + $0x1780] ss:$16 sps:$4 sm:$0xff]   ;;  %v12313_v62 = vld [vmem:[#allocation7 + $0x1788] ss:$16 sps:$4 sm:$0xff]  }
 0x5e5   : > { %8420 = vmatprep.mubr.bf16.mxu1 %v12709_v0  ;;  %8461 = vmatprep.mubr.bf16.mxu0 %v12709_v0 }
 0x5e7   : > { %8391 = vmatpush1.bf16.msra.mxu1 %v12244_v63  ;;  %8432 = vmatpush1.bf16.msra.mxu0 %v12247_v51  ;;  %v12318_v63 = vld [vmem:[#allocation7 + $0x17a4] ss:$16 sps:$4 sm:$0xff]   ;;  %v12321_v51 = vld [vmem:[#allocation7 + $0x17ac] ss:$16 sps:$4 sm:$0xff]  }
 0x5e8   : > { %8392 = vmatprep.subr.bf16.mxu1 %v12252_v1  ;;  %8433 = vmatprep.subr.bf16.mxu0 %v12255_v53  ;;  %v12316_v1 = vld [vmem:[#allocation7 + $0x17a0] ss:$16 sps:$4 sm:$0xff]   ;;  %v12319_v53 = vld [vmem:[#allocation7 + $0x17a8] ss:$16 sps:$4 sm:$0xff]  }
 0x5eb   : > { %8393 = vmatpush1.bf16.msra.mxu1 %v12250_v3  ;;  %8434 = vmatpush1.bf16.msra.mxu0 %v12253_v5  ;;  %v12324_v3 = vld [vmem:[#allocation7 + $0x17c4] ss:$16 sps:$4 sm:$0xff]   ;;  %v12327_v5 = vld [vmem:[#allocation7 + $0x17cc] ss:$16 sps:$4 sm:$0xff]  }
 0x5ec   : > { %8394 = vmatprep.subr.bf16.mxu1 %v12258_v4  ;;  %8435 = vmatprep.subr.bf16.mxu0 %v12261_v6 }
 0x5ef   : > { %8395 = vmatpush1.bf16.msra.mxu1 %v12256_v7  ;;  %8436 = vmatpush1.bf16.msra.mxu0 %v12259_v33 }
 0x5f0   : > { %8396 = vmatprep.subr.bf16.mxu1 %v12264_v9  ;;  %8437 = vmatprep.subr.bf16.mxu0 %v12267_v14 }
 0x5f3   : > { %8397 = vmatpush1.bf16.msra.mxu1 %v12262_v11  ;;  %8438 = vmatpush1.bf16.msra.mxu0 %v12265_v57 }
 0x5f4   : > { %8398 = vmatprep.subr.bf16.mxu1 %v12270_v10  ;;  %8439 = vmatprep.subr.bf16.mxu0 %v12273_v12 }
 0x5f5   : > { %v6454_v18 = vpop.f32.mrb[120].mxu1  ;;  %v6495_v54 = vpop.f32.mrb[124].mxu0 }
 0x5f6   : > { %v13574_v19 = vadd.f32 %v6454_v18, %v13559_v34  ;;  %v13577_v20 = vadd.f32 %v6495_v54, %v13562_v30  ;;  %v6456_v21 = vpop.f32.mrb[121].mxu1  ;;  %v6497_v23 = vpop.f32.mrb[125].mxu0  ;;  %v12280_v34 = vld [vmem:[#allocation7 + $0x16e0] ss:$16 sps:$4 sm:$0xff]   ;;  %v12283_v30 = vld [vmem:[#allocation7 + $0x16e8] ss:$16 sps:$4 sm:$0xff]  }
 0x5f7   : > { %v13580_v24 = vadd.f32 %v6456_v21, %v13565_v31  ;;  %v13583_v26 = vadd.f32 %v6497_v23, %v13568_v36  ;;  %v6458_v15 = vpop.f32.mrb[122].mxu1  ;;  %v6499_v27 = vpop.f32.mrb[126].mxu0  ;;  %8399 = vmatpush1.bf16.msra.mxu1 %v12268_v40  ;;  %8440 = vmatpush1.bf16.msra.mxu0 %v12271_v16  ;;  %v12286_v31 = vld [vmem:[#allocation7 + $0x1700] ss:$16 sps:$4 sm:$0xff]   ;;  %v12289_v36 = vld [vmem:[#allocation7 + $0x1708] ss:$16 sps:$4 sm:$0xff]  }
 0x5f8   : > { %v6459_v59 = vpop.f32.mrb[123].mxu1  ;;  %v6500_v32 = vpop.f32.mrb[127].mxu0  ;;  %8400 = vmatprep.subr.bf16.mxu1 %v12276_v28  ;;  %8441 = vmatprep.subr.bf16.mxu0 %v12279_v17  ;;  %v12322_v40 = vld [vmem:[#allocation7 + $0x17c0] ss:$16 sps:$4 sm:$0xff]   ;;  %v12325_v16 = vld [vmem:[#allocation7 + $0x17c8] ss:$16 sps:$4 sm:$0xff]  }
 0x5f9   : > { %v12330_v18 = vld [vmem:[#allocation7 + $0x17e4] ss:$16 sps:$4 sm:$0xff]   ;;  %v12333_v54 = vld [vmem:[#allocation7 + $0x17ec] ss:$16 sps:$4 sm:$0xff]   ;;  %v8507_v15 = vrot.slane %v13507_v56, 3 }
 0x5fa   : > { %v12336_v21 = vld [vmem:[#allocation7 + $0x1804] ss:$16 sps:$4 sm:$0xff]   ;;  %v12339_v23 = vld [vmem:[#allocation7 + $0x180c] ss:$16 sps:$4 sm:$0xff]   ;;  %v12343_v59 = vld [vmem:[#allocation7 + $0x1828] ss:$16 sps:$4 sm:$0xff]  }
 0x5fb   : > { %8401 = vmatpush1.bf16.msra.mxu1 %v12274_v29  ;;  %8442 = vmatpush1.bf16.msra.mxu0 %v12277_v37  ;;  %v12342_v27 = vld [vmem:[#allocation7 + $0x1824] ss:$16 sps:$4 sm:$0xff]   ;;  %v12345_v29 = vld [vmem:[#allocation7 + $0x182c] ss:$16 sps:$4 sm:$0xff]   ;;  %v12340_v37 = vld [vmem:[#allocation7 + $0x1820] ss:$16 sps:$4 sm:$0xff]  }
 0x5fc   : > { %8402 = vmatprep.subr.bf16.mxu1 %v12282_v39  ;;  %8443 = vmatprep.subr.bf16.mxu0 %v12285_v22  ;;  %v12348_v32 = vld [vmem:[#allocation7 + $0x1844] ss:$16 sps:$4 sm:$0xff]   ;;  %v12351_v39 = vld [vmem:[#allocation7 + $0x184c] ss:$16 sps:$4 sm:$0xff]   ;;  %v12346_v56 = vld [vmem:[#allocation7 + $0x1840] ss:$16 sps:$4 sm:$0xff]  }
 0x5fd   : > { %v12349_v22 = vld [vmem:[#allocation7 + $0x1848] ss:$16 sps:$4 sm:$0xff]  }
 0x5ff   : > { %8403 = vmatpush1.bf16.msra.mxu1 %v12280_v34  ;;  %8444 = vmatpush1.bf16.msra.mxu0 %v12283_v30  ;;  %v12354_v34 = vld [vmem:[#allocation7 + $0x1864] ss:$16 sps:$4 sm:$0xff]   ;;  %v12357_v30 = vld [vmem:[#allocation7 + $0x186c] ss:$16 sps:$4 sm:$0xff]  }
 0x600   : > { %8669 = vmatprep.subr.bf16.mxu1 %v12288_v8  ;;  %8710 = vmatprep.subr.bf16.mxu0 %v12291_v25  ;;  %v12352_v8 = vld [vmem:[#allocation7 + $0x1860] ss:$16 sps:$4 sm:$0xff]   ;;  %v12355_v25 = vld [vmem:[#allocation7 + $0x1868] ss:$16 sps:$4 sm:$0xff]  }
 0x602   : > { %8421 = vmatmul.mubr.bf16.vlgmr.msra.gmra.mrb[148].mxu1 %v8226_v41  ;;  %8462 = vmatmul.mubr.bf16.vlgmr.msra.gmra.mrb[152].mxu0 %v8226_v41  ;;  %v12358_v41 = vld [vmem:[#allocation7 + $0x1880] ss:$16 sps:$4 sm:$0xff]  }
 0x603   : > { %8670 = vmatpush1.bf16.msra.mxu1 %v12286_v31  ;;  %8711 = vmatpush1.bf16.msra.mxu0 %v12289_v36  ;;  %v12360_v31 = vld [vmem:[#allocation7 + $0x1884] ss:$16 sps:$4 sm:$0xff]   ;;  %v12363_v36 = vld [vmem:[#allocation7 + $0x188c] ss:$16 sps:$4 sm:$0xff]  }
 0x604   : > { %8671 = vmatprep.subr.bf16.mxu1 %v12294_v42  ;;  %8712 = vmatprep.subr.bf16.mxu0 %v12297_v44  ;;  %v12366_v42 = vld [vmem:[#allocation7 + $0x18a4] ss:$16 sps:$4 sm:$0xff]   ;;  %v12369_v44 = vld [vmem:[#allocation7 + $0x18ac] ss:$16 sps:$4 sm:$0xff]  }
 0x605   : > { %8701 = vmatprep.mubr.bf16.mxu1 %v12709_v0  ;;  %8742 = vmatprep.mubr.bf16.mxu0 %v12709_v0 }
 0x607   : > { %8672 = vmatpush1.bf16.msra.mxu1 %v12292_v38  ;;  %8713 = vmatpush1.bf16.msra.mxu0 %v12295_v46  ;;  %v12364_v38 = vld [vmem:[#allocation7 + $0x18a0] ss:$16 sps:$4 sm:$0xff]   ;;  %v12367_v46 = vld [vmem:[#allocation7 + $0x18a8] ss:$16 sps:$4 sm:$0xff]  }
 0x608   : > { %8673 = vmatprep.subr.bf16.mxu1 %v12300_v2  ;;  %8714 = vmatprep.subr.bf16.mxu0 %v12303_v43  ;;  %v12372_v2 = vld [vmem:[#allocation7 + $0x18c4] ss:$16 sps:$4 sm:$0xff]   ;;  %v12375_v43 = vld [vmem:[#allocation7 + $0x18cc] ss:$16 sps:$4 sm:$0xff]  }
 0x60b   : > { %8674 = vmatpush1.bf16.msra.mxu1 %v12298_v48  ;;  %8715 = vmatpush1.bf16.msra.mxu0 %v12301_v49 }
 0x60c   : > { %8675 = vmatprep.subr.bf16.mxu1 %v12306_v13  ;;  %8716 = vmatprep.subr.bf16.mxu0 %v12309_v50 }
 0x60f   : > { %8676 = vmatpush1.bf16.msra.mxu1 %v12304_v52  ;;  %8717 = vmatpush1.bf16.msra.mxu0 %v12307_v45 }
 0x610   : > { %8677 = vmatprep.subr.bf16.mxu1 %v12312_v55  ;;  %8718 = vmatprep.subr.bf16.mxu0 %v12315_v58 }
 0x613   : > { %8678 = vmatpush1.bf16.msra.mxu1 %v12310_v60  ;;  %8719 = vmatpush1.bf16.msra.mxu0 %v12313_v62 }
 0x614   : > { %8679 = vmatprep.subr.bf16.mxu1 %v12318_v63  ;;  %8720 = vmatprep.subr.bf16.mxu0 %v12321_v51  ;;  %v12370_v63 = vld [vmem:[#allocation7 + $0x18c0] ss:$16 sps:$4 sm:$0xff]   ;;  %v12373_v51 = vld [vmem:[#allocation7 + $0x18c8] ss:$16 sps:$4 sm:$0xff]  }
 0x615   : > { %v6733_v4 = vpop.f32.mrb[124].mxu1  ;;  %v6774_v6 = vpop.f32.mrb[128].mxu0 }
 0x616   : > { %v13589_v7 = vadd.f32 %v6733_v4, %v13574_v19  ;;  %v13592_v33 = vadd.f32 %v6774_v6, %v13577_v20  ;;  %v6735_v9 = vpop.f32.mrb[125].mxu1  ;;  %v6776_v14 = vpop.f32.mrb[129].mxu0  ;;  %v12328_v19 = vld [vmem:[#allocation7 + $0x17e0] ss:$16 sps:$4 sm:$0xff]   ;;  %v12331_v20 = vld [vmem:[#allocation7 + $0x17e8] ss:$16 sps:$4 sm:$0xff]  }
 0x617   : > { %v13595_v11 = vadd.f32 %v6735_v9, %v13580_v24  ;;  %v13598_v57 = vadd.f32 %v6776_v14, %v13583_v26  ;;  %v6737_v10 = vpop.f32.mrb[126].mxu1  ;;  %v6778_v12 = vpop.f32.mrb[130].mxu0  ;;  %8680 = vmatpush1.bf16.msra.mxu1 %v12316_v1  ;;  %8721 = vmatpush1.bf16.msra.mxu0 %v12319_v53  ;;  %v12334_v24 = vld [vmem:[#allocation7 + $0x1800] ss:$16 sps:$4 sm:$0xff]   ;;  %v12337_v26 = vld [vmem:[#allocation7 + $0x1808] ss:$16 sps:$4 sm:$0xff]  }
 0x618   : > { %v6738_v28 = vpop.f32.mrb[127].mxu1  ;;  %v6779_v17 = vpop.f32.mrb[131].mxu0  ;;  %8681 = vmatprep.subr.bf16.mxu1 %v12324_v3  ;;  %8722 = vmatprep.subr.bf16.mxu0 %v12327_v5  ;;  %v12378_v3 = vld [vmem:[#allocation7 + $0x18e4] ss:$16 sps:$4 sm:$0xff]   ;;  %v12381_v5 = vld [vmem:[#allocation7 + $0x18ec] ss:$16 sps:$4 sm:$0xff]  }
 0x619   : > { %v12376_v4 = vld [vmem:[#allocation7 + $0x18e0] ss:$16 sps:$4 sm:$0xff]   ;;  %v12379_v6 = vld [vmem:[#allocation7 + $0x18e8] ss:$16 sps:$4 sm:$0xff]  }
 0x61b   : > { %8682 = vmatpush1.bf16.msra.mxu1 %v12322_v40  ;;  %8723 = vmatpush1.bf16.msra.mxu0 %v12325_v16 }
 0x61c   : > { %8683 = vmatprep.subr.bf16.mxu1 %v12330_v18  ;;  %8724 = vmatprep.subr.bf16.mxu0 %v12333_v54 }
 0x61f   : > { %8684 = vmatpush1.bf16.msra.mxu1 %v12328_v19  ;;  %8725 = vmatpush1.bf16.msra.mxu0 %v12331_v20 }
 0x620   : > { %8950 = vmatprep.subr.bf16.mxu1 %v12336_v21  ;;  %8991 = vmatprep.subr.bf16.mxu0 %v12339_v23 }
 0x622   : > { %8702 = vmatmul.mubr.bf16.vlgmr.msra.gmra.mrb[152].mxu1 %v8507_v15  ;;  %8743 = vmatmul.mubr.bf16.vlgmr.msra.gmra.mrb[156].mxu0 %v8507_v15 }
 0x623   : > { %8951 = vmatpush1.bf16.msra.mxu1 %v12334_v24  ;;  %8992 = vmatpush1.bf16.msra.mxu0 %v12337_v26 }
 0x624   : > { %8952 = vmatprep.subr.bf16.mxu1 %v12342_v27  ;;  %8993 = vmatprep.subr.bf16.mxu0 %v12345_v29 }
 0x625   : > { %8982 = vmatprep.mubr.bf16.mxu1 %v12709_v0  ;;  %9023 = vmatprep.mubr.bf16.mxu0 %v12709_v0  ;;  %v12361_v0 = vld [vmem:[#allocation7 + $0x1888] ss:$16 sps:$4 sm:$0xff]  }
 0x627   : > { %8953 = vmatpush1.bf16.msra.mxu1 %v12340_v37  ;;  %8994 = vmatpush1.bf16.msra.mxu0 %v12343_v59  ;;  %v12382_v59 = vld [vmem:[#allocation10 + $0x40] sm:$0xff]  }
 0x628   : > { %8954 = vmatprep.subr.bf16.mxu1 %v12348_v32  ;;  %8995 = vmatprep.subr.bf16.mxu0 %v12351_v39  ;;  %v12383_v32 = vld [vmem:[#allocation10 + $0xc0] sm:$0xff]  }
 0x629   : > { %v12384_v39 = vld [vmem:[#allocation10] sm:$0xff]  }
 0x62b   : > { %8955 = vmatpush1.bf16.msra.mxu1 %v12346_v56  ;;  %8996 = vmatpush1.bf16.msra.mxu0 %v12349_v22  ;;  %v12385_v56 = vld [vmem:[#allocation10 + $0x80] sm:$0xff]   ;;  %v12386_v22 = vld [vmem:[#allocation10 + $0x48] sm:$0xff]  }
 0x62c   : > { %8956 = vmatprep.subr.bf16.mxu1 %v12354_v34  ;;  %8997 = vmatprep.subr.bf16.mxu0 %v12357_v30  ;;  %v12387_v34 = vld [vmem:[#allocation10 + $0xc8] sm:$0xff]  }
 0x62d   : > { %v12388_v30 = vld [vmem:[#allocation10 + $0x8] sm:$0xff]  }
 0x62f   : > { %8957 = vmatpush1.bf16.msra.mxu1 %v12352_v8  ;;  %8998 = vmatpush1.bf16.msra.mxu0 %v12355_v25  ;;  %v12389_v8 = vld [vmem:[#allocation10 + $0x88] sm:$0xff]   ;;  %v12390_v25 = vld [vmem:[#allocation10 + $0x50] sm:$0xff]  }
 0x630   : > { %8958 = vmatprep.subr.bf16.mxu1 %v12360_v31  ;;  %8999 = vmatprep.subr.bf16.mxu0 %v12363_v36  ;;  %v12391_v31 = vld [vmem:[#allocation10 + $0xd0] sm:$0xff]  }
 0x631   : > { %v12392_v36 = vld [vmem:[#allocation10 + $0x10] sm:$0xff]  }
 0x633   : > { %8959 = vmatpush1.bf16.msra.mxu1 %v12358_v41  ;;  %9000 = vmatpush1.bf16.msra.mxu0 %v12361_v0  ;;  %v12393_v41 = vld [vmem:[#allocation10 + $0x90] sm:$0xff]   ;;  %v12394_v0 = vld [vmem:[#allocation10 + $0x58] sm:$0xff]  }
 0x634   : > { %8960 = vmatprep.subr.bf16.mxu1 %v12366_v42  ;;  %9001 = vmatprep.subr.bf16.mxu0 %v12369_v44  ;;  %v12395_v42 = vld [vmem:[#allocation10 + $0xd8] sm:$0xff]  }
 0x635   : > { %v7016_v48 = vpop.f32.mrb[128].mxu1  ;;  %v7057_v49 = vpop.f32.mrb[132].mxu0  ;;  %v12396_v44 = vld [vmem:[#allocation10 + $0x18] sm:$0xff]  }
 0x636   : > { %v7064_v13 = vadd.f32 %v7016_v48, %v13589_v7  ;;  %v7066_v50 = vadd.f32 %v7057_v49, %v13592_v33  ;;  %v7018_v52 = vpop.f32.mrb[129].mxu1  ;;  %v7059_v45 = vpop.f32.mrb[133].mxu0  ;;  %v8788_v7 = vrot.slane %v13333_v35, 4  ;;  %v12401_v48 = vld [vmem:[#allocation10 + $0xa0] sm:$0xff]  }
 0x637   : > { %v7065_v55 = vadd.f32 %v7018_v52, %v13595_v11  ;;  %v7067_v58 = vadd.f32 %v7059_v45, %v13598_v57  ;;  %v7020_v60 = vpop.f32.mrb[130].mxu1  ;;  %v7061_v62 = vpop.f32.mrb[134].mxu0  ;;  %8961 = vmatpush1.bf16.msra.mxu1 %v12364_v38  ;;  %9002 = vmatpush1.bf16.msra.mxu0 %v12367_v46  ;;  %v12397_v38 = vld [vmem:[#allocation10 + $0x98] sm:$0xff]   ;;  %v12398_v46 = vld [vmem:[#allocation10 + $0x60] sm:$0xff]  }
 0x638   : > { %v7021_v1 = vpop.f32.mrb[131].mxu1  ;;  %v7062_v53 = vpop.f32.mrb[135].mxu0  ;;  %8962 = vmatprep.subr.bf16.mxu1 %v12372_v2  ;;  %9003 = vmatprep.subr.bf16.mxu0 %v12375_v43  ;;  %v12399_v2 = vld [vmem:[#allocation10 + $0xe0] sm:$0xff]  }
 0x639   : > { %v12400_v43 = vld [vmem:[#allocation10 + $0x20] sm:$0xff]   ;;  %v12402_v53 = vld [vmem:[#allocation10 + $0x68] sm:$0xff]  }
 0x63b   : > { %8963 = vmatpush1.bf16.msra.mxu1 %v12370_v63  ;;  %9004 = vmatpush1.bf16.msra.mxu0 %v12373_v51 }
 0x63c   : > { %8964 = vmatprep.subr.bf16.mxu1 %v12378_v3  ;;  %9005 = vmatprep.subr.bf16.mxu0 %v12381_v5  ;;  %v12403_v3 = vld [vmem:[#allocation10 + $0xe8] sm:$0xff]  }
 0x63d   : > { %v12404_v5 = vld [vmem:[#allocation10 + $0x28] sm:$0xff]  }
 0x63f   : > { %8965 = vmatpush1.bf16.msra.mxu1 %v12376_v4  ;;  %9006 = vmatpush1.bf16.msra.mxu0 %v12379_v6  ;;  %v12405_v4 = vld [vmem:[#allocation10 + $0xa8] sm:$0xff]   ;;  %v12406_v6 = vld [vmem:[#allocation10 + $0x70] sm:$0xff]  }
 0x640   : > { %10837 = vmatprep.subr.bf16.mxu1 %v12382_v59  ;;  %10859 = vmatprep.subr.bf16.mxu0 %v12383_v32 }
 0x642   : > { %8983 = vmatmul.mubr.bf16.vlgmr.msra.gmra.mrb[156].mxu1 %v8788_v7  ;;  %9024 = vmatmul.mubr.bf16.vlgmr.msra.gmra.mrb[160].mxu0 %v8788_v7  ;;  %v12407_v7 = vld [vmem:[#allocation10 + $0xf0] sm:$0xff]  }
 0x643   : > { %10838 = vmatpush3.bf16.msra.mxu1 %v12384_v39  ;;  %10860 = vmatpush3.bf16.msra.mxu0 %v12385_v56 }
 0x644   : > { %10839 = vmatprep.subr.bf16.mxu1 %v12386_v22  ;;  %10861 = vmatprep.subr.bf16.mxu0 %v12387_v34 }
 0x647   : > { %10840 = vmatpush3.bf16.msra.mxu1 %v12388_v30  ;;  %10862 = vmatpush3.bf16.msra.mxu0 %v12389_v8 }
 0x648   : > { %10841 = vmatprep.subr.bf16.mxu1 %v12390_v25  ;;  %10863 = vmatprep.subr.bf16.mxu0 %v12391_v31 }
 0x64b   : > { %10842 = vmatpush3.bf16.msra.mxu1 %v12392_v36  ;;  %10864 = vmatpush3.bf16.msra.mxu0 %v12393_v41 }
 0x64c   : > { %10843 = vmatprep.subr.bf16.mxu1 %v12394_v0  ;;  %10865 = vmatprep.subr.bf16.mxu0 %v12395_v42 }
 0x64f   : > { %10844 = vmatpush3.bf16.msra.mxu1 %v12396_v44  ;;  %10866 = vmatpush3.bf16.msra.mxu0 %v12397_v38 }
 0x650   : > { %10845 = vmatprep.subr.bf16.mxu1 %v12398_v46  ;;  %10867 = vmatprep.subr.bf16.mxu0 %v12399_v2 }
 0x653   : > { %10846 = vmatpush3.bf16.msra.mxu1 %v12400_v43  ;;  %10868 = vmatpush3.bf16.msra.mxu0 %v12401_v48  ;;  %v9040_v43 = vsub.s32 0, %v13183_v47  ;;  %v9048_v48 = vsub.s32 2, %v13183_v47 }
 0x654   : > { %10847 = vmatprep.subr.bf16.mxu1 %v12402_v53  ;;  %10869 = vmatprep.subr.bf16.mxu0 %v12403_v3 }
 0x655   : > { %v7298_v33 = vpop.f32.mrb[132].mxu1  ;;  %v7339_v9 = vpop.f32.mrb[136].mxu0 }
 0x656   : > { %v7346_v14 = vadd.f32 %v7298_v33, %v7064_v13  ;;  %v7348_v11 = vadd.f32 %v7339_v9, %v7066_v50  ;;  %v7300_v57 = vpop.f32.mrb[133].mxu1  ;;  %v7341_v10 = vpop.f32.mrb[137].mxu0  ;;  %v12408_v33 = vld [vmem:[#allocation10 + $0x30] sm:$0xff]  }
 0x657   : > { %v7347_v12 = vadd.f32 %v7300_v57, %v7065_v55  ;;  %v7349_v40 = vadd.f32 %v7341_v10, %v7067_v58  ;;  %v7302_v16 = vpop.f32.mrb[134].mxu1  ;;  %v7343_v28 = vpop.f32.mrb[138].mxu0  ;;  %10848 = vmatpush3.bf16.msra.mxu1 %v12404_v5  ;;  %10870 = vmatpush3.bf16.msra.mxu0 %v12405_v4  ;;  %v12409_v9 = vld [vmem:[#allocation10 + $0xb0] sm:$0xff]   ;;  %v12412_v57 = vld [vmem:[#allocation10 + $0x38] sm:$0xff]  }
 0x658   : > { %v7303_v17 = vpop.f32.mrb[135].mxu1  ;;  %v7344_v18 = vpop.f32.mrb[139].mxu0  ;;  %10849 = vmatprep.subr.bf16.mxu1 %v12406_v6  ;;  %10871 = vmatprep.subr.bf16.mxu0 %v12407_v7  ;;  %v12413_v10 = vld [vmem:[#allocation10 + $0xb8] sm:$0xff]  }
 0x65b   : > { %10850 = vmatpush3.bf16.msra.mxu1 %v12408_v33  ;;  %10872 = vmatpush3.bf16.msra.mxu0 %v12409_v9 }
 0x675   : > { %v7579_v54 = vpop.f32.mrb[136].mxu1  ;;  %v7620_v19 = vpop.f32.mrb[140].mxu0 }
 0x676   : > { %v7627_v20 = vadd.f32 %v7579_v54, %v7346_v14  ;;  %v7629_v21 = vadd.f32 %v7620_v19, %v7348_v11  ;;  %v7581_v23 = vpop.f32.mrb[137].mxu1  ;;  %v7622_v35 = vpop.f32.mrb[141].mxu0  ;;  %v12410_v14 = vld [vmem:[#allocation10 + $0x78] sm:$0xff]  }
 0x677   : > { %v7628_v24 = vadd.f32 %v7581_v23, %v7347_v12  ;;  %v7630_v26 = vadd.f32 %v7622_v35, %v7349_v40  ;;  %v7583_v15 = vpop.f32.mrb[138].mxu1  ;;  %v7624_v27 = vpop.f32.mrb[142].mxu0  ;;  %v12411_v11 = vld [vmem:[#allocation10 + $0xf8] sm:$0xff]   ;;  %10851 = vmatprep.subr.bf16.mxu1 %v12410_v14 }
 0x678   : > { %v7584_v29 = vpop.f32.mrb[139].mxu1  ;;  %v7625_v37 = vpop.f32.mrb[143].mxu0  ;;  %10873 = vmatprep.subr.bf16.mxu0 %v12411_v11  ;;  %10852 = vmatpush3.bf16.msra.mxu1 %v12412_v57 }
 0x679   : > { %10874 = vmatpush3.bf16.msra.mxu0 %v12413_v10  ;;  %10916 = vmatprep.subr.bf16.mxu1 %v12710_v61 }
 0x695   : > { %v7860_v49 = vpop.f32.mrb[140].mxu1  ;;  %v7901_v13 = vpop.f32.mrb[144].mxu0 }
 0x696   : > { %v7908_v50 = vadd.f32 %v7860_v49, %v7627_v20  ;;  %v7910_v52 = vadd.f32 %v7901_v13, %v7629_v21  ;;  %v7862_v45 = vpop.f32.mrb[141].mxu1  ;;  %v7903_v55 = vpop.f32.mrb[145].mxu0  ;;  %v9036_v49 = vld [vmem:[#allocation8] sm:$0xf]  ;;  %v9044_v13 = vsub.s32 1, %v13183_v47 }
 0x697   : > { %v7909_v58 = vadd.f32 %v7862_v45, %v7628_v24  ;;  %v7911_v60 = vadd.f32 %v7903_v55, %v7630_v26  ;;  %v7864_v62 = vpop.f32.mrb[142].mxu1  ;;  %v7905_v63 = vpop.f32.mrb[146].mxu0  ;;  %v9049_v45 = vrot.slane %v9036_v49, %v9048_v48 }
 0x698   : > { %v7865_v51 = vpop.f32.mrb[143].mxu1  ;;  %v7906_v1 = vpop.f32.mrb[147].mxu0  ;;  %v9045_v62 = vrot.slane %v9036_v49, %v9044_v13 }
 0x6b5   : > { %v8141_v12 = vpop.f32.mrb[144].mxu1  ;;  %v8182_v40 = vpop.f32.mrb[148].mxu0 }
 0x6b6   : > { %v8189_v16 = vadd.f32 %v8141_v12, %v7908_v50  ;;  %v8191_v28 = vadd.f32 %v8182_v40, %v7910_v52  ;;  %v8143_v17 = vpop.f32.mrb[145].mxu1  ;;  %v8184_v18 = vpop.f32.mrb[149].mxu0  ;;  %v9052_v50 = vsub.s32 3, %v13183_v47  ;;  %v9041_v52 = vrot.slane %v9036_v49, %v9040_v43 }
 0x6b7   : > { %v8190_v54 = vadd.f32 %v8143_v17, %v7909_v58  ;;  %v8192_v19 = vadd.f32 %v8184_v18, %v7911_v60  ;;  %v8145_v20 = vpop.f32.mrb[146].mxu1  ;;  %v8186_v21 = vpop.f32.mrb[150].mxu0  ;;  %v9066_v58 = vld [vmem:[%s505_s26] sm:$0xf] }
 0x6b8   : > { %v8146_v23 = vpop.f32.mrb[147].mxu1  ;;  %v8187_v35 = vpop.f32.mrb[151].mxu0  ;;  %v9053_v63 = vrot.slane %v9036_v49, %v9052_v50  ;;  %v9071_v33 = vrot.slane %v9066_v58, %v9040_v43  ;;  %v9079_v14 = vrot.slane %v9066_v58, %v9048_v48  ;;  %v9075_v40 = vrot.slane %v9066_v58, %v9044_v13  ;;  %v9453_v13 = vld [vmem:[#allocation13] sm:$0x1] }
 0x6d5   : > { %v8422_v24 = vpop.f32.mrb[148].mxu1  ;;  %v8463_v26 = vpop.f32.mrb[152].mxu0 }
 0x6d6   : > { %v8470_v15 = vadd.f32 %v8422_v24, %v8189_v16  ;;  %v8472_v27 = vadd.f32 %v8463_v26, %v8191_v28  ;;  %v8424_v29 = vpop.f32.mrb[149].mxu1  ;;  %v8465_v37 = vpop.f32.mrb[153].mxu0  ;;  %v9083_v16 = vrot.slane %v9066_v58, %v9052_v50  ;;  %v12414_v26 = vld [vmem:[%s13707_s7] sm:$0xff]  }
 0x6d7   : > { %v8471_v59 = vadd.f32 %v8424_v29, %v8190_v54  ;;  %v8473_v32 = vadd.f32 %v8465_v37, %v8192_v19  ;;  %v8426_v39 = vpop.f32.mrb[150].mxu1  ;;  %v8467_v56 = vpop.f32.mrb[154].mxu0  ;;  %v12415_v29 = vld [vmem:[%s13707_s7 + $0x8] sm:$0xff]   ;;  %v12416_v37 = vld [vmem:[%s13707_s7 + $0x10] sm:$0xff]  }
 0x6d8   : > { %v8427_v22 = vpop.f32.mrb[151].mxu1  ;;  %v8468_v34 = vpop.f32.mrb[155].mxu0  ;;  %v12419_v39 = vld [vmem:[%s13707_s7 + $0x28] sm:$0xff]   ;;  %v12420_v56 = vld [vmem:[%s13707_s7 + $0x30] sm:$0xff]  }
 0x6d9   : > { %v12421_v22 = vld [vmem:[%s13707_s7 + $0x38] sm:$0xff]  }
 0x6f5   : > { %v8703_v30 = vpop.f32.mrb[152].mxu1  ;;  %v8744_v8 = vpop.f32.mrb[156].mxu0 }
 0x6f6   : > { %v8751_v25 = vadd.f32 %v8703_v30, %v8470_v15  ;;  %v8753_v31 = vadd.f32 %v8744_v8, %v8472_v27  ;;  %v8705_v36 = vpop.f32.mrb[153].mxu1  ;;  %v8746_v41 = vpop.f32.mrb[157].mxu0  ;;  %v9160_v8 = vld [vmem:[#allocation11] sm:$0x1] }
 0x6f7   : > { %v8752_v0 = vadd.f32 %v8705_v36, %v8471_v59  ;;  %v8754_v42 = vadd.f32 %v8746_v41, %v8473_v32  ;;  %v8707_v44 = vpop.f32.mrb[154].mxu1  ;;  %v8748_v38 = vpop.f32.mrb[158].mxu0  ;;  %v12417_v59 = vld [vmem:[%s13707_s7 + $0x18] sm:$0xff]   ;;  %v12418_v32 = vld [vmem:[%s13707_s7 + $0x20] sm:$0xff]  }
 0x6f8   : > { %v8708_v46 = vpop.f32.mrb[155].mxu1  ;;  %v8749_v2 = vpop.f32.mrb[159].mxu0 }
 0x6f9   : > { %v9434_v2 = vld [vmem:[%s508_s23] sm:$0x1] }
 0x715   : > { %v8984_v55 = vpop.f32.mrb[156].mxu1  ;;  %v9025_v60 = vpop.f32.mrb[160].mxu0 }
 0x716   : > { %v9032_v51 = vadd.f32 %v8984_v55, %v8751_v25  ;;  %v9034_v1 = vadd.f32 %v9025_v60, %v8753_v31  ;;  %v8986_v53 = vpop.f32.mrb[157].mxu1  ;;  %v9027_v3 = vpop.f32.mrb[161].mxu0 }
 0x717   : > { %v9033_v5 = vadd.f32 %v8986_v53, %v8752_v0  ;;  %v9035_v4 = vadd.f32 %v9027_v3, %v8754_v42  ;;  %v8988_v6 = vpop.f32.mrb[158].mxu1  ;;  %v9029_v7 = vpop.f32.mrb[162].mxu0 }
 0x718   : > { %v9058_v47 = vadd.f32 %v9041_v52, %v9032_v51  ;;  %v9060_v9 = vadd.f32 %v9049_v45, %v9034_v1  ;;  %v8989_v11 = vpop.f32.mrb[159].mxu1  ;;  %v9030_v57 = vpop.f32.mrb[163].mxu0 }
 0x719   : > { %v9059_v10 = vadd.f32 %v9045_v62, %v9033_v5  ;;  %v9061_v12 = vadd.f32 %v9053_v63, %v9035_v4 }
 0x71a   : > { %v9062_v28 = vmax.f32 %v9058_v47, 0.0  ;;  %v9064_v17 = vmax.f32 %v9060_v9, 0.0 }
 0x71b   : > { %v9063_v18 = vmax.f32 %v9059_v10, 0.0  ;;  %v9065_v54 = vmax.f32 %v9061_v12, 0.0 }
 0x71c   : > { %v9088_v19 = vmul.f32 %v9071_v33, %v9062_v28  ;;  %v9090_v20 = vmul.f32 %v9079_v14, %v9064_v17 }
 0x71d   : > { %v9089_v21 = vmul.f32 %v9075_v40, %v9063_v18  ;;  %v9091_v23 = vmul.f32 %v9083_v16, %v9065_v54 }
 0x71e   : > { %v9092_v15 = vpack.c.bf16 %v9088_v19, %v9088_v19  ;;  %v9094_v27 = vpack.c.bf16 %v9090_v20, %v9090_v20 }
 0x71f   : > { %v9093_v35 = vpack.c.bf16 %v9089_v21, %v9089_v21  ;;  %v9095_v24 = vpack.c.bf16 %v9091_v23, %v9091_v23 }
 0x721   : > { %9385 = vmatprep.mubr.bf16.mxu1 %v9093_v35  ;;  %9425 = vmatprep.mubr.bf16.mxu0 %v9095_v24 }
 0x722   : > { %9386 = vmatmul.mubr.bf16.vlgmr.msra.gmra.mrb[160].mxu1 %v9092_v15  ;;  %9426 = vmatmul.mubr.bf16.vlgmr.msra.gmra.mrb[164].mxu0 %v9094_v27 }
 0x723   : > { %10917 = vmatpush3.bf16.msra.mxu1 %v12414_v26  ;;  %10932 = vmatprep.mubr.msk.bf16.mxu1 %vm12712_vm12, %v12710_v61 }
 0x724   : > { %10918 = vmatprep.subr.bf16.mxu1 %v12710_v61 }
 0x727   : > { %10919 = vmatpush3.bf16.msra.mxu1 %v12415_v29 }
 0x728   : > { %10920 = vmatprep.subr.bf16.mxu1 %v12710_v61 }
 0x72b   : > { %10921 = vmatpush3.bf16.msra.mxu1 %v12416_v37 }
 0x72c   : > { %10922 = vmatprep.subr.bf16.mxu1 %v12710_v61 }
 0x72f   : > { %10923 = vmatpush3.bf16.msra.mxu1 %v12417_v59 }
 0x730   : > { %10924 = vmatprep.subr.bf16.mxu1 %v12710_v61 }
 0x733   : > { %10925 = vmatpush3.bf16.msra.mxu1 %v12418_v32 }
 0x734   : > { %10926 = vmatprep.subr.bf16.mxu1 %v12710_v61 }
 0x737   : > { %10927 = vmatpush3.bf16.msra.mxu1 %v12419_v39 }
 0x738   : > { %10928 = vmatprep.subr.bf16.mxu1 %v12710_v61 }
 0x73b   : > { %10929 = vmatpush3.bf16.msra.mxu1 %v12420_v56 }
 0x73c   : > { %10930 = vmatprep.subr.bf16.mxu1 %v12710_v61 }
 0x73f   : > { %10931 = vmatpush3.bf16.msra.mxu1 %v12421_v22 }
 0x7f5   : > { %v10853_v34 = vpop.f32.mrb[160].mxu1  ;;  %v10875_v30 = vpop.f32.mrb[164].mxu0 }
 0x7f6   : > { %v10854_v25 = vpop.f32.mrb[161].mxu1  ;;  %v10876_v31 = vpop.f32.mrb[165].mxu0 }
 0x7f7   : > { %v10855_v36 = vadd.f32 %v10854_v25, %v10853_v34  ;;  %v10877_v41 = vadd.f32 %v10876_v31, %v10875_v30  ;;  %v10856_v0 = vpop.f32.mrb[162].mxu1  ;;  %v10878_v42 = vpop.f32.mrb[166].mxu0 }
 0x7f8   : > { %v10857_v44 = vpop.f32.mrb[163].mxu1  ;;  %v10879_v38 = vpop.f32.mrb[167].mxu0 }
 0x7f9   : > { %v9388_v46 = vadd.f32 %v10855_v36, %v9160_v8 }
 0x7fb   : > { %v9428_v61 = vadd.f32 %v10877_v41, %v9388_v46 }
 0x7fd   : > { %v9433_v43 = vmax.f32 %v9428_v61, 0.0 }
 0x7ff   : > { %v9435_v48 = vmul.f32 %v9434_v2, %v9433_v43 }
 0x801   : > { %v9436_v49 = vpack.c.bf16 %v9435_v48, %v9435_v48 }
 0x803   : > { %10933 = vmatmul.mubr.bf16.vlgmr.msra.gmra.mrb[164].mxu1 %v9436_v49 }
 0x8d6   : > { %v9536_v50 = vpop.f32.mrb[164].mxu1 }
 0x8d7   : > { %v9537_v52 = vadd.f32 %v9536_v50, %v9453_v13  ;;  %v10934_v45 = vpop.f32.mrb[165].mxu1 }
 0x8d8   : > { %v9539_v55 = vpop.f32.mrb[166].mxu1 }
 0x8d9   : > { %v10935_v58 = vpop.f32.mrb[167].mxu1  ;;  %9543 = vst.msk [vmem:[%s496_s30] sm:$0x1] %vm9542_vm13, %v9537_v52 }
 0x8da   : > { %12631 = shalt.err (!%p12628_p6)
}
 0x8db   : > { %s12632_s13 = scalar_lea.hbm %s13658_s29, 16  ;;  %s12636_s28 = scalar_lea.hbm %s13711_s11, 32 }
 0x8dc   : > { %p12633_p5 = scmp.ne.s32.totalorder %s13658_s29, %s12632_s13  ;;  %p12637_p10 = scmp.lt.u32.totalorder %s13658_s29, %s13711_s11 }
 0x8dd   : > { %p12638_p2 = scmp.lt.u32.totalorder %s12636_s28, %s12632_s13  ;;  %p12640_p4 = scmp.lt.u32.totalorder %s12632_s13, %s13658_s29 }
 0x8de   : > { %p12634_p9 = pnand %p12633_p5, %p13753_p7 }
 0x8df   : > { %p12639_p3 = por %p12638_p2, %p12637_p10 }
 0x8e0   : > { %p12635_p12 = pneg %p12634_p9 }
 0x8e1   : > { %p12641_p8 = por %p12640_p4, %p12639_p3 }
 0x8e3   : > { %p12642_p11 = pnand %p12641_p8, %p12635_p12 }
 0x8e5   : > { %12645 = shalt.err (!%p12642_p11)
}
 0x8e6   : > { %10987 = dma.vmem_to_hbm [thread:$0]  (%p13753_p7), %s13660_s19, 16, %s13658_s29, %s9545_s21  }
 0x8e7 PF: > { %s13754_s26 = sld [smem:[#allocation20_spill]]  ;;  %s13755_s23 = sld [smem:[#allocation24_spill]] }
 0x8e8   : > { %p11029_p13 = scmp.ge.s32.totalorder %s12696_s20, 2 }
 0x8ed   : > { %s9569_s2 = sand.u32 1, %s13754_s26   ;;  %p13756_p1 = scmp.ne.s32.totalorder %s13755_s23, 0 }
 0x8ee   : > { %s9570_s4 = scalar_lea.sflag [#allocation4], %s9569_s2 }
 0x8ef   : > { %p11012_p0 = pnand %p11029_p13, %p13756_p1 }
 0x8f1   : > { %12679 = dma.done.wait (!%p11012_p0), %s9570_s4, 16  }
 0x8f2   : > { %12681 = vsyncadd (!%p11012_p0), %s9570_s4, 4294967280  ;;  %s13757_s20 = sld [smem:[#allocation22_spill]]  ;;  %s13758_s30 = sld [smem:[#allocation21_spill]] }
 0x8f3   : > { %s13759_s19 = sld [smem:[#allocation23_spill]]  ;;  %s13760_s17 = smov %s12688_s18 }
 0x8f8   : > { %p25_p6 = scmp.ge.s32.totalorder %s13757_s20, 4   ;;  %s13761_s18 = smov %s13758_s30 }
 0x8fa   :  { %27 = sbr.rel (!%p25_p6) target bundleno = 12 (0xc), region = 160 }
 0x901   :  { %9574 = vsyncpa [#allocation3], 1 }
 0x902   :  { %9576 = vsyncpa [#allocation3 + $0x1], 1 }
 0x903   :  { %9577 = vsyncpa [#allocation6], 1 }
 0x904   :  { %9578 = vsyncpa [#allocation9], 1 }
 0x905   :  { %9579 = vsyncpa [#allocation12], 1 }
 0x906   :  { %9580 = vsyncpa [#allocation4], 1 }
 0x907   :  { %9582 = vsyncpa [#allocation4 + $0x1], 1 }

</bundles_post_ra>
